<compile_context>
chip_gen: v5e
topology: v5e:2x2
jax: 0.10.0
libtpu: 0.0.40
codegen_flags: <defaults>
</compile_context>

<pallas_src>
import numpy as np
import jax
import jax.numpy as jnp
from jax import lax
from jax.experimental import pallas as pl
from jax.experimental.pallas import tpu as pltpu

SIZE = 10                     # SpatialInput hidden size
N_COMP = 3                    # x, y, z components
N_FEAT = 9                    # per-component spatial features
IN_ROWS = N_COMP * N_FEAT     # 27 flattened spatial features
OUT_DIM = 9                   # final actor output
HALF = N_COMP * SIZE          # 30  (concat of the three SpatialInputs)
GCOLS = 2 * HALF              # 60  (normal pass 0:30, sign-inverted pass 30:60)

# Row layout of the single packed parameter buffer (8-sublane-aligned sections).
ROW_LOC, ROW_VEL, ROW_ANG, ROW_NRM = 0, 32, 64, 96   # four [27, 60] group weights
ROW_FIN = 128                                        # [60, 9] combined output layer
ROW_BIAS = 192                                       # rows: b_loc, b_vel, b_ang, b_final
P_ROWS, P_COLS = 200, 64

_HP = lax.Precision.HIGHEST   # keep f32 accuracy on the MXU (review: don't drop to bf16)


def _round_up(x, m):
    return (x + m - 1) // m * m


# --------------------------------- kernel ---------------------------------

def symmetric_kernel(x_ref, p_ref, o_ref):
    """x_ref: [bt, 27] spatial block, p_ref: [200, 64] packed params,
    o_ref: [bt, 9] final (post-tanh) output block."""
    x = x_ref[...]                                           # [bt, 27]

    def dot(a, b):
        return jnp.dot(a, b, preferred_element_type=jnp.float32, precision=_HP)

    w_loc = p_ref[ROW_LOC:ROW_LOC + IN_ROWS, :GCOLS]         # [27, 60] block-sparse
    w_vel = p_ref[ROW_VEL:ROW_VEL + IN_ROWS, :GCOLS]
    w_ang = p_ref[ROW_ANG:ROW_ANG + IN_ROWS, :GCOLS]
    w_nrm = p_ref[ROW_NRM:ROW_NRM + IN_ROWS, :GCOLS]
    b_loc = p_ref[ROW_BIAS + 0:ROW_BIAS + 1, :GCOLS]         # [1, 60]
    b_vel = p_ref[ROW_BIAS + 1:ROW_BIAS + 2, :GCOLS]
    b_ang = p_ref[ROW_BIAS + 2:ROW_BIAS + 3, :GCOLS]

    # SpatialInput for all three components AND both sign passes at once:
    # four MXU matmuls + three elementwise multiplies -> [bt, 60].
    prod = ((dot(x, w_loc) + b_loc)
            * (dot(x, w_vel) + b_vel)
            * (dot(x, w_ang) + b_ang)
            * dot(x, w_nrm))                                 # normal has no bias

    # 30->9 linear, the +6/-3 symmetric combine and its bias folded into a
    # single [60, 9] matmul (rows 30:60 carry the sign-flipped output weights).
    w_fin = p_ref[ROW_FIN:ROW_FIN + GCOLS, :OUT_DIM]         # [60, 9]
    b_fin = p_ref[ROW_BIAS + 3:ROW_BIAS + 4, :OUT_DIM]       # [1, 9] = bfin*(1+comb)
    o_ref[...] = jnp.tanh(dot(prod, w_fin) + b_fin)          # [bt, 9]


# ------------------------------ wrapper / glue -----------------------------

def symmetric_forward(spatial, car_stats, kparams, block_b=4096):
    """spatial: [B, 3, 9] f32, car_stats unused (as in the reference). -> [B, 9]."""
    del car_stats  # the PyTorch model never reads it in forward()
    B = spatial.shape[0]

    x = spatial.reshape(B, IN_ROWS)                 # bitcast only, no transpose
    # Tile so the batch grid has >= 2 steps whenever B allows it (v7x: 2 TCs),
    # bt a multiple of 128; raise block_b for very large B to amortize the
    # ~0.35us/step pipeline overhead (working set stays tiny vs VMEM).
    bt = max(128, min(block_b, _round_up((B + 1) // 2, 128)))
    b_pad = _round_up(B, bt)
    if b_pad != B:
        x = jnp.pad(x, ((0, b_pad - B), (0, 0)))    # zero rows -> finite garbage, sliced off

    out = pl.pallas_call(
        symmetric_kernel,
        out_shape=jax.ShapeDtypeStruct((b_pad, OUT_DIM), jnp.float32),
        grid_spec=pltpu.PrefetchScalarGridSpec(
            num_scalar_prefetch=0,
            grid=(b_pad // bt,),
            in_specs=[
                pl.BlockSpec((bt, IN_ROWS), lambda i: (i, 0)),
                pl.BlockSpec((P_ROWS, P_COLS), lambda i: (0, 0)),  # packed params
            ],
            out_specs=pl.BlockSpec((bt, OUT_DIM), lambda i: (i, 0)),
        ),
        compiler_params=pltpu.CompilerParams(
            dimension_semantics=("parallel",)),
    )(x, kparams["packed"])

    return out[:B]


def init_params(key):
    """Deterministic synthetic parameters (PyTorch-Linear-like uniform init).

    Weights are stored as [in_features, out_features], stacked over the 3
    components (same convention as the plain-JAX reference below).
    """
    keys = jax.random.split(key, 9)

    def unif(k, shape, fan_in):
        bound = 1.0 / np.sqrt(fan_in)
        return jax.random.uniform(k, shape, jnp.float32, -bound, bound)

    return dict(
        wloc=unif(keys[0], (N_COMP, 2, SIZE), 2),
        bloc=unif(keys[1], (N_COMP, SIZE), 2),
        wvel=unif(keys[2], (N_COMP, 2, SIZE), 2),
        bvel=unif(keys[3], (N_COMP, SIZE), 2),
        wang=unif(keys[4], (N_COMP, 2, SIZE), 2),
        bang=unif(keys[5], (N_COMP, SIZE), 2),
        wnorm=unif(keys[6], (N_COMP, 3, SIZE), 3),
        wfin=unif(keys[7], (N_COMP * SIZE, OUT_DIM), N_COMP * SIZE),
        bfin=unif(keys[8], (1, OUT_DIM), N_COMP * SIZE),
    )


def _sign_matrix():
    """Sign pattern SymmetricModel applies to build spatial_inv."""
    sign = np.ones((N_COMP, N_FEAT), np.float32)
    sign[0, :] *= -1.0        # spatial_inv[:, 0] *= -1
    sign[:, 7] *= -1.0        # spatial_inv[:, :, 7] *= -1
    sign[:, 4:6] *= -1.0      # spatial_inv[:, :, 4:6] *= -1
    return sign


def prepare_kernel_params(p):
    """Pack all weights/biases into one [200, 64] f32 buffer for the kernel.

    Each group weight is a block-sparse [27, 60] matrix: columns c*10+h hold
    the normal-pass linear of component c; columns 30+c*10+h hold the same
    linear with the spatial_inv signs folded into the weights.  The final
    [60, 9] block folds Linear(30, 9), the +6/-3 combine and its bias."""
    sign = _sign_matrix()

    def group_block(w_g, f0, f1):
        w_np = np.asarray(w_g, np.float32)           # [3, f1-f0, SIZE]
        W = np.zeros((IN_ROWS, GCOLS), np.float32)
        for c in range(N_COMP):
            rows = slice(c * N_FEAT + f0, c * N_FEAT + f1)
            W[rows, c * SIZE:(c + 1) * SIZE] = w_np[c]
            W[rows, HALF + c * SIZE:HALF + (c + 1) * SIZE] = (
                w_np[c] * sign[c, f0:f1, None])
        return W

    def bias_row(b_g):
        b = np.asarray(b_g, np.float32).reshape(HALF)   # order c*SIZE + h
        return np.concatenate([b, b])                   # same bias for both passes

    wfin = np.asarray(p["wfin"], np.float32)            # [30, 9]
    bfin = np.asarray(p["bfin"], np.float32).reshape(OUT_DIM)
    comb = np.array([1.0] * 6 + [-1.0] * 3, np.float32)

    packed = np.zeros((P_ROWS, P_COLS), np.float32)
    packed[ROW_LOC:ROW_LOC + IN_ROWS, :GCOLS] = group_block(p["wloc"], 0, 2)
    packed[ROW_VEL:ROW_VEL + IN_ROWS, :GCOLS] = group_block(p["wvel"], 2, 4)
    packed[ROW_ANG:ROW_ANG + IN_ROWS, :GCOLS] = group_block(p["wang"], 4, 6)
    packed[ROW_NRM:ROW_NRM + IN_ROWS, :GCOLS] = group_block(p["wnorm"], 6, 9)
    packed[ROW_FIN:ROW_FIN + GCOLS, :OUT_DIM] = np.concatenate(
        [wfin, wfin * comb[None, :]], axis=0)            # [60, 9]
    packed[ROW_BIAS + 0, :GCOLS] = bias_row(p["bloc"])
    packed[ROW_BIAS + 1, :GCOLS] = bias_row(p["bvel"])
    packed[ROW_BIAS + 2, :GCOLS] = bias_row(p["bang"])
    packed[ROW_BIAS + 3, :OUT_DIM] = bfin * (1.0 + comb)  # 2*b for +cols, 0 for -cols
    return dict(packed=jnp.asarray(packed))


def reference_forward(spatial, p):
    """Plain-JAX reference replicating the PyTorch forward semantics."""
    def lin(sub, W, b):
        y = jnp.dot(sub, W, precision=_HP)
        return y if b is None else y + b

    def spatial_input(s, c):
        return (lin(s[:, 0:2], p["wloc"][c], p["bloc"][c]) *
                lin(s[:, 2:4], p["wvel"][c], p["bvel"][c]) *
                lin(s[:, 4:6], p["wang"][c], p["bang"][c]) *
                lin(s[:, 6:9], p["wnorm"][c], None))

    def actor(sp):
        proc = jnp.concatenate(
            [spatial_input(sp[:, c, :], c) for c in range(N_COMP)], axis=1)
        return jnp.dot(proc, p["wfin"], precision=_HP) + p["bfin"]

    sp_inv = spatial * jnp.asarray(_sign_matrix())[None]
    out = actor(spatial)
    out_inv = actor(sp_inv)
    combined = jnp.concatenate([out[:, 0:6] + out_inv[:, 0:6],
                                out[:, 6:9] - out_inv[:, 6:9]], axis=1)
    return jnp.tanh(combined)


if __name__ == "__main__":
    key = jax.random.PRNGKey(0)
    k_sp, k_cs, k_par, k_sp2 = jax.random.split(key, 4)

    B = 2
    spatial = jax.random.normal(k_sp, (B, N_COMP, N_FEAT), jnp.float32)
    car_stats = jax.random.normal(k_cs, (B, 4), jnp.float32)  # unused by the model
    torch_params = init_params(k_par)
    kparams = prepare_kernel_params(torch_params)

    out = symmetric_forward(spatial, car_stats, kparams)
    out = jax.block_until_ready(out)
    ref = reference_forward(spatial, torch_params)
    assert out.shape == (B, OUT_DIM)
    np.testing.assert_allclose(np.asarray(out), np.asarray(ref),
                               atol=1e-5, rtol=1e-4)

    # Second shape: exercises batch padding and a multi-step (2-tile) grid.
    B2 = 300
    spatial2 = jax.random.normal(k_sp2, (B2, N_COMP, N_FEAT), jnp.float32)
    out2 = jax.block_until_ready(
        symmetric_forward(spatial2, None, kparams, block_b=256))
    ref2 = reference_forward(spatial2, torch_params)
    np.testing.assert_allclose(np.asarray(out2), np.asarray(ref2),
                               atol=1e-5, rtol=1e-4)

    print("KERNEL_OK")
</pallas_src>

<mosaic_0001>
module attributes {stable_mosaic.version = 11 : i64} {
  func.func @symmetric_kernel(%arg0: i32, %arg1: memref<128x27xf32, #tpu.memory_space<vmem>>, %arg2: memref<200x64xf32, #tpu.memory_space<vmem>>, %arg3: memref<128x9xf32, #tpu.memory_space<vmem>>) attributes {dimension_semantics = [#tpu.dimension_semantics<parallel>], iteration_bounds = array<i64: 1>, scalar_prefetch = 0 : i64, scratch_operands = 0 : i64, tpu.core_type = #tpu.core_type<tc>, window_params = [{transform_indices = @transform_0, window_bounds = array<i64: 128, 27>}, {pipeline_mode = #tpu.pipeline_mode<synchronous>, transform_indices = @transform_1, window_bounds = array<i64: 200, 64>}, {transform_indices = @transform_2, window_bounds = array<i64: 128, 9>}]} {
    %c0 = arith.constant 0 : index
    %c0_0 = arith.constant 0 : index
    %0 = vector.load %arg1[%c0, %c0_0] : memref<128x27xf32, #tpu.memory_space<vmem>>, vector<128x27xf32>
    %c0_1 = arith.constant 0 : index
    %c0_2 = arith.constant 0 : index
    %1 = vector.load %arg2[%c0_1, %c0_2] : memref<200x64xf32, #tpu.memory_space<vmem>>, vector<27x60xf32>
    %c32 = arith.constant 32 : index
    %c0_3 = arith.constant 0 : index
    %2 = vector.load %arg2[%c32, %c0_3] : memref<200x64xf32, #tpu.memory_space<vmem>>, vector<27x60xf32>
    %c64 = arith.constant 64 : index
    %c0_4 = arith.constant 0 : index
    %3 = vector.load %arg2[%c64, %c0_4] : memref<200x64xf32, #tpu.memory_space<vmem>>, vector<27x60xf32>
    %c96 = arith.constant 96 : index
    %c0_5 = arith.constant 0 : index
    %4 = vector.load %arg2[%c96, %c0_5] : memref<200x64xf32, #tpu.memory_space<vmem>>, vector<27x60xf32>
    %c192 = arith.constant 192 : index
    %c0_6 = arith.constant 0 : index
    %5 = vector.load %arg2[%c192, %c0_6] : memref<200x64xf32, #tpu.memory_space<vmem>>, vector<1x60xf32>
    %c193 = arith.constant 193 : index
    %c0_7 = arith.constant 0 : index
    %6 = vector.load %arg2[%c193, %c0_7] : memref<200x64xf32, #tpu.memory_space<vmem>>, vector<1x60xf32>
    %c194 = arith.constant 194 : index
    %c0_8 = arith.constant 0 : index
    %7 = vector.load %arg2[%c194, %c0_8] : memref<200x64xf32, #tpu.memory_space<vmem>>, vector<1x60xf32>
    %cst = arith.constant dense<0.000000e+00> : vector<128x60xf32>
    %8 = tpu.matmul %0, %1, %cst {dimension_numbers = #tpu.dot_dimension_numbers<[1], [0], [0], [1], [0, 0, 1, 1], [], []>, precision = #tpu.contract_precision<fp32>} : vector<128x27xf32>, vector<27x60xf32>, vector<128x60xf32> -> vector<128x60xf32>
    %9 = vector.broadcast %5 : vector<1x60xf32> to vector<128x60xf32>
    %10 = arith.addf %8, %9 : vector<128x60xf32>
    %cst_9 = arith.constant dense<0.000000e+00> : vector<128x60xf32>
    %11 = tpu.matmul %0, %2, %cst_9 {dimension_numbers = #tpu.dot_dimension_numbers<[1], [0], [0], [1], [0, 0, 1, 1], [], []>, precision = #tpu.contract_precision<fp32>} : vector<128x27xf32>, vector<27x60xf32>, vector<128x60xf32> -> vector<128x60xf32>
    %12 = vector.broadcast %6 : vector<1x60xf32> to vector<128x60xf32>
    %13 = arith.addf %11, %12 : vector<128x60xf32>
    %14 = arith.mulf %10, %13 : vector<128x60xf32>
    %cst_10 = arith.constant dense<0.000000e+00> : vector<128x60xf32>
    %15 = tpu.matmul %0, %3, %cst_10 {dimension_numbers = #tpu.dot_dimension_numbers<[1], [0], [0], [1], [0, 0, 1, 1], [], []>, precision = #tpu.contract_precision<fp32>} : vector<128x27xf32>, vector<27x60xf32>, vector<128x60xf32> -> vector<128x60xf32>
    %16 = vector.broadcast %7 : vector<1x60xf32> to vector<128x60xf32>
    %17 = arith.addf %15, %16 : vector<128x60xf32>
    %18 = arith.mulf %14, %17 : vector<128x60xf32>
    %cst_11 = arith.constant dense<0.000000e+00> : vector<128x60xf32>
    %19 = tpu.matmul %0, %4, %cst_11 {dimension_numbers = #tpu.dot_dimension_numbers<[1], [0], [0], [1], [0, 0, 1, 1], [], []>, precision = #tpu.contract_precision<fp32>} : vector<128x27xf32>, vector<27x60xf32>, vector<128x60xf32> -> vector<128x60xf32>
    %20 = arith.mulf %18, %19 : vector<128x60xf32>
    %c128 = arith.constant 128 : index
    %c0_12 = arith.constant 0 : index
    %21 = vector.load %arg2[%c128, %c0_12] : memref<200x64xf32, #tpu.memory_space<vmem>>, vector<60x9xf32>
    %c195 = arith.constant 195 : index
    %c0_13 = arith.constant 0 : index
    %22 = vector.load %arg2[%c195, %c0_13] : memref<200x64xf32, #tpu.memory_space<vmem>>, vector<1x9xf32>
    %cst_14 = arith.constant dense<0.000000e+00> : vector<128x9xf32>
    %23 = tpu.matmul %20, %21, %cst_14 {dimension_numbers = #tpu.dot_dimension_numbers<[1], [0], [0], [1], [0, 0, 1, 1], [], []>, precision = #tpu.contract_precision<fp32>} : vector<128x60xf32>, vector<60x9xf32>, vector<128x9xf32> -> vector<128x9xf32>
    %24 = vector.broadcast %22 : vector<1x9xf32> to vector<128x9xf32>
    %25 = arith.addf %23, %24 : vector<128x9xf32>
    %26 = math.tanh %25 : vector<128x9xf32>
    %c0_15 = arith.constant 0 : index
    %c0_16 = arith.constant 0 : index
    %27 = vector.load %arg3[%c0_15, %c0_16] : memref<128x9xf32, #tpu.memory_space<vmem>>, vector<128x9xf32>
    tpu.vector_store %arg3[%c0_15, %c0_16], %26 {strides = array<i32>} : memref<128x9xf32, #tpu.memory_space<vmem>>, vector<128x9xf32>,
    return
  }
  func.func @transform_0(%arg0: i32) -> (i32, i32) {
    %c0_i32 = arith.constant 0 : i32
    %c0_i32_0 = arith.constant 0 : i32
    return %arg0, %c0_i32 : i32, i32
  }
  func.func @transform_1(%arg0: i32) -> (i32, i32) {
    %c0_i32 = arith.constant 0 : i32
    %c0_i32_0 = arith.constant 0 : i32
    %c0_i32_1 = arith.constant 0 : i32
    return %c0_i32, %c0_i32_0 : i32, i32
  }
  func.func @transform_2(%arg0: i32) -> (i32, i32) {
    %c0_i32 = arith.constant 0 : i32
    %c0_i32_0 = arith.constant 0 : i32
    return %arg0, %c0_i32 : i32, i32
  }
}

</mosaic_0001>

<bundles_post_ra>
// kernel: tpu_custom_call.1
= control target key start
LH: loop header
LB: loop body
LE: loop exit
PB: predicated region body
PF: predicated region fallthrough
CT: control target
= control target key end

     0   :  { %vm96_vm0 = vcmask 1042432   ;;  %vm47_vm1 = vcmask 220160   ;;  %vm2818_vm2 = vcmask 1043456   ;;  %vm2769_vm3 = vcmask 490496   ;;  %s5316_s1 = inlined_call_operand.vmem [shape: f32[200,64], index: 1, kind: input, shape index: {}]   ;;  %s5317_s0 = inlined_call_operand.vmem [shape: f32[128,27], index: 0, kind: input, shape index: {}]   ;;  %s5318_s2 = inlined_call_operand.vmem [shape: f32[128,9], index: 2, kind: output, shape index: {}]  }
   0x1   :  { %v30_v0 = vld [vmem:[%s5316_s1 + $0x18] sm:$0x7]  ;;  %v29_v1 = vld [vmem:[%s5316_s1 + $0x10] sm:$0xff]  ;;  %v28_v2 = vld [vmem:[%s5316_s1 + $0x8] sm:$0xff]  ;;  %vm3540_vm4 = vcmask 72704  }
   0x2   :  { %v98_v3 = vsel %vm96_vm0, %v30_v0, 0  ;;  %v3630_v4 = vand.u32 4294901760, %v29_v1  ;;  %v3632_v5 = vand.u32 4294901760, %v28_v2  ;;  %v27_v6 = vld [vmem:[%s5316_s1] sm:$0xff]  ;;  %v20_v8 = vld [vmem:[%s5317_s0 + $0x48] sm:$0xff]  ;;  %v21_v14 = vld [vmem:[%s5317_s0 + $0x50] sm:$0xff] }
   0x3   :  { %v19_v7 = vld [vmem:[%s5317_s0 + $0x40] sm:$0xff]  ;;  %v3643_v9 = vand.u32 4294901760, %v98_v3  ;;  %v3645_v10 = vand.u32 4294901760, %v27_v6  ;;  %v76_v12 = vsel %vm47_vm1, %v20_v8, 0  ;;  %v79_v22 = vsel %vm47_vm1, %v21_v14, 0  ;;  %v12_v23 = vld [vmem:[%s5317_s0 + $0x8] sm:$0xff] }
   0x4   :  { %v73_v11 = vsel %vm47_vm1, %v19_v7, 0  ;;  %v11_v13 = vld [vmem:[%s5317_s0] sm:$0xff]  ;;  %v268_v16 = vsub.f32 %v29_v1, %v3630_v4  ;;  %v3659_v17 = vsub.f32 %v28_v2, %v3632_v5  ;;  %v3661_v18 = vand.u32 4294901760, %v76_v12  ;;  %v13_v40 = vld [vmem:[%s5317_s0 + $0x10] sm:$0xff]  ;;  %v22_v47 = vld [vmem:[%s5317_s0 + $0x58] sm:$0xff] }
   0x5   :  { %v3655_v15 = vand.u32 4294901760, %v73_v11  ;;  %3561 = vmatpush.msra.mxu2 %v3643_v9  ;;  %v262_v19 = vsub.f32 %v98_v3, %v3643_v9  ;;  %v3666_v20 = vsub.f32 %v27_v6, %v3645_v10  ;;  %113 = vmatpush.msra.mxu0 %v3643_v9  ;;  %v49_v21 = vsel %vm47_vm1, %v11_v13, 0  ;;  %v14_v59 = vld [vmem:[%s5317_s0 + $0x18] sm:$0xff]  ;;  %v23_v1 = vld [vmem:[%s5317_s0 + $0x60] sm:$0xff] }
   0x6   :  { %v269_v25 = vand.u32 4294901760, %v268_v16  ;;  %v275_v26 = vand.u32 4294901760, %v3659_v17  ;;  %v3679_v27 = vsub.f32 %v76_v12, %v3661_v18  ;;  %v3684_v30 = vand.u32 4294901760, %v49_v21  ;;  %v15_v13 = vld [vmem:[%s5317_s0 + $0x20] sm:$0xff] }
   0x7   :  { %5443 = vst [vmem:[#allocation2_spill] sm:$0xff] %v3655_v15  ;;  %v3675_v24 = vsub.f32 %v73_v11, %v3655_v15  ;;  %3562 = vmatpush.msra.mxu2 %v3630_v4  ;;  %v263_v28 = vand.u32 4294901760, %v262_v19  ;;  %v281_v29 = vand.u32 4294901760, %v3666_v20  ;;  %115 = vmatpush.msra.mxu0 %v3630_v4  ;;  %v3689_v33 = vand.u32 4294901760, %v79_v22 }
   0x8   :  { %5445 = vst [vmem:[#allocation4_spill] sm:$0xff] %v3679_v27  ;;  %v270_v32 = vsub.f32 %v268_v16, %v269_v25  ;;  %v276_v35 = vsub.f32 %v3659_v17, %v275_v26  ;;  %v3695_v36 = vsub.f32 %v49_v21, %v3684_v30  ;;  %v52_v37 = vsel %vm47_vm1, %v12_v23, 0 }
   0x9   :  { %5444 = vst [vmem:[#allocation3_spill] sm:$0xff] %v3675_v24  ;;  %v3687_v31 = vand.u32 4294901760, %v3675_v24  ;;  %3563 = vmatpush.msra.mxu2 %v3632_v5  ;;  %v264_v34 = vsub.f32 %v262_v19, %v263_v28  ;;  %117 = vmatpush.msra.mxu0 %v3632_v5  ;;  %v3701_v39 = vand.u32 4294901760, %v3679_v27  ;;  %v282_v43 = vsub.f32 %v3666_v20, %v281_v29 }
   0xa   :  { %v271_v42 = vand.u32 4294901760, %v270_v32  ;;  %v3712_v44 = vand.u32 4294901760, %v3695_v36  ;;  %v3716_v46 = vand.u32 4294901760, %v52_v37  ;;  %v277_v48 = vand.u32 4294901760, %v276_v35 }
   0xb   :  { %5446 = vst [vmem:[#allocation5_spill] sm:$0xff] %v3687_v31  ;;  %v187_v38 = vsub.f32 %v3675_v24, %v3687_v31  ;;  %3564 = vmatpush.msra.mxu2 %v3645_v10  ;;  %v265_v41 = vand.u32 4294901760, %v264_v34  ;;  %119 = vmatpush.msra.mxu0 %v3645_v10  ;;  %v3724_v50 = vsub.f32 %v79_v22, %v3689_v33  ;;  %v55_v51 = vsel %vm47_vm1, %v13_v40, 0 }
   0xc   :  { %5447 = vst [vmem:[#allocation6_spill] sm:$0xff] %v3701_v39  ;;  %v123_v49 = vsub.f32 %v3695_v36, %v3712_v44  ;;  %v195_v52 = vsub.f32 %v3679_v27, %v3701_v39  ;;  %v3731_v53 = vsub.f32 %v52_v37, %v3716_v46  ;;  %v3733_v54 = vand.u32 4294901760, %v55_v51  ;;  %v25_v37 = vld [vmem:[%s5317_s0 + $0x70] sm:$0xff] }
   0xd   :  { %5448 = vst [vmem:[#allocation7_spill] sm:$0xff] %v3712_v44  ;;  %v3714_v45 = vand.u32 4294901760, %v187_v38  ;;  %364 = vmatpush.msrb.mxu2 %v262_v19  ;;  %587 = vmatpush.msrb.mxu0 %v263_v28  ;;  %v283_v55 = vand.u32 4294901760, %v282_v43  ;;  %v82_v57 = vsel %vm47_vm1, %v22_v47, 0  ;;  %v3745_v60 = vand.u32 4294901760, %v3724_v50  ;;  %v16_v28 = vld [vmem:[%s5317_s0 + $0x28] sm:$0xff] }
   0xe   :  { %3565 = vmatpush.msra.mxu3 %v265_v41  ;;  %266 = vmatpush.msra.mxu1 %v265_v41  ;;  %5450 = vst [vmem:[#allocation9_spill] sm:$0xff] %v3724_v50  ;;  %v3735_v56 = vand.u32 4294901760, %v123_v49  ;;  %v3739_v58 = vand.u32 4294901760, %v3731_v53  ;;  %v3747_v61 = vand.u32 4294901760, %v195_v52  ;;  %v3752_v63 = vand.u32 4294901760, %v82_v57  ;;  %v17_v49 = vld [vmem:[%s5317_s0 + $0x30] sm:$0xff] }
   0xf   :  { %5449 = vst [vmem:[#allocation8_spill] sm:$0xff] %v3714_v45  ;;  %189 = vmatmul.f32.vlgmr.msra.gmra.mxu2 %v3714_v45  ;;  %591 = vmatpush.msrb.mxu0 %v269_v25  ;;  %v3755_v0 = vsub.f32 %v55_v51, %v3733_v54  ;;  %v58_v2 = vsel %vm47_vm1, %v14_v59, 0  ;;  %v203_v3 = vsub.f32 %v3724_v50, %v3745_v60  ;;  %v85_v6 = vsel %vm47_vm1, %v23_v1, 0 }
  0x10   :  { %5451 = vst [vmem:[#allocation10_spill] sm:$0xff] %v3731_v53  ;;  %3566 = vmatpush.msra.mxu3 %v271_v42  ;;  %272 = vmatpush.msra.mxu1 %v271_v42  ;;  %v131_v62 = vsub.f32 %v3731_v53, %v3739_v58  ;;  %v3773_v8 = vsub.f32 %v82_v57, %v3752_v63  ;;  %v3778_v12 = vand.u32 4294901760, %v58_v2  ;;  %v3788_v14 = vand.u32 4294901760, %v85_v6 }
  0x11   :  { %5452 = vst [vmem:[#allocation11_spill] sm:$0xff] %v3735_v56  ;;  %367 = vmatpush.msrb.mxu2 %v268_v16  ;;  %595 = vmatpush.msrb.mxu0 %v275_v26  ;;  %v3776_v11 = vand.u32 4294901760, %v3755_v0  ;;  %v3791_v16 = vand.u32 4294901760, %v203_v3  ;;  %v64_v38 = vsel %vm47_vm1, %v16_v28, 0  ;;  %v91_v41 = vsel %vm47_vm1, %v25_v37, 0  ;;  %v18_v28 = vld [vmem:[%s5317_s0 + $0x38] sm:$0xff] }
  0x12   :  { %3567 = vmatpush.msra.mxu3 %v277_v48  ;;  %278 = vmatpush.msra.mxu1 %v277_v48  ;;  %5453 = vst [vmem:[#allocation12_spill] sm:$0xff] %v3745_v60  ;;  %v3770_v7 = vand.u32 4294901760, %v131_v62  ;;  %v3800_v19 = vsub.f32 %v58_v2, %v3778_v12  ;;  %v3811_v21 = vsub.f32 %v85_v6, %v3788_v14  ;;  %v3859_v48 = vand.u32 4294901760, %v64_v38  ;;  %v26_v62 = vld [vmem:[%s5317_s0 + $0x78] sm:$0xff] }
  0x13   :  { %5454 = vst [vmem:[#allocation13_spill] sm:$0xff] %v3747_v61  ;;  %125 = vmatmul.f32.vlgmr.msra.gmra.mxu0 %v3735_v56  ;;  %370 = vmatpush.msrb.mxu2 %v3659_v17  ;;  %v139_v17 = vsub.f32 %v3755_v0, %v3776_v11  ;;  %v3867_v52 = vand.u32 4294901760, %v91_v41  ;;  %v67_v1 = vsel %vm47_vm1, %v17_v49, 0 }
  0x14   :  { %3568 = vmatpush.msra.mxu3 %v283_v55  ;;  %284 = vmatpush.msra.mxu1 %v283_v55  ;;  %5455 = vst [vmem:[#allocation14_spill] sm:$0xff] %v3770_v7  ;;  %v3821_v25 = vand.u32 4294901760, %v3800_v19  ;;  %v3875_v59 = vsub.f32 %v64_v38, %v3859_v48 }
  0x15   :  { %318 = vmatmul.f32.vlgmr.msra.gmra.mxu3 %v3655_v15  ;;  %286 = vmatmul.f32.vlgmr.msra.gmra.mxu1 %v3684_v30  ;;  %5456 = vst [vmem:[#allocation15_spill] sm:$0xff] %v3773_v8  ;;  %v3818_v23 = vand.u32 4294901760, %v139_v17  ;;  %v3886_v3 = vsub.f32 %v91_v41, %v3867_v52  ;;  %v94_v17 = vsel %vm47_vm1, %v26_v62, 0 }
  0x16   :  { %468 = vmatpush.msrb.mxu3 %v3643_v9  ;;  %373 = vmatpush.msrb.mxu2 %v3666_v20  ;;  %5457 = vst [vmem:[#allocation16_spill] sm:$0xff] %v3776_v11  ;;  %v61_v20 = vsel %vm47_vm1, %v15_v13, 0  ;;  %v147_v34 = vsub.f32 %v3800_v19, %v3821_v25  ;;  %v3892_v13 = vand.u32 4294901760, %v3875_v59  ;;  %v3909_v37 = vand.u32 4294901760, %v94_v17 }
  0x17   :  { %197 = vmatmul.f32.gmra.mxu2 %v3747_v61  ;;  %5458 = vst [vmem:[#allocation17_spill] sm:$0xff] %v3778_v12  ;;  %678 = vmatpush.msrb.mxu1 %v3643_v9  ;;  %v3795_v9 = vand.u32 4294901760, %v3773_v8  ;;  %v3823_v26 = vand.u32 4294901760, %v61_v20 }
  0x18   :  { %470 = vmatpush.msrb.mxu3 %v3630_v4  ;;  %599 = vmatpush.msrb.mxu0 %v281_v29  ;;  %5459 = vst [vmem:[#allocation18_spill] sm:$0xff] %v3788_v14  ;;  %v3854_v43 = vand.u32 4294901760, %v147_v34  ;;  %v3907_v34 = vand.u32 4294901760, %v3886_v3  ;;  %v163_v41 = vsub.f32 %v3875_v59, %v3892_v13 }
  0x19   :  { %680 = vmatpush.msrb.mxu1 %v3630_v4  ;;  %5460 = vst [vmem:[#allocation19_spill] sm:$0xff] %v3791_v16  ;;  %v24_v4 = vld [vmem:[%s5317_s0 + $0x68] sm:$0xff]  ;;  %v3839_v35 = vsub.f32 %v61_v20, %v3823_v26  ;;  %v34_v20 = vld [vmem:[%s5316_s1 + $0x38] sm:$0x7] }
  0x1a   :  { %472 = vmatpush.msrb.mxu3 %v3632_v5  ;;  %5461 = vst [vmem:[#allocation20_spill] sm:$0xff] %v3795_v9  ;;  %v88_v22 = vsel %vm47_vm1, %v24_v4, 0  ;;  %v3895_v4 = vand.u32 4294901760, %v67_v1 }
  0x1b   :  { %133 = vmatmul.f32.gmra.mxu0 %v3770_v7  ;;  %5462 = vst [vmem:[#allocation21_spill] sm:$0xff] %v3800_v19  ;;  %682 = vmatpush.msrb.mxu1 %v3632_v5  ;;  %v211_v5 = vsub.f32 %v3773_v8, %v3795_v9  ;;  %v3828_v29 = vand.u32 4294901760, %v88_v22  ;;  %v3857_v47 = vand.u32 4294901760, %v3839_v35 }
  0x1c   :  { %474 = vmatpush.msrb.mxu3 %v3645_v10  ;;  %5463 = vst [vmem:[#allocation22_spill] sm:$0xff] %v3811_v21 }
  0x1d   :  { %322 = vmatmul.f32.gmra.mxu3 %v3661_v18  ;;  %290 = vmatmul.f32.gmra.mxu1 %v3716_v46  ;;  %5464 = vst [vmem:[#allocation23_spill] sm:$0xff] %v3818_v23  ;;  %v3830_v32 = vand.u32 4294901760, %v211_v5  ;;  %v3848_v40 = vsub.f32 %v88_v22, %v3828_v29  ;;  %v155_v57 = vsub.f32 %v3839_v35, %v3857_v47  ;;  %v752_v22 = vsel %vm96_vm0, %v34_v20, 0 }
  0x1e   :  { %684 = vmatpush.msrb.mxu1 %v3645_v10  ;;  %5465 = vst [vmem:[#allocation24_spill] sm:$0xff] %v3821_v25  ;;  %v3834_v10 = vand.u32 4294901760, %v3811_v21  ;;  %v3901_v5 = vand.u32 4294901760, %v752_v22  ;;  %v3935_v20 = vand.u32 4294901760, %v163_v41 }
  0x1f   :  { %205 = vmatmul.f32.gmra.mxu2 %v3791_v16  ;;  %5466 = vst [vmem:[#allocation25_spill] sm:$0xff] %v3823_v26  ;;  %v3865_v51 = vand.u32 4294901760, %v3848_v40  ;;  %v3889_v6 = vand.u32 4294901760, %v155_v57  ;;  %v70_v57 = vsel %vm47_vm1, %v18_v28, 0 }
  0x20   :  { %5467 = vst [vmem:[#allocation26_spill] sm:$0xff] %v3828_v29  ;;  %v219_v42 = vsub.f32 %v3811_v21, %v3834_v10  ;;  %767 = vmatpush.msra.mxu2 %v3901_v5  ;;  %v3921_v49 = vsub.f32 %v752_v22, %v3901_v5  ;;  %1122 = vmatpush.msra.mxu1 %v3901_v5  ;;  %v3940_v28 = vand.u32 4294901760, %v70_v57 }
  0x21   :  { %5468 = vst [vmem:[#allocation27_spill] sm:$0xff] %v3830_v32  ;;  %v227_v2 = vsub.f32 %v3848_v40, %v3865_v51 }
  0x22   :  { %5469 = vst [vmem:[#allocation28_spill] sm:$0xff] %v3834_v10  ;;  %v3869_v55 = vand.u32 4294901760, %v219_v42  ;;  %v3917_v42 = vsub.f32 %v67_v1, %v3895_v4  ;;  %v5327_v62 = vand.u32 4294901760, %v3921_v49  ;;  %v3931_v1 = vsub.f32 %v94_v17, %v3909_v37  ;;  %1018 = vmatpush.msra.mxu0 %v3921_v49 }
  0x23   :  { %141 = vmatmul.f32.gmra.mxu0 %v3818_v23  ;;  %5470 = vst [vmem:[#allocation29_spill] sm:$0xff] %v3839_v35  ;;  %v3911_v38 = vand.u32 4294901760, %v227_v2  ;;  %v235_v2 = vsub.f32 %v3886_v3, %v3907_v34 }
  0x24   :  { %5471 = vst [vmem:[#allocation30_spill] sm:$0xff] %v3848_v40  ;;  %v3938_v22 = vand.u32 4294901760, %v3917_v42  ;;  %v3949_v17 = vand.u32 4294901760, %v3931_v1 }
  0x25   :  { %326 = vmatmul.f32.gmra.mxu3 %v3689_v33  ;;  %294 = vmatmul.f32.gmra.mxu1 %v3733_v54  ;;  %5472 = vst [vmem:[#allocation31_spill] sm:$0xff] %v3854_v43  ;;  %v3945_v16 = vand.u32 4294901760, %v235_v2 }
  0x26   :  { %5473 = vst [vmem:[#allocation32_spill] sm:$0xff] %v3857_v47  ;;  %v171_v41 = vsub.f32 %v3917_v42, %v3938_v22 }
  0x27   :  { %213 = vmatmul.f32.gmra.mxu2 %v3830_v32  ;;  %5474 = vst [vmem:[#allocation33_spill] sm:$0xff] %v3859_v48 }
  0x28   :  { %5475 = vst [vmem:[#allocation34_spill] sm:$0xff] %v3865_v51  ;;  %v3961_v2 = vand.u32 4294901760, %v171_v41  ;;  %v33_v41 = vld [vmem:[%s5316_s1 + $0x30] sm:$0xff] }
  0x29   :  { %5476 = vst [vmem:[#allocation35_spill] sm:$0xff] %v3867_v52 }
  0x2a   :  { %5477 = vst [vmem:[#allocation36_spill] sm:$0xff] %v3869_v55 }
  0x2b   :  { %149 = vmatmul.f32.gmra.mxu0 %v3854_v43  ;;  %5478 = vst [vmem:[#allocation37_spill] sm:$0xff] %v3875_v59 }
  0x2c   :  { %5479 = vst [vmem:[#allocation38_spill] sm:$0xff] %v3886_v3 }
  0x2d   :  { %330 = vmatmul.f32.gmra.mxu3 %v3752_v63  ;;  %298 = vmatmul.f32.gmra.mxu1 %v3778_v12  ;;  %5480 = vst [vmem:[#allocation39_spill] sm:$0xff] %v3889_v6 }
  0x2e   :  { %5481 = vst [vmem:[#allocation40_spill] sm:$0xff] %v3892_v13 }
  0x2f   :  { %221 = vmatmul.f32.gmra.mxu2 %v3869_v55  ;;  %5482 = vst [vmem:[#allocation41_spill] sm:$0xff] %v3895_v4  ;;  %v918_v55 = vsub.f32 %v3921_v49, %v5327_v62 }
  0x30   :  { %5483 = vst [vmem:[#allocation42_spill] sm:$0xff] %v3907_v34 }
  0x31   :  { %5484 = vst [vmem:[#allocation43_spill] sm:$0xff] %v3909_v37  ;;  %v919_v32 = vand.u32 4294901760, %v918_v55  ;;  %v243_v55 = vsub.f32 %v3931_v1, %v3949_v17 }
  0x32   :  { %5485 = vst [vmem:[#allocation44_spill] sm:$0xff] %v3911_v38 }
  0x33   :  { %157 = vmatmul.f32.gmra.mxu0 %v3889_v6  ;;  %5486 = vst [vmem:[#allocation45_spill] sm:$0xff] %v3917_v42  ;;  %920 = vmatpush.msra.mxu3 %v919_v32  ;;  %v3966_v61 = vand.u32 4294901760, %v243_v55  ;;  %v3983_v55 = vand.u32 4294901760, %v33_v41 }
  0x34   :  { %5487 = vst [vmem:[#allocation46_spill] sm:$0xff] %v3931_v1 }
  0x35   :  { %334 = vmatmul.f32.gmra.mxu3 %v3788_v14  ;;  %302 = vmatmul.f32.gmra.mxu1 %v3823_v26  ;;  %5488 = vst [vmem:[#allocation47_spill] sm:$0xff] %v3935_v20 }
  0x36   :  { %5489 = vst [vmem:[#allocation48_spill] sm:$0xff] %v3938_v22  ;;  %769 = vmatpush.msra.mxu2 %v3983_v55  ;;  %1124 = vmatpush.msra.mxu1 %v3983_v55 }
  0x37   :  { %229 = vmatmul.f32.gmra.mxu2 %v3911_v38  ;;  %5490 = vst [vmem:[#allocation49_spill] sm:$0xff] %v3940_v28  ;;  %v3954_v38 = vsub.f32 %v70_v57, %v3940_v28 }
  0x38   :  { %5491 = vst [vmem:[#allocation50_spill] sm:$0xff] %v3945_v16 }
  0x39   :  { %5492 = vst [vmem:[#allocation51_spill] sm:$0xff] %v3949_v17  ;;  %v3964_v62 = vand.u32 4294901760, %v3954_v38 }
  0x3a   :  { %5493 = vst [vmem:[#allocation52_spill] sm:$0xff] %v3954_v38 }
  0x3b   :  { %165 = vmatmul.f32.gmra.mxu0 %v3935_v20  ;;  %5494 = vst [vmem:[#allocation53_spill] sm:$0xff] %v3961_v2  ;;  %v179_v32 = vsub.f32 %v3954_v38, %v3964_v62 }
  0x3c   :  { %5495 = vst [vmem:[#allocation54_spill] sm:$0xff] %v3964_v62 }
  0x3d   :  { %338 = vmatmul.f32.gmra.mxu3 %v3828_v29  ;;  %306 = vmatmul.f32.gmra.mxu1 %v3859_v48  ;;  %5496 = vst [vmem:[#allocation55_spill] sm:$0xff] %v3966_v61  ;;  %v3974_v57 = vand.u32 4294901760, %v179_v32  ;;  %v3991_v32 = vsub.f32 %v33_v41, %v3983_v55 }
  0x3f   :  { %237 = vmatmul.f32.gmra.mxu2 %v3945_v16  ;;  %5497 = vst [vmem:[#allocation56_spill] sm:$0xff] %v3974_v57  ;;  %1021 = vmatpush.msra.mxu0 %v3991_v32 }
  0x43   :  { %173 = vmatmul.f32.gmra.mxu0 %v3961_v2 }
  0x45   :  { %342 = vmatmul.f32.gmra.mxu3 %v3867_v52  ;;  %310 = vmatmul.f32.gmra.mxu1 %v3895_v4 }
  0x47   :  { %245 = vmatmul.f32.gmra.mxu2 %v3966_v61  ;;  %v5336_v61 = vand.u32 4294901760, %v3991_v32 }
  0x49   :  { %v924_v16 = vsub.f32 %v3991_v32, %v5336_v61 }
  0x4b   :  { %181 = vmatmul.f32.gmra.mxu0 %v3974_v57  ;;  %v925_v45 = vand.u32 4294901760, %v924_v16 }
  0x4d   :  { %346 = vmatmul.f32.gmra.mxu3 %v3909_v37  ;;  %314 = vmatmul.f32.gmra.mxu1 %v3940_v28 }
  0x4e   :  { %926 = vmatpush.msra.mxu3 %v925_v45  ;;  %v32_v45 = vld [vmem:[%s5316_s1 + $0x28] sm:$0xff] }
  0x4f   :  { %376 = vmatmul.f32.vlgmr.msrb.gmra.mxu2 %v3695_v36  ;;  %v4015_v16 = vand.u32 4294901760, %v32_v45 }
  0x51   :  { %771 = vmatpush.msra.mxu2 %v4015_v16  ;;  %v928_v41 = vsub.f32 %v32_v45, %v4015_v16  ;;  %1126 = vmatpush.msra.mxu1 %v4015_v16 }
  0x53   :  { %601 = vmatmul.f32.vlgmr.msrb.gmra.mxu0 %v3684_v30  ;;  %v929_v61 = vand.u32 4294901760, %v928_v41 }
  0x54   :  { %1024 = vmatpush.msra.mxu0 %v928_v41 }
  0x55   :  { %478 = vmatmul.f32.vlgmr.msrb.gmra.mxu3 %v3712_v44  ;;  %686 = vmatmul.f32.vlgmr.msrb.gmra.mxu1 %v3684_v30  ;;  %v930_v57 = vsub.f32 %v928_v41, %v929_v61 }
  0x57   :  { %381 = vmatmul.f32.gmra.mxu2 %v3731_v53  ;;  %v931_v2 = vand.u32 4294901760, %v930_v57 }
  0x59   :  { %932 = vmatpush.msra.mxu3 %v931_v2  ;;  %v4038_v2 = vld [vmem:[%s5316_s1 + $0xc0] ss:$0 sm:$0xff] }
  0x5b   :  { %605 = vmatmul.f32.gmra.mxu0 %v3716_v46 }
  0x5d   :  { %484 = vmatmul.f32.gmra.mxu3 %v3739_v58  ;;  %690 = vmatmul.f32.gmra.mxu1 %v3716_v46 }
  0x5f   :  { %386 = vmatmul.f32.gmra.mxu2 %v3755_v0 }
  0x63   :  { %609 = vmatmul.f32.gmra.mxu0 %v3733_v54 }
  0x65   :  { %490 = vmatmul.f32.gmra.mxu3 %v3776_v11  ;;  %694 = vmatmul.f32.gmra.mxu1 %v3733_v54 }
  0x67   :  { %391 = vmatmul.f32.gmra.mxu2 %v3800_v19 }
  0x6b   :  { %613 = vmatmul.f32.gmra.mxu0 %v3778_v12 }
  0x6d   :  { %496 = vmatmul.f32.gmra.mxu3 %v3821_v25  ;;  %698 = vmatmul.f32.gmra.mxu1 %v3778_v12 }
  0x6f   :  { %396 = vmatmul.f32.gmra.mxu2 %v3839_v35 }
  0x73   :  { %617 = vmatmul.f32.gmra.mxu0 %v3823_v26 }
  0x75   :  { %502 = vmatmul.f32.gmra.mxu3 %v3857_v47  ;;  %702 = vmatmul.f32.gmra.mxu1 %v3823_v26 }
  0x77   :  { %401 = vmatmul.f32.gmra.mxu2 %v3875_v59 }
  0x7b   :  { %621 = vmatmul.f32.gmra.mxu0 %v3859_v48 }
  0x7d   :  { %508 = vmatmul.f32.gmra.mxu3 %v3892_v13  ;;  %706 = vmatmul.f32.gmra.mxu1 %v3859_v48 }
  0x7f   :  { %406 = vmatmul.f32.gmra.mxu2 %v3917_v42  ;;  %v5498_v42 = vand.u32 4294901760, %v3921_v49 }
  0x83   :  { %625 = vmatmul.f32.gmra.mxu0 %v3895_v4 }
  0x85   :  { %514 = vmatmul.f32.gmra.mxu3 %v3938_v22  ;;  %710 = vmatmul.f32.gmra.mxu1 %v3895_v4 }
  0x87   :  { %411 = vmatmul.f32.gmra.mxu2 %v3954_v38 }
  0x8b   :  { %629 = vmatmul.f32.gmra.mxu0 %v3940_v28 }
  0x8d   :  { %520 = vmatmul.f32.gmra.mxu3 %v3964_v62  ;;  %714 = vmatmul.f32.gmra.mxu1 %v3940_v28  ;;  %v31_v62 = vld [vmem:[%s5316_s1 + $0x20] sm:$0xff] }
  0x8e   :  { %v772_v28 = vand.u32 4294901760, %v31_v62 }
  0x8f   :  { %416 = vmatmul.f32.gmra.mxu2 %v3675_v24 }
  0x90   :  { %v4040_v57 = vpop.f32.mrf.mxu0  ;;  %773 = vmatpush.msra.mxu2 %v772_v28  ;;  %v934_v24 = vsub.f32 %v31_v62, %v772_v28  ;;  %1128 = vmatpush.msra.mxu1 %v772_v28 }
  0x92   :  { %v190_v45 = vpop.f32.mrf.mxu2  ;;  %v4042_v41 = vpop.f32.mrf.mxu1  ;;  %1241 = vmatpush.msrb.mxu2 %v5498_v42  ;;  %1027 = vmatpush.msra.mxu0 %v934_v24 }
  0x93   :  { %v191_v38 = vadd.f32 %v4038_v2, %v190_v45  ;;  %633 = vmatmul.f32.gmra.mxu0 %v3655_v15  ;;  %v935_v45 = vand.u32 4294901760, %v934_v24 }
  0x95   :  { %526 = vmatmul.f32.gmra.mxu3 %v3687_v31  ;;  %718 = vmatmul.f32.gmra.mxu1 %v3655_v15  ;;  %v936_v31 = vsub.f32 %v934_v24, %v935_v45  ;;  %v5499_v15 = vand.u32 4294901760, %v3991_v32 }
  0x97   :  { %421 = vmatmul.f32.gmra.mxu2 %v3679_v27  ;;  %v937_v27 = vand.u32 4294901760, %v936_v31 }
  0x98   :  { %v319_v22 = vpop.f32.mrf.mxu3  ;;  %v4052_v4 = vpop.f32.mrf.mxu0  ;;  %1245 = vmatpush.msrb.mxu2 %v5499_v15 }
  0x99   :  { %v4056_v13 = vadd.f32 %v319_v22, %v191_v38  ;;  %938 = vmatpush.msra.mxu3 %v937_v27 }
  0x9a   :  { %v198_v48 = vpop.f32.mrf.mxu2  ;;  %v4058_v59 = vpop.f32.mrf.mxu1  ;;  %1249 = vmatpush.msrb.mxu2 %v929_v61 }
  0x9b   :  { %v199_v62 = vadd.f32 %v4038_v2, %v198_v48  ;;  %637 = vmatmul.f32.gmra.mxu0 %v3661_v18  ;;  %1332 = vmatpush.msrb.mxu3 %v3901_v5 }
  0x9c   :  { %1253 = vmatpush.msrb.mxu2 %v935_v45 }
  0x9d   :  { %532 = vmatmul.f32.gmra.mxu3 %v3701_v39  ;;  %722 = vmatmul.f32.gmra.mxu1 %v3661_v18 }
  0x9e   :  { %1334 = vmatpush.msrb.mxu3 %v3983_v55 }
  0x9f   :  { %426 = vmatmul.f32.gmra.mxu2 %v3724_v50 }
  0xa0   :  { %v323_v24 = vpop.f32.mrf.mxu3  ;;  %v4068_v38 = vpop.f32.mrf.mxu0  ;;  %1336 = vmatpush.msrb.mxu3 %v4015_v16 }
  0xa1   :  { %v4070_v15 = vadd.f32 %v323_v24, %v199_v62 }
  0xa2   :  { %v206_v48 = vpop.f32.mrf.mxu2  ;;  %v4073_v31 = vpop.f32.mrf.mxu1  ;;  %1338 = vmatpush.msrb.mxu3 %v772_v28 }
  0xa3   :  { %v207_v61 = vadd.f32 %v4038_v2, %v206_v48  ;;  %641 = vmatmul.f32.gmra.mxu0 %v3689_v33 }
  0xa5   :  { %538 = vmatmul.f32.gmra.mxu3 %v3745_v60  ;;  %726 = vmatmul.f32.gmra.mxu1 %v3689_v33 }
  0xa7   :  { %431 = vmatmul.f32.gmra.mxu2 %v3773_v8 }
  0xa8   :  { %v327_v27 = vpop.f32.mrf.mxu3  ;;  %v4081_v5 = vpop.f32.mrf.mxu0 }
  0xa9   :  { %v4083_v42 = vadd.f32 %v327_v27, %v207_v61 }
  0xaa   :  { %v214_v49 = vpop.f32.mrf.mxu2  ;;  %v4085_v22 = vpop.f32.mrf.mxu1 }
  0xab   :  { %v215_v55 = vadd.f32 %v4038_v2, %v214_v49  ;;  %645 = vmatmul.f32.gmra.mxu0 %v3752_v63 }
  0xad   :  { %544 = vmatmul.f32.gmra.mxu3 %v3795_v9  ;;  %730 = vmatmul.f32.gmra.mxu1 %v3752_v63 }
  0xaf   :  { %436 = vmatmul.f32.gmra.mxu2 %v3811_v21 }
  0xb0   :  { %v331_v28 = vpop.f32.mrf.mxu3  ;;  %v4092_v32 = vpop.f32.mrf.mxu0 }
  0xb1   :  { %v4094_v16 = vadd.f32 %v331_v28, %v215_v55 }
  0xb2   :  { %v222_v45 = vpop.f32.mrf.mxu2  ;;  %v4096_v62 = vpop.f32.mrf.mxu1 }
  0xb3   :  { %v223_v24 = vadd.f32 %v4038_v2, %v222_v45  ;;  %649 = vmatmul.f32.gmra.mxu0 %v3788_v14 }
  0xb5   :  { %550 = vmatmul.f32.gmra.mxu3 %v3834_v10  ;;  %734 = vmatmul.f32.gmra.mxu1 %v3788_v14 }
  0xb7   :  { %441 = vmatmul.f32.gmra.mxu2 %v3848_v40 }
  0xb8   :  { %v335_v48 = vpop.f32.mrf.mxu3  ;;  %v4103_v61 = vpop.f32.mrf.mxu0 }
  0xb9   :  { %v4105_v27 = vadd.f32 %v335_v48, %v223_v24 }
  0xba   :  { %v230_v49 = vpop.f32.mrf.mxu2  ;;  %v4107_v55 = vpop.f32.mrf.mxu1 }
  0xbb   :  { %v231_v28 = vadd.f32 %v4038_v2, %v230_v49  ;;  %653 = vmatmul.f32.gmra.mxu0 %v3828_v29 }
  0xbd   :  { %556 = vmatmul.f32.gmra.mxu3 %v3865_v51  ;;  %738 = vmatmul.f32.gmra.mxu1 %v3828_v29 }
  0xbf   :  { %446 = vmatmul.f32.gmra.mxu2 %v3886_v3 }
  0xc0   :  { %v339_v45 = vpop.f32.mrf.mxu3  ;;  %v4114_v40 = vpop.f32.mrf.mxu0 }
  0xc1   :  { %v4116_v10 = vadd.f32 %v339_v45, %v231_v28 }
  0xc2   :  { %v238_v24 = vpop.f32.mrf.mxu2  ;;  %v4118_v48 = vpop.f32.mrf.mxu1 }
  0xc3   :  { %v239_v14 = vadd.f32 %v4038_v2, %v238_v24  ;;  %657 = vmatmul.f32.gmra.mxu0 %v3867_v52  ;;  %v127_v24 = vadd.f32 %v4038_v2, %v4040_v57 }
  0xc5   :  { %562 = vmatmul.f32.gmra.mxu3 %v3907_v34  ;;  %742 = vmatmul.f32.gmra.mxu1 %v3867_v52 }
  0xc7   :  { %451 = vmatmul.f32.gmra.mxu2 %v3931_v1 }
  0xc8   :  { %v343_v49 = vpop.f32.mrf.mxu3  ;;  %v4125_v3 = vpop.f32.mrf.mxu0 }
  0xc9   :  { %v4127_v51 = vadd.f32 %v343_v49, %v239_v14  ;;  %v288_v14 = vadd.f32 %v4042_v41, %v127_v24 }
  0xca   :  { %v246_v28 = vpop.f32.mrf.mxu2  ;;  %v4129_v45 = vpop.f32.mrf.mxu1 }
  0xcb   :  { %5500 = vst [vmem:[#allocation57_spill] sm:$0xff] %v4127_v51  ;;  %v247_v29 = vadd.f32 %v4038_v2, %v246_v28  ;;  %661 = vmatmul.f32.gmra.mxu0 %v3909_v37  ;;  %v135_v28 = vadd.f32 %v4038_v2, %v4052_v4  ;;  %v143_v4 = vadd.f32 %v4038_v2, %v4068_v38 }
  0xcd   :  { %568 = vmatmul.f32.gmra.mxu3 %v3949_v17  ;;  %746 = vmatmul.f32.gmra.mxu1 %v3909_v37  ;;  %v292_v41 = vadd.f32 %v4058_v59, %v135_v28 }
  0xcf   :  { %779 = vmatmul.f32.vlgmr.msra.gmra.mxu2 %v3735_v56 }
  0xd0   :  { %v347_v1 = vpop.f32.mrf.mxu3  ;;  %v602_v34 = vpop.f32.mrf.mxu0 }
  0xd1   :  { %v4139_v49 = vadd.f32 %v347_v1, %v247_v29 }
  0xd2   :  { %v377_v52 = vpop.f32.mrf.mxu2  ;;  %v687_v51 = vpop.f32.mrf.mxu1 }
  0xd3   :  { %1030 = vmatmul.f32.vlgmr.msra.gmra.mxu0 %v3695_v36  ;;  %v378_v57 = vadd.f32 %v377_v52, %v288_v14 }
  0xd5   :  { %940 = vmatmul.f32.vlgmr.msra.gmra.mxu3 %v3684_v30  ;;  %1132 = vmatmul.f32.vlgmr.msra.gmra.mxu1 %v3712_v44 }
  0xd7   :  { %787 = vmatmul.f32.gmra.mxu2 %v3770_v7 }
  0xd8   :  { %v479_v56 = vpop.f32.mrf.mxu3  ;;  %v606_v17 = vpop.f32.mrf.mxu0 }
  0xd9   :  { %v480_v29 = vadd.f32 %v479_v56, %v378_v57  ;;  %v296_v56 = vadd.f32 %v4073_v31, %v143_v4 }
  0xda   :  { %v382_v1 = vpop.f32.mrf.mxu2  ;;  %v691_v24 = vpop.f32.mrf.mxu1 }
  0xdb   :  { %v603_v37 = vadd.f32 %v602_v34, %v480_v29  ;;  %1035 = vmatmul.f32.gmra.mxu0 %v3731_v53  ;;  %v383_v52 = vadd.f32 %v382_v1, %v292_v41 }
  0xdd   :  { %v4151_v14 = vadd.f32 %v687_v51, %v603_v37  ;;  %944 = vmatmul.f32.gmra.mxu3 %v3716_v46  ;;  %1138 = vmatmul.f32.gmra.mxu1 %v3739_v58  ;;  %v151_v51 = vadd.f32 %v4038_v2, %v4081_v5  ;;  %v159_v5 = vadd.f32 %v4038_v2, %v4092_v32 }
  0xde   :  { %v167_v32 = vadd.f32 %v4038_v2, %v4103_v61  ;;  %v175_v61 = vadd.f32 %v4038_v2, %v4114_v40  ;;  %v183_v40 = vadd.f32 %v4038_v2, %v4125_v3 }
  0xdf   :  { %795 = vmatmul.f32.gmra.mxu2 %v3818_v23 }
  0xe0   :  { %v485_v44 = vpop.f32.mrf.mxu3  ;;  %v610_v59 = vpop.f32.mrf.mxu0 }
  0xe1   :  { %v486_v28 = vadd.f32 %v485_v44, %v383_v52  ;;  %v300_v44 = vadd.f32 %v4085_v22, %v151_v51 }
  0xe2   :  { %v387_v34 = vpop.f32.mrf.mxu2  ;;  %v695_v57 = vpop.f32.mrf.mxu1 }
  0xe3   :  { %v607_v29 = vadd.f32 %v606_v17, %v486_v28  ;;  %1040 = vmatmul.f32.gmra.mxu0 %v3755_v0  ;;  %v388_v37 = vadd.f32 %v387_v34, %v296_v56  ;;  %v304_v34 = vadd.f32 %v4096_v62, %v159_v5 }
  0xe5   :  { %v4160_v38 = vadd.f32 %v691_v24, %v607_v29  ;;  %948 = vmatmul.f32.gmra.mxu3 %v3733_v54  ;;  %1144 = vmatmul.f32.gmra.mxu1 %v3776_v11 }
  0xe7   :  { %803 = vmatmul.f32.gmra.mxu2 %v3854_v43 }
  0xe8   :  { %v491_v41 = vpop.f32.mrf.mxu3  ;;  %v614_v31 = vpop.f32.mrf.mxu0 }
  0xe9   :  { %v492_v1 = vadd.f32 %v491_v41, %v388_v37 }
  0xea   :  { %v392_v17 = vpop.f32.mrf.mxu2  ;;  %v699_v4 = vpop.f32.mrf.mxu1 }
  0xeb   :  { %v611_v52 = vadd.f32 %v610_v59, %v492_v1  ;;  %1045 = vmatmul.f32.gmra.mxu0 %v3800_v19  ;;  %v393_v24 = vadd.f32 %v392_v17, %v300_v44  ;;  %v308_v1 = vadd.f32 %v4107_v55, %v167_v32  ;;  %v312_v32 = vadd.f32 %v4118_v48, %v175_v61 }
  0xec   :  { %v316_v61 = vadd.f32 %v4129_v45, %v183_v40 }
  0xed   :  { %v4169_v56 = vadd.f32 %v695_v57, %v611_v52  ;;  %952 = vmatmul.f32.gmra.mxu3 %v3778_v12  ;;  %1150 = vmatmul.f32.gmra.mxu1 %v3821_v25 }
  0xef   :  { %5501 = vst [vmem:[#allocation58_spill] sm:$0xff] %v4169_v56  ;;  %811 = vmatmul.f32.gmra.mxu2 %v3889_v6 }
  0xf0   :  { %v497_v28 = vpop.f32.mrf.mxu3  ;;  %v618_v22 = vpop.f32.mrf.mxu0 }
  0xf1   :  { %v498_v29 = vadd.f32 %v497_v28, %v393_v24  ;;  %v5503_v24 = vld [vmem:[#allocation37_spill] sm:$0xff] }
  0xf2   :  { %v397_v59 = vpop.f32.mrf.mxu2  ;;  %v703_v51 = vpop.f32.mrf.mxu1 }
  0xf3   :  { %v615_v37 = vadd.f32 %v614_v31, %v498_v29  ;;  %1050 = vmatmul.f32.gmra.mxu0 %v3839_v35  ;;  %v398_v57 = vadd.f32 %v397_v59, %v304_v34  ;;  %v5505_v34 = vld [vmem:[#allocation33_spill] sm:$0xff]  ;;  %v5506_v29 = vld [vmem:[#allocation40_spill] sm:$0xff] }
  0xf4   :  { %v5507_v59 = vld [vmem:[#allocation53_spill] sm:$0xff] }
  0xf5   :  { %v4178_v41 = vadd.f32 %v699_v4, %v615_v37  ;;  %956 = vmatmul.f32.gmra.mxu3 %v3823_v26  ;;  %1156 = vmatmul.f32.gmra.mxu1 %v3857_v47 }
  0xf7   :  { %5502 = vst [vmem:[#allocation59_spill] sm:$0xff] %v4178_v41  ;;  %819 = vmatmul.f32.gmra.mxu2 %v3935_v20 }
  0xf8   :  { %v503_v44 = vpop.f32.mrf.mxu3  ;;  %v622_v62 = vpop.f32.mrf.mxu0 }
  0xf9   :  { %v504_v17 = vadd.f32 %v503_v44, %v398_v57 }
  0xfa   :  { %v402_v31 = vpop.f32.mrf.mxu2  ;;  %v707_v52 = vpop.f32.mrf.mxu1 }
  0xfb   :  { %v619_v5 = vadd.f32 %v618_v22, %v504_v17  ;;  %1055 = vmatmul.f32.gmra.mxu0 %v5503_v24  ;;  %v403_v4 = vadd.f32 %v402_v31, %v308_v1  ;;  %v5508_v24 = vld [vmem:[#allocation45_spill] sm:$0xff] }
  0xfc   :  { %v5510_v31 = vld [vmem:[#allocation41_spill] sm:$0xff] }
  0xfd   :  { %v4187_v28 = vadd.f32 %v703_v51, %v619_v5  ;;  %960 = vmatmul.f32.gmra.mxu3 %v5505_v34  ;;  %1162 = vmatmul.f32.gmra.mxu1 %v5506_v29  ;;  %v5511_v5 = vld [vmem:[#allocation48_spill] sm:$0xff] }
  0xfe   :  { %v5512_v29 = vld [vmem:[#allocation56_spill] sm:$0xff] }
  0xff   :  { %5504 = vst [vmem:[#allocation60_spill] sm:$0xff] %v4187_v28  ;;  %827 = vmatmul.f32.gmra.mxu2 %v5507_v59 }
 0x100   :  { %v509_v37 = vpop.f32.mrf.mxu3  ;;  %v626_v55 = vpop.f32.mrf.mxu0 }
 0x101   :  { %v510_v57 = vadd.f32 %v509_v37, %v403_v4 }
 0x102   :  { %v407_v22 = vpop.f32.mrf.mxu2  ;;  %v711_v44 = vpop.f32.mrf.mxu1 }
 0x103   :  { %v623_v17 = vadd.f32 %v622_v62, %v510_v57  ;;  %1060 = vmatmul.f32.gmra.mxu0 %v5508_v24  ;;  %v408_v51 = vadd.f32 %v407_v22, %v312_v32  ;;  %v5513_v24 = vld [vmem:[#allocation52_spill] sm:$0xff]  ;;  %v5516_v32 = vld [vmem:[#allocation54_spill] sm:$0xff] }
 0x104   :  { %v5517_v22 = vld [vmem:[#allocation8_spill] sm:$0xff] }
 0x105   :  { %v4196_v1 = vadd.f32 %v707_v52, %v623_v17  ;;  %964 = vmatmul.f32.gmra.mxu3 %v5510_v31  ;;  %1168 = vmatmul.f32.gmra.mxu1 %v5511_v5  ;;  %v5515_v52 = vld [vmem:[#allocation49_spill] sm:$0xff] }
 0x107   :  { %5509 = vst [vmem:[#allocation33_spill] sm:$0xff] %v4196_v1  ;;  %835 = vmatmul.f32.gmra.mxu2 %v5512_v29 }
 0x108   :  { %v515_v28 = vpop.f32.mrf.mxu3  ;;  %v630_v48 = vpop.f32.mrf.mxu0 }
 0x109   :  { %v516_v4 = vadd.f32 %v515_v28, %v408_v51 }
 0x10a   :  { %v412_v62 = vpop.f32.mrf.mxu2  ;;  %v715_v37 = vpop.f32.mrf.mxu1 }
 0x10b   :  { %v627_v57 = vadd.f32 %v626_v55, %v516_v4  ;;  %1065 = vmatmul.f32.gmra.mxu0 %v5513_v24  ;;  %v413_v3 = vadd.f32 %v412_v62, %v316_v61  ;;  %v5518_v55 = vld [vmem:[#allocation3_spill] sm:$0xff]  ;;  %v5521_v61 = vld [vmem:[#allocation5_spill] sm:$0xff] }
 0x10c   :  { %v5522_v4 = vld [vmem:[#allocation13_spill] sm:$0xff] }
 0x10d   :  { %v4203_v2 = vadd.f32 %v711_v44, %v627_v57  ;;  %968 = vmatmul.f32.gmra.mxu3 %v5515_v52  ;;  %1174 = vmatmul.f32.gmra.mxu1 %v5516_v32  ;;  %v5520_v44 = vld [vmem:[#allocation2_spill] sm:$0xff] }
 0x10f   :  { %5514 = vst [vmem:[#allocation41_spill] sm:$0xff] %v4203_v2  ;;  %843 = vmatmul.f32.gmra.mxu2 %v5517_v22 }
 0x110   :  { %v521_v17 = vpop.f32.mrf.mxu3  ;;  %v634_v5 = vpop.f32.mrf.mxu0 }
 0x111   :  { %v522_v1 = vadd.f32 %v521_v17, %v413_v3 }
 0x112   :  { %v417_v47 = vpop.f32.mrf.mxu2  ;;  %v719_v45 = vpop.f32.mrf.mxu1 }
 0x113   :  { %v418_v28 = vadd.f32 %v417_v47, %v4056_v13  ;;  %v631_v40 = vadd.f32 %v630_v48, %v522_v1  ;;  %1070 = vmatmul.f32.gmra.mxu0 %v5518_v55  ;;  %v5523_v47 = vld [vmem:[#allocation4_spill] sm:$0xff]  ;;  %v5525_v1 = vld [vmem:[#allocation19_spill] sm:$0xff] }
 0x115   :  { %v4210_v51 = vadd.f32 %v715_v37, %v631_v40  ;;  %972 = vmatmul.f32.gmra.mxu3 %v5520_v44  ;;  %1180 = vmatmul.f32.gmra.mxu1 %v5521_v61 }
 0x117   :  { %5519 = vst [vmem:[#allocation49_spill] sm:$0xff] %v4210_v51  ;;  %851 = vmatmul.f32.gmra.mxu2 %v5522_v4 }
 0x118   :  { %v527_v62 = vpop.f32.mrf.mxu3  ;;  %v638_v57 = vpop.f32.mrf.mxu0 }
 0x119   :  { %v528_v32 = vadd.f32 %v527_v62, %v418_v28 }
 0x11a   :  { %v422_v2 = vpop.f32.mrf.mxu2  ;;  %v723_v3 = vpop.f32.mrf.mxu1 }
 0x11b   :  { %v423_v17 = vadd.f32 %v422_v2, %v4070_v15  ;;  %v635_v24 = vadd.f32 %v634_v5, %v528_v32  ;;  %1075 = vmatmul.f32.gmra.mxu0 %v5523_v47 }
 0x11d   :  { %v4217_v13 = vadd.f32 %v719_v45, %v635_v24  ;;  %976 = vmatmul.f32.gmra.mxu3 %v3661_v18  ;;  %1186 = vmatmul.f32.gmra.mxu1 %v3701_v39  ;;  %v5527_v24 = vld [vmem:[#allocation27_spill] sm:$0xff] }
 0x11f   :  { %5524 = vst [vmem:[#allocation61_spill] sm:$0xff] %v4217_v13  ;;  %859 = vmatmul.f32.gmra.mxu2 %v5525_v1 }
 0x120   :  { %v533_v48 = vpop.f32.mrf.mxu3  ;;  %v642_v37 = vpop.f32.mrf.mxu0 }
 0x121   :  { %v534_v40 = vadd.f32 %v533_v48, %v423_v17 }
 0x122   :  { %v427_v61 = vpop.f32.mrf.mxu2  ;;  %v727_v28 = vpop.f32.mrf.mxu1 }
 0x123   :  { %v428_v62 = vadd.f32 %v427_v61, %v4083_v42  ;;  %v639_v51 = vadd.f32 %v638_v57, %v534_v40  ;;  %1080 = vmatmul.f32.gmra.mxu0 %v3724_v50  ;;  %v5529_v57 = vld [vmem:[#allocation36_spill] sm:$0xff] }
 0x125   :  { %v4224_v15 = vadd.f32 %v723_v3, %v639_v51  ;;  %980 = vmatmul.f32.gmra.mxu3 %v3689_v33  ;;  %1192 = vmatmul.f32.gmra.mxu1 %v3745_v60  ;;  %v38_v51 = vld [vmem:[%s5316_s1 + $0x58] sm:$0x7]  ;;  %v5531_v60 = vld [vmem:[#allocation18_spill] sm:$0xff] }
 0x126   :  { %v1422_v61 = vsel %vm96_vm0, %v38_v51, 0 }
 0x127   :  { %5526 = vst [vmem:[#allocation62_spill] sm:$0xff] %v4224_v15  ;;  %867 = vmatmul.f32.gmra.mxu2 %v5527_v24  ;;  %v4240_v3 = vand.u32 4294901760, %v1422_v61  ;;  %v5533_v15 = vld [vmem:[#allocation44_spill] sm:$0xff] }
 0x128   :  { %v539_v5 = vpop.f32.mrf.mxu3  ;;  %v646_v2 = vpop.f32.mrf.mxu0 }
 0x129   :  { %v540_v32 = vadd.f32 %v539_v5, %v428_v62  ;;  %1437 = vmatpush.msrb.mxu0 %v4240_v3  ;;  %1792 = vmatpush.msra.mxu3 %v4240_v3 }
 0x12a   :  { %v432_v45 = vpop.f32.mrf.mxu2  ;;  %v731_v17 = vpop.f32.mrf.mxu1 }
 0x12b   :  { %v433_v48 = vadd.f32 %v432_v45, %v4094_v16  ;;  %v643_v39 = vadd.f32 %v642_v37, %v540_v32  ;;  %1085 = vmatmul.f32.gmra.mxu0 %v3773_v8  ;;  %v36_v45 = vld [vmem:[%s5316_s1 + $0x48] sm:$0xff] }
 0x12d   :  { %v4231_v42 = vadd.f32 %v727_v28, %v643_v39  ;;  %984 = vmatmul.f32.gmra.mxu3 %v3752_v63  ;;  %1198 = vmatmul.f32.gmra.mxu1 %v3795_v9  ;;  %v37_v39 = vld [vmem:[%s5316_s1 + $0x50] sm:$0xff]  ;;  %v1586_v28 = vsub.f32 %v1422_v61, %v4240_v3  ;;  %v1440_v61 = vand.u32 4294901760, %v36_v45 }
 0x12e   :  { %v4248_v62 = vand.u32 4294901760, %v37_v39 }
 0x12f   :  { %5528 = vst [vmem:[#allocation63_spill] sm:$0xff] %v4231_v42  ;;  %875 = vmatmul.f32.gmra.mxu2 %v5529_v57  ;;  %v35_v42 = vld [vmem:[%s5316_s1 + $0x40] sm:$0xff] }
 0x130   :  { %v545_v16 = vpop.f32.mrf.mxu3  ;;  %v650_v37 = vpop.f32.mrf.mxu0  ;;  %1688 = vmatpush.msra.mxu2 %v1586_v28  ;;  %1439 = vmatpush.msrb.mxu0 %v4248_v62 }
 0x131   :  { %v546_v40 = vadd.f32 %v545_v16, %v433_v48  ;;  %v1587_v48 = vand.u32 4294901760, %v1586_v28  ;;  %v1592_v16 = vsub.f32 %v37_v39, %v4248_v62  ;;  %1794 = vmatpush.msra.mxu3 %v4248_v62 }
 0x132   :  { %v437_v5 = vpop.f32.mrf.mxu2  ;;  %v735_v32 = vpop.f32.mrf.mxu1  ;;  %1441 = vmatpush.msrb.mxu0 %v1440_v61 }
 0x133   :  { %v438_v51 = vadd.f32 %v437_v5, %v4105_v27  ;;  %v647_v9 = vadd.f32 %v646_v2, %v546_v40  ;;  %1090 = vmatmul.f32.gmra.mxu0 %v3811_v21  ;;  %v5532_v27 = vld [vmem:[#allocation28_spill] sm:$0xff]  ;;  %v1588_v2 = vsub.f32 %v1586_v28, %v1587_v48  ;;  %v1442_v40 = vand.u32 4294901760, %v35_v42  ;;  %1691 = vmatpush.msra.mxu2 %v1592_v16 }
 0x134   :  { %v1598_v5 = vsub.f32 %v36_v45, %v1440_v61  ;;  %v1593_v21 = vand.u32 4294901760, %v1592_v16  ;;  %1796 = vmatpush.msra.mxu3 %v1440_v61 }
 0x135   :  { %v4261_v8 = vadd.f32 %v731_v17, %v647_v9  ;;  %988 = vmatmul.f32.gmra.mxu3 %v5531_v60  ;;  %1204 = vmatmul.f32.gmra.mxu1 %v5532_v27  ;;  %v1589_v39 = vand.u32 4294901760, %v1588_v2  ;;  %v1604_v13 = vsub.f32 %v35_v42, %v1442_v40  ;;  %v5534_v42 = vld [vmem:[#allocation30_spill] sm:$0xff] }
 0x136   :  { %v1599_v50 = vand.u32 4294901760, %v1598_v5  ;;  %v1594_v9 = vsub.f32 %v1592_v16, %v1593_v21  ;;  %1443 = vmatpush.msrb.mxu0 %v1442_v40  ;;  %1694 = vmatpush.msra.mxu2 %v1598_v5 }
 0x137   :  { %5530 = vst [vmem:[#allocation64_spill] sm:$0xff] %v4261_v8  ;;  %883 = vmatmul.f32.gmra.mxu2 %v5533_v15  ;;  %1590 = vmatpush.msrb.mxu1 %v1589_v39  ;;  %v1605_v28 = vand.u32 4294901760, %v1604_v13  ;;  %v5537_v39 = vld [vmem:[#allocation50_spill] sm:$0xff] }
 0x138   :  { %v551_v47 = vpop.f32.mrf.mxu3  ;;  %v654_v55 = vpop.f32.mrf.mxu0  ;;  %v1600_v27 = vsub.f32 %v1598_v5, %v1599_v50  ;;  %1798 = vmatpush.msra.mxu3 %v1442_v40  ;;  %v1595_v41 = vand.u32 4294901760, %v1594_v9  ;;  %1697 = vmatpush.msra.mxu2 %v1604_v13  ;;  %v5542_v9 = vld [vmem:[#allocation55_spill] sm:$0xff] }
 0x139   :  { %v552_v17 = vadd.f32 %v551_v47, %v438_v51  ;;  %1911 = vmatpush.msra.mxu0 %v1587_v48  ;;  %v1606_v56 = vsub.f32 %v1604_v13, %v1605_v28  ;;  %v5535_v47 = vld [vmem:[#allocation26_spill] sm:$0xff] }
 0x13a   :  { %v442_v45 = vpop.f32.mrf.mxu2  ;;  %v739_v8 = vpop.f32.mrf.mxu1  ;;  %v1601_v25 = vand.u32 4294901760, %v1600_v27  ;;  %1596 = vmatpush.msrb.mxu1 %v1595_v41  ;;  %v5536_v51 = vld [vmem:[#allocation34_spill] sm:$0xff] }
 0x13b   :  { %v443_v2 = vadd.f32 %v442_v45, %v4116_v10  ;;  %v651_v35 = vadd.f32 %v650_v37, %v552_v17  ;;  %1095 = vmatmul.f32.gmra.mxu0 %v5534_v42  ;;  %v1607_v5 = vand.u32 4294901760, %v1606_v56  ;;  %v5539_v27 = vld [vmem:[#allocation38_spill] sm:$0xff] }
 0x13c   :  { %1915 = vmatpush.msra.mxu0 %v1593_v21  ;;  %1602 = vmatpush.msrb.mxu1 %v1601_v25  ;;  %v5541_v56 = vld [vmem:[#allocation42_spill] sm:$0xff] }
 0x13d   :  { %v4268_v16 = vadd.f32 %v735_v32, %v651_v35  ;;  %992 = vmatmul.f32.gmra.mxu3 %v5535_v47  ;;  %1210 = vmatmul.f32.gmra.mxu1 %v5536_v51  ;;  %v5538_v35 = vld [vmem:[#allocation57_spill] sm:$0xff] }
 0x13e   :  { %1919 = vmatpush.msra.mxu0 %v1599_v50  ;;  %1608 = vmatpush.msrb.mxu1 %v1607_v5  ;;  %v5540_v50 = vld [vmem:[#allocation35_spill] sm:$0xff] }
 0x13f   :  { %891 = vmatmul.f32.gmra.mxu2 %v5537_v39 }
 0x140   :  { %v557_v48 = vpop.f32.mrf.mxu3  ;;  %v658_v10 = vpop.f32.mrf.mxu0  ;;  %1923 = vmatpush.msra.mxu0 %v1605_v28  ;;  %2002 = vmatpush.msra.mxu1 %v4240_v3 }
 0x141   :  { %v558_v37 = vadd.f32 %v557_v48, %v443_v2  ;;  %v5543_v48 = vld [vmem:[#allocation46_spill] sm:$0xff] }
 0x142   :  { %v447_v41 = vpop.f32.mrf.mxu2  ;;  %v743_v21 = vpop.f32.mrf.mxu1  ;;  %2004 = vmatpush.msra.mxu1 %v4248_v62  ;;  %v5545_v62 = vld [vmem:[#allocation43_spill] sm:$0xff] }
 0x143   :  { %v448_v13 = vadd.f32 %v447_v41, %v5538_v35  ;;  %v655_v32 = vadd.f32 %v654_v55, %v558_v37  ;;  %1100 = vmatmul.f32.gmra.mxu0 %v5539_v27  ;;  %v5546_v37 = vld [vmem:[#allocation51_spill] sm:$0xff] }
 0x144   :  { %2006 = vmatpush.msra.mxu1 %v1440_v61 }
 0x145   :  { %v4277_v25 = vadd.f32 %v739_v8, %v655_v32  ;;  %996 = vmatmul.f32.gmra.mxu3 %v5540_v50  ;;  %1216 = vmatmul.f32.gmra.mxu1 %v5541_v56  ;;  %v5547_v32 = vld [vmem:[#allocation11_spill] sm:$0xff] }
 0x146   :  { %2008 = vmatpush.msra.mxu1 %v1442_v40  ;;  %v4292_v40 = vld [vmem:[%s5316_s1 + $0xc1] ss:$0 sm:$0xff] }
 0x147   :  { %899 = vmatmul.f32.gmra.mxu2 %v5542_v9 }
 0x148   :  { %v563_v17 = vpop.f32.mrf.mxu3  ;;  %v662_v3 = vpop.f32.mrf.mxu0 }
 0x149   :  { %v564_v28 = vadd.f32 %v563_v17, %v448_v13 }
 0x14a   :  { %v452_v45 = vpop.f32.mrf.mxu2  ;;  %v747_v2 = vpop.f32.mrf.mxu1 }
 0x14b   :  { %v453_v55 = vadd.f32 %v452_v45, %v4139_v49  ;;  %v659_v5 = vadd.f32 %v658_v10, %v564_v28  ;;  %1105 = vmatmul.f32.gmra.mxu0 %v5543_v48 }
 0x14d   :  { %v4284_v8 = vadd.f32 %v743_v21, %v659_v5  ;;  %1000 = vmatmul.f32.gmra.mxu3 %v5545_v62  ;;  %1222 = vmatmul.f32.gmra.mxu1 %v5546_v37 }
 0x14f   :  { %5544 = vst [vmem:[#allocation18_spill] sm:$0xff] %v4284_v8  ;;  %1255 = vmatmul.f32.vlgmr.msrb.gmra.mxu2 %v3684_v30 }
 0x150   :  { %v569_v61 = vpop.f32.mrf.mxu3  ;;  %v1031_v41 = vpop.f32.mrf.mxu0 }
 0x151   :  { %v570_v35 = vadd.f32 %v569_v61, %v453_v55 }
 0x152   :  { %v780_v49 = vpop.f32.mrf.mxu2  ;;  %v1133_v10 = vpop.f32.mrf.mxu1 }
 0x153   :  { %v663_v13 = vadd.f32 %v662_v3, %v570_v35  ;;  %1449 = vmatmul.f32.vlgmr.msrb.gmra.mxu0 %v5547_v32  ;;  %v781_v21 = vadd.f32 %v4292_v40, %v780_v49 }
 0x155   :  { %v4296_v17 = vadd.f32 %v747_v2, %v663_v13  ;;  %1340 = vmatmul.f32.vlgmr.msrb.gmra.mxu3 %v3684_v30  ;;  %1610 = vmatmul.f32.vlgmr.msrb.gmra.mxu1 %v3684_v30 }
 0x157   :  { %5548 = vst [vmem:[#allocation26_spill] sm:$0xff] %v4296_v17  ;;  %1259 = vmatmul.f32.gmra.mxu2 %v3716_v46 }
 0x158   :  { %v941_v28 = vpop.f32.mrf.mxu3  ;;  %v1036_v45 = vpop.f32.mrf.mxu0 }
 0x159   :  { %v942_v55 = vadd.f32 %v941_v28, %v781_v21 }
 0x15a   :  { %v788_v5 = vpop.f32.mrf.mxu2  ;;  %v1139_v61 = vpop.f32.mrf.mxu1 }
 0x15b   :  { %v1032_v37 = vadd.f32 %v1031_v41, %v942_v55  ;;  %1457 = vmatmul.f32.gmra.mxu0 %v3770_v7  ;;  %v789_v3 = vadd.f32 %v4292_v40, %v788_v5 }
 0x15d   :  { %v4303_v35 = vadd.f32 %v1133_v10, %v1032_v37  ;;  %1344 = vmatmul.f32.gmra.mxu3 %v3716_v46  ;;  %1614 = vmatmul.f32.gmra.mxu1 %v3716_v46 }
 0x15f   :  { %1263 = vmatmul.f32.gmra.mxu2 %v3733_v54 }
 0x160   :  { %v945_v2 = vpop.f32.mrf.mxu3  ;;  %v1041_v49 = vpop.f32.mrf.mxu0 }
 0x161   :  { %v946_v13 = vadd.f32 %v945_v2, %v789_v3 }
 0x162   :  { %v796_v17 = vpop.f32.mrf.mxu2  ;;  %v1145_v21 = vpop.f32.mrf.mxu1 }
 0x163   :  { %v1037_v28 = vadd.f32 %v1036_v45, %v946_v13  ;;  %1465 = vmatmul.f32.gmra.mxu0 %v3818_v23  ;;  %v797_v41 = vadd.f32 %v4292_v40, %v796_v17 }
 0x165   :  { %v4310_v55 = vadd.f32 %v1139_v61, %v1037_v28  ;;  %1348 = vmatmul.f32.gmra.mxu3 %v3733_v54  ;;  %1618 = vmatmul.f32.gmra.mxu1 %v3733_v54 }
 0x167   :  { %1267 = vmatmul.f32.gmra.mxu2 %v3778_v12 }
 0x168   :  { %v949_v37 = vpop.f32.mrf.mxu3  ;;  %v1046_v10 = vpop.f32.mrf.mxu0 }
 0x169   :  { %v950_v5 = vadd.f32 %v949_v37, %v797_v41 }
 0x16a   :  { %v804_v7 = vpop.f32.mrf.mxu2  ;;  %v1151_v3 = vpop.f32.mrf.mxu1 }
 0x16b   :  { %v1042_v2 = vadd.f32 %v1041_v49, %v950_v5  ;;  %1473 = vmatmul.f32.gmra.mxu0 %v3854_v43  ;;  %v805_v45 = vadd.f32 %v4292_v40, %v804_v7 }
 0x16d   :  { %v4317_v13 = vadd.f32 %v1145_v21, %v1042_v2  ;;  %1352 = vmatmul.f32.gmra.mxu3 %v3778_v12  ;;  %1622 = vmatmul.f32.gmra.mxu1 %v3778_v12 }
 0x16f   :  { %1271 = vmatmul.f32.gmra.mxu2 %v3823_v26 }
 0x170   :  { %v953_v17 = vpop.f32.mrf.mxu3  ;;  %v1051_v61 = vpop.f32.mrf.mxu0 }
 0x171   :  { %v954_v28 = vadd.f32 %v953_v17, %v805_v45 }
 0x172   :  { %v812_v23 = vpop.f32.mrf.mxu2  ;;  %v1157_v41 = vpop.f32.mrf.mxu1 }
 0x173   :  { %v1047_v37 = vadd.f32 %v1046_v10, %v954_v28  ;;  %1481 = vmatmul.f32.gmra.mxu0 %v3889_v6  ;;  %v813_v49 = vadd.f32 %v4292_v40, %v812_v23 }
 0x175   :  { %v4324_v5 = vadd.f32 %v1151_v3, %v1047_v37  ;;  %1356 = vmatmul.f32.gmra.mxu3 %v3823_v26  ;;  %1626 = vmatmul.f32.gmra.mxu1 %v3823_v26 }
 0x177   :  { %1275 = vmatmul.f32.gmra.mxu2 %v5505_v34 }
 0x178   :  { %v957_v7 = vpop.f32.mrf.mxu3  ;;  %v1056_v21 = vpop.f32.mrf.mxu0 }
 0x179   :  { %v958_v2 = vadd.f32 %v957_v7, %v813_v49 }
 0x17a   :  { %v820_v43 = vpop.f32.mrf.mxu2  ;;  %v1163_v45 = vpop.f32.mrf.mxu1 }
 0x17b   :  { %v1052_v17 = vadd.f32 %v1051_v61, %v958_v2  ;;  %1489 = vmatmul.f32.gmra.mxu0 %v3935_v20  ;;  %v821_v10 = vadd.f32 %v4292_v40, %v820_v43 }
 0x17d   :  { %v4331_v28 = vadd.f32 %v1157_v41, %v1052_v17  ;;  %1360 = vmatmul.f32.gmra.mxu3 %v5505_v34  ;;  %1630 = vmatmul.f32.gmra.mxu1 %v5505_v34 }
 0x17f   :  { %1279 = vmatmul.f32.gmra.mxu2 %v5510_v31 }
 0x180   :  { %v961_v23 = vpop.f32.mrf.mxu3  ;;  %v1061_v3 = vpop.f32.mrf.mxu0 }
 0x181   :  { %v962_v37 = vadd.f32 %v961_v23, %v821_v10 }
 0x182   :  { %v828_v6 = vpop.f32.mrf.mxu2  ;;  %v1169_v49 = vpop.f32.mrf.mxu1 }
 0x183   :  { %v1057_v7 = vadd.f32 %v1056_v21, %v962_v37  ;;  %1497 = vmatmul.f32.gmra.mxu0 %v5507_v59  ;;  %v829_v61 = vadd.f32 %v4292_v40, %v828_v6 }
 0x185   :  { %v4338_v2 = vadd.f32 %v1163_v45, %v1057_v7  ;;  %1364 = vmatmul.f32.gmra.mxu3 %v5510_v31  ;;  %1634 = vmatmul.f32.gmra.mxu1 %v5510_v31 }
 0x187   :  { %1283 = vmatmul.f32.gmra.mxu2 %v5515_v52 }
 0x188   :  { %v965_v43 = vpop.f32.mrf.mxu3  ;;  %v1066_v41 = vpop.f32.mrf.mxu0 }
 0x189   :  { %v966_v17 = vadd.f32 %v965_v43, %v829_v61 }
 0x18a   :  { %v836_v20 = vpop.f32.mrf.mxu2  ;;  %v1175_v10 = vpop.f32.mrf.mxu1 }
 0x18b   :  { %v1062_v23 = vadd.f32 %v1061_v3, %v966_v17  ;;  %1505 = vmatmul.f32.gmra.mxu0 %v5512_v29  ;;  %v837_v21 = vadd.f32 %v4292_v40, %v836_v20 }
 0x18d   :  { %v4345_v37 = vadd.f32 %v1169_v49, %v1062_v23  ;;  %1368 = vmatmul.f32.gmra.mxu3 %v5515_v52  ;;  %1638 = vmatmul.f32.gmra.mxu1 %v5515_v52 }
 0x18f   :  { %1287 = vmatmul.f32.gmra.mxu2 %v5520_v44 }
 0x190   :  { %v969_v6 = vpop.f32.mrf.mxu3  ;;  %v1071_v45 = vpop.f32.mrf.mxu0 }
 0x191   :  { %v970_v7 = vadd.f32 %v969_v6, %v837_v21 }
 0x192   :  { %v844_v59 = vpop.f32.mrf.mxu2  ;;  %v1181_v61 = vpop.f32.mrf.mxu1 }
 0x193   :  { %v1067_v43 = vadd.f32 %v1066_v41, %v970_v7  ;;  %1513 = vmatmul.f32.gmra.mxu0 %v5517_v22  ;;  %v845_v3 = vadd.f32 %v4292_v40, %v844_v59 }
 0x195   :  { %v4352_v17 = vadd.f32 %v1175_v10, %v1067_v43  ;;  %1372 = vmatmul.f32.gmra.mxu3 %v5520_v44  ;;  %1642 = vmatmul.f32.gmra.mxu1 %v5520_v44 }
 0x197   :  { %1291 = vmatmul.f32.gmra.mxu2 %v3661_v18 }
 0x198   :  { %v973_v20 = vpop.f32.mrf.mxu3  ;;  %v1076_v49 = vpop.f32.mrf.mxu0 }
 0x199   :  { %v974_v23 = vadd.f32 %v973_v20, %v845_v3 }
 0x19a   :  { %v852_v29 = vpop.f32.mrf.mxu2  ;;  %v1187_v21 = vpop.f32.mrf.mxu1 }
 0x19b   :  { %v1072_v6 = vadd.f32 %v1071_v45, %v974_v23  ;;  %1521 = vmatmul.f32.gmra.mxu0 %v5522_v4  ;;  %v853_v41 = vadd.f32 %v4292_v40, %v852_v29 }
 0x19d   :  { %v4359_v7 = vadd.f32 %v1181_v61, %v1072_v6  ;;  %1376 = vmatmul.f32.gmra.mxu3 %v3661_v18  ;;  %1646 = vmatmul.f32.gmra.mxu1 %v3661_v18 }
 0x19f   :  { %1295 = vmatmul.f32.gmra.mxu2 %v3689_v33 }
 0x1a0   :  { %v977_v59 = vpop.f32.mrf.mxu3  ;;  %v1081_v10 = vpop.f32.mrf.mxu0 }
 0x1a1   :  { %v978_v43 = vadd.f32 %v977_v59, %v853_v41 }
 0x1a2   :  { %v860_v22 = vpop.f32.mrf.mxu2  ;;  %v1193_v3 = vpop.f32.mrf.mxu1 }
 0x1a3   :  { %v1077_v20 = vadd.f32 %v1076_v49, %v978_v43  ;;  %1529 = vmatmul.f32.gmra.mxu0 %v5525_v1  ;;  %v861_v45 = vadd.f32 %v4292_v40, %v860_v22 }
 0x1a5   :  { %v4366_v23 = vadd.f32 %v1187_v21, %v1077_v20  ;;  %1380 = vmatmul.f32.gmra.mxu3 %v3689_v33  ;;  %1650 = vmatmul.f32.gmra.mxu1 %v3689_v33 }
 0x1a7   :  { %1299 = vmatmul.f32.gmra.mxu2 %v3752_v63 }
 0x1a8   :  { %v981_v29 = vpop.f32.mrf.mxu3  ;;  %v1086_v61 = vpop.f32.mrf.mxu0 }
 0x1a9   :  { %v982_v6 = vadd.f32 %v981_v29, %v861_v45 }
 0x1aa   :  { %v868_v4 = vpop.f32.mrf.mxu2  ;;  %v1199_v41 = vpop.f32.mrf.mxu1 }
 0x1ab   :  { %v1082_v59 = vadd.f32 %v1081_v10, %v982_v6  ;;  %1537 = vmatmul.f32.gmra.mxu0 %v5527_v24  ;;  %v869_v49 = vadd.f32 %v4292_v40, %v868_v4  ;;  %v42_v4 = vld [vmem:[%s5316_s1 + $0x78] sm:$0x7] }
 0x1ac   :  { %v2091_v10 = vsel %vm96_vm0, %v42_v4, 0 }
 0x1ad   :  { %v4373_v43 = vadd.f32 %v1193_v3, %v1082_v59  ;;  %1384 = vmatmul.f32.gmra.mxu3 %v3752_v63  ;;  %1654 = vmatmul.f32.gmra.mxu1 %v3752_v63  ;;  %v4388_v59 = vand.u32 4294901760, %v2091_v10 }
 0x1af   :  { %1303 = vmatmul.f32.gmra.mxu2 %v5531_v60  ;;  %2461 = vmatpush.msrb.mxu1 %v4388_v59 }
 0x1b0   :  { %v985_v22 = vpop.f32.mrf.mxu3  ;;  %v1091_v21 = vpop.f32.mrf.mxu0  ;;  %2106 = vmatpush.msrb.mxu2 %v4388_v59 }
 0x1b1   :  { %v986_v20 = vadd.f32 %v985_v22, %v869_v49 }
 0x1b2   :  { %v876_v1 = vpop.f32.mrf.mxu2  ;;  %v1205_v45 = vpop.f32.mrf.mxu1 }
 0x1b3   :  { %v1087_v29 = vadd.f32 %v1086_v61, %v986_v20  ;;  %1545 = vmatmul.f32.gmra.mxu0 %v5529_v57  ;;  %v877_v3 = vadd.f32 %v4292_v40, %v876_v1  ;;  %v4392_v61 = vsub.f32 %v2091_v10, %v4388_v59 }
 0x1b5   :  { %v4384_v6 = vadd.f32 %v1199_v41, %v1087_v29  ;;  %1388 = vmatmul.f32.gmra.mxu3 %v5531_v60  ;;  %1658 = vmatmul.f32.gmra.mxu1 %v5531_v60  ;;  %v5424_v41 = vand.u32 4294901760, %v4392_v61 }
 0x1b6   :  { %2357 = vmatpush.msrb.mxu0 %v4392_v61 }
 0x1b7   :  { %1307 = vmatmul.f32.gmra.mxu2 %v5535_v47  ;;  %v2257_v10 = vsub.f32 %v4392_v61, %v5424_v41 }
 0x1b8   :  { %v989_v49 = vpop.f32.mrf.mxu3  ;;  %v1096_v22 = vpop.f32.mrf.mxu0 }
 0x1b9   :  { %v990_v1 = vadd.f32 %v989_v49, %v877_v3  ;;  %v2258_v3 = vand.u32 4294901760, %v2257_v10 }
 0x1ba   :  { %v884_v20 = vpop.f32.mrf.mxu2  ;;  %v1211_v29 = vpop.f32.mrf.mxu1 }
 0x1bb   :  { %v1092_v4 = vadd.f32 %v1091_v21, %v990_v1  ;;  %1553 = vmatmul.f32.gmra.mxu0 %v5533_v15  ;;  %v885_v57 = vadd.f32 %v4292_v40, %v884_v20  ;;  %2259 = vmatpush.msrb.mxu3 %v2258_v3 }
 0x1bd   :  { %v4403_v24 = vadd.f32 %v1205_v45, %v1092_v4  ;;  %1392 = vmatmul.f32.gmra.mxu3 %v5535_v47  ;;  %1662 = vmatmul.f32.gmra.mxu1 %v5535_v47 }
 0x1bf   :  { %1311 = vmatmul.f32.gmra.mxu2 %v5540_v50 }
 0x1c0   :  { %v993_v49 = vpop.f32.mrf.mxu3  ;;  %v1101_v21 = vpop.f32.mrf.mxu0 }
 0x1c1   :  { %v994_v1 = vadd.f32 %v993_v49, %v885_v57 }
 0x1c2   :  { %v892_v15 = vpop.f32.mrf.mxu2  ;;  %v1217_v32 = vpop.f32.mrf.mxu1 }
 0x1c3   :  { %v1097_v8 = vadd.f32 %v1096_v22, %v994_v1  ;;  %1561 = vmatmul.f32.gmra.mxu0 %v5537_v39  ;;  %v893_v20 = vadd.f32 %v4292_v40, %v892_v15 }
 0x1c5   :  { %v4410_v45 = vadd.f32 %v1211_v29, %v1097_v8  ;;  %1396 = vmatmul.f32.gmra.mxu3 %v5540_v50  ;;  %1666 = vmatmul.f32.gmra.mxu1 %v5540_v50 }
 0x1c7   :  { %1315 = vmatmul.f32.gmra.mxu2 %v5545_v62 }
 0x1c8   :  { %v997_v4 = vpop.f32.mrf.mxu3  ;;  %v1106_v10 = vpop.f32.mrf.mxu0 }
 0x1c9   :  { %v998_v3 = vadd.f32 %v997_v4, %v893_v20 }
 0x1ca   :  { %v900_v41 = vpop.f32.mrf.mxu2  ;;  %v1223_v57 = vpop.f32.mrf.mxu1 }
 0x1cb   :  { %v1102_v49 = vadd.f32 %v1101_v21, %v998_v3  ;;  %1569 = vmatmul.f32.gmra.mxu0 %v5542_v9  ;;  %v901_v22 = vadd.f32 %v4292_v40, %v900_v41  ;;  %v41_v40 = vld [vmem:[%s5316_s1 + $0x70] sm:$0xff] }
 0x1cd   :  { %v4417_v1 = vadd.f32 %v1217_v32, %v1102_v49  ;;  %1400 = vmatmul.f32.gmra.mxu3 %v5545_v62  ;;  %1670 = vmatmul.f32.gmra.mxu1 %v5545_v62  ;;  %v4431_v32 = vand.u32 4294901760, %v41_v40  ;;  %v5549_v49 = vld [vmem:[#allocation7_spill] sm:$0xff] }
 0x1cf   :  { %1700 = vmatmul.f32.vlgmr.msra.gmra.mxu2 %v3695_v36  ;;  %2463 = vmatpush.msrb.mxu1 %v4431_v32 }
 0x1d0   :  { %v1001_v15 = vpop.f32.mrf.mxu3  ;;  %v4422_v8 = vpop.f32.mrf.mxu0  ;;  %2108 = vmatpush.msrb.mxu2 %v4431_v32 }
 0x1d1   :  { %v1002_v29 = vadd.f32 %v1001_v15, %v901_v22  ;;  %v4439_v22 = vsub.f32 %v41_v40, %v4431_v32 }
 0x1d2   :  { %v1256_v20 = vpop.f32.mrf.mxu2  ;;  %v4424_v4 = vpop.f32.mrf.mxu1 }
 0x1d3   :  { %v1257_v21 = vadd.f32 %v1256_v20, %v4303_v35  ;;  %v1107_v3 = vadd.f32 %v1106_v10, %v1002_v29  ;;  %1925 = vmatmul.f32.vlgmr.msra.gmra.mxu0 %v3684_v30  ;;  %v5428_v15 = vand.u32 4294901760, %v4439_v22 }
 0x1d4   :  { %2360 = vmatpush.msrb.mxu0 %v4439_v22 }
 0x1d5   :  { %v4433_v41 = vadd.f32 %v1223_v57, %v1107_v3  ;;  %1802 = vmatmul.f32.vlgmr.msra.gmra.mxu3 %v5549_v49  ;;  %2010 = vmatmul.f32.vlgmr.msra.gmra.mxu1 %v3684_v30  ;;  %v2263_v3 = vsub.f32 %v4439_v22, %v5428_v15 }
 0x1d7   :  { %1705 = vmatmul.f32.gmra.mxu2 %v3731_v53  ;;  %v2264_v39 = vand.u32 4294901760, %v2263_v3 }
 0x1d8   :  { %v1341_v35 = vpop.f32.mrf.mxu3  ;;  %v4443_v10 = vpop.f32.mrf.mxu0 }
 0x1d9   :  { %v1342_v57 = vadd.f32 %v1341_v35, %v1257_v21  ;;  %2265 = vmatpush.msrb.mxu3 %v2264_v39 }
 0x1da   :  { %v1260_v29 = vpop.f32.mrf.mxu2  ;;  %v4447_v20 = vpop.f32.mrf.mxu1 }
 0x1db   :  { %5550 = vst [vmem:[#allocation34_spill] sm:$0xff] %v4447_v20  ;;  %v4453_v40 = vmul.f32 %v1342_v57, %v4151_v14  ;;  %v1261_v9 = vadd.f32 %v1260_v29, %v4310_v55  ;;  %1929 = vmatmul.f32.gmra.mxu0 %v3716_v46 }
 0x1dd   :  { %1808 = vmatmul.f32.gmra.mxu3 %v3739_v58  ;;  %2014 = vmatmul.f32.gmra.mxu1 %v3716_v46 }
 0x1df   :  { %1710 = vmatmul.f32.gmra.mxu2 %v3755_v0 }
 0x1e0   :  { %v1345_v21 = vpop.f32.mrf.mxu3  ;;  %v4460_v35 = vpop.f32.mrf.mxu0 }
 0x1e1   :  { %v1346_v53 = vadd.f32 %v1345_v21, %v1261_v9  ;;  %v5553_v21 = vld [vmem:[#allocation58_spill] sm:$0xff] }
 0x1e2   :  { %v1264_v15 = vpop.f32.mrf.mxu2  ;;  %v4462_v20 = vpop.f32.mrf.mxu1 }
 0x1e3   :  { %v4465_v14 = vmul.f32 %v1346_v53, %v4160_v38  ;;  %v1265_v55 = vadd.f32 %v1264_v15, %v4317_v13  ;;  %1933 = vmatmul.f32.gmra.mxu0 %v3733_v54  ;;  %v5555_v13 = vld [vmem:[#allocation24_spill] sm:$0xff]  ;;  %v5556_v15 = vld [vmem:[#allocation29_spill] sm:$0xff] }
 0x1e5   :  { %5551 = vst [vmem:[#allocation57_spill] sm:$0xff] %v4465_v14  ;;  %1814 = vmatmul.f32.gmra.mxu3 %v3776_v11  ;;  %2018 = vmatmul.f32.gmra.mxu1 %v3733_v54 }
 0x1e7   :  { %1715 = vmatmul.f32.gmra.mxu2 %v3800_v19 }
 0x1e8   :  { %v1349_v39 = vpop.f32.mrf.mxu3  ;;  %v4472_v57 = vpop.f32.mrf.mxu0 }
 0x1e9   :  { %v1350_v9 = vadd.f32 %v1349_v39, %v1265_v55 }
 0x1ea   :  { %v1268_v29 = vpop.f32.mrf.mxu2  ;;  %v4474_v3 = vpop.f32.mrf.mxu1 }
 0x1eb   :  { %5552 = vst [vmem:[#allocation38_spill] sm:$0xff] %v4474_v3  ;;  %v4477_v53 = vmul.f32 %v1350_v9, %v5553_v21  ;;  %v1269_v38 = vadd.f32 %v1268_v29, %v4324_v5  ;;  %1937 = vmatmul.f32.gmra.mxu0 %v3778_v12  ;;  %v5558_v3 = vld [vmem:[#allocation59_spill] sm:$0xff] }
 0x1ec   :  { %v40_v29 = vld [vmem:[%s5316_s1 + $0x68] sm:$0xff] }
 0x1ed   :  { %5554 = vst [vmem:[#allocation7_spill] sm:$0xff] %v4477_v53  ;;  %1820 = vmatmul.f32.gmra.mxu3 %v5555_v13  ;;  %2022 = vmatmul.f32.gmra.mxu1 %v3778_v12  ;;  %v4496_v21 = vand.u32 4294901760, %v40_v29  ;;  %v5566_v53 = vld [vmem:[#allocation40_spill] sm:$0xff] }
 0x1ef   :  { %1720 = vmatmul.f32.gmra.mxu2 %v5556_v15  ;;  %v5560_v15 = vld [vmem:[#allocation32_spill] sm:$0xff]  ;;  %2465 = vmatpush.msrb.mxu1 %v4496_v21 }
 0x1f0   :  { %v1353_v19 = vpop.f32.mrf.mxu3  ;;  %v4484_v14 = vpop.f32.mrf.mxu0  ;;  %2110 = vmatpush.msrb.mxu2 %v4496_v21 }
 0x1f1   :  { %v1354_v55 = vadd.f32 %v1353_v19, %v1269_v38  ;;  %v4502_v19 = vsub.f32 %v40_v29, %v4496_v21 }
 0x1f2   :  { %v1272_v39 = vpop.f32.mrf.mxu2  ;;  %v4486_v11 = vpop.f32.mrf.mxu1 }
 0x1f3   :  { %5557 = vst [vmem:[#allocation58_spill] sm:$0xff] %v4486_v11  ;;  %v4489_v9 = vmul.f32 %v1354_v55, %v5558_v3  ;;  %v1273_v5 = vadd.f32 %v1272_v39, %v4331_v28  ;;  %1941 = vmatmul.f32.gmra.mxu0 %v3823_v26  ;;  %v5561_v28 = vld [vmem:[#allocation37_spill] sm:$0xff]  ;;  %v5433_v55 = vand.u32 4294901760, %v4502_v19 }
 0x1f4   :  { %2363 = vmatpush.msrb.mxu0 %v4502_v19 }
 0x1f5   :  { %5559 = vst [vmem:[#allocation59_spill] sm:$0xff] %v4489_v9  ;;  %1826 = vmatmul.f32.gmra.mxu3 %v5560_v15  ;;  %2026 = vmatmul.f32.gmra.mxu1 %v3823_v26  ;;  %v2269_v29 = vsub.f32 %v4502_v19, %v5433_v55  ;;  %v5564_v26 = vld [vmem:[#allocation60_spill] sm:$0xff] }
 0x1f7   :  { %1725 = vmatmul.f32.gmra.mxu2 %v5561_v28 }
 0x1f8   :  { %v1357_v3 = vpop.f32.mrf.mxu3  ;;  %v4506_v38 = vpop.f32.mrf.mxu0 }
 0x1f9   :  { %5562 = vst [vmem:[#allocation65_spill] sm:$0xff] %v4506_v38  ;;  %v1358_v39 = vadd.f32 %v1357_v3, %v1273_v5  ;;  %v2270_v38 = vand.u32 4294901760, %v2269_v29  ;;  %v5567_v5 = vld [vmem:[#allocation45_spill] sm:$0xff] }
 0x1fa   :  { %v1276_v9 = vpop.f32.mrf.mxu2  ;;  %v4510_v15 = vpop.f32.mrf.mxu1 }
 0x1fb   :  { %5563 = vst [vmem:[#allocation66_spill] sm:$0xff] %v4510_v15  ;;  %v4516_v11 = vmul.f32 %v1358_v39, %v5564_v26  ;;  %v1277_v28 = vadd.f32 %v1276_v9, %v4338_v2  ;;  %1945 = vmatmul.f32.gmra.mxu0 %v5505_v34  ;;  %2271 = vmatpush.msrb.mxu3 %v2270_v38  ;;  %v5569_v26 = vld [vmem:[#allocation33_spill] sm:$0xff]  ;;  %v5571_v9 = vld [vmem:[#allocation48_spill] sm:$0xff] }
 0x1fc   :  { %v5572_v38 = vld [vmem:[#allocation52_spill] sm:$0xff] }
 0x1fd   :  { %5565 = vst [vmem:[#allocation60_spill] sm:$0xff] %v4516_v11  ;;  %1832 = vmatmul.f32.gmra.mxu3 %v5566_v53  ;;  %2030 = vmatmul.f32.gmra.mxu1 %v5505_v34 }
 0x1ff   :  { %1730 = vmatmul.f32.gmra.mxu2 %v5567_v5 }
 0x200   :  { %v1361_v3 = vpop.f32.mrf.mxu3  ;;  %v4523_v15 = vpop.f32.mrf.mxu0 }
 0x201   :  { %v1362_v13 = vadd.f32 %v1361_v3, %v1277_v28 }
 0x202   :  { %v1280_v55 = vpop.f32.mrf.mxu2  ;;  %v4525_v12 = vpop.f32.mrf.mxu1 }
 0x203   :  { %5568 = vst [vmem:[#allocation40_spill] sm:$0xff] %v4525_v12  ;;  %v4528_v39 = vmul.f32 %v1362_v13, %v5569_v26  ;;  %v1281_v2 = vadd.f32 %v1280_v55, %v4345_v37  ;;  %1949 = vmatmul.f32.gmra.mxu0 %v5510_v31  ;;  %v5574_v12 = vld [vmem:[#allocation41_spill] sm:$0xff]  ;;  %v5576_v55 = vld [vmem:[#allocation54_spill] sm:$0xff]  ;;  %v5577_v26 = vld [vmem:[#allocation3_spill] sm:$0xff] }
 0x205   :  { %5570 = vst [vmem:[#allocation33_spill] sm:$0xff] %v4528_v39  ;;  %1838 = vmatmul.f32.gmra.mxu3 %v5571_v9  ;;  %2034 = vmatmul.f32.gmra.mxu1 %v5510_v31 }
 0x207   :  { %1735 = vmatmul.f32.gmra.mxu2 %v5572_v38 }
 0x208   :  { %v1365_v29 = vpop.f32.mrf.mxu3  ;;  %v4535_v5 = vpop.f32.mrf.mxu0 }
 0x209   :  { %v1366_v28 = vadd.f32 %v1365_v29, %v1281_v2 }
 0x20a   :  { %v1284_v3 = vpop.f32.mrf.mxu2  ;;  %v4537_v11 = vpop.f32.mrf.mxu1 }
 0x20b   :  { %5573 = vst [vmem:[#allocation67_spill] sm:$0xff] %v4537_v11  ;;  %v4540_v13 = vmul.f32 %v1366_v28, %v5574_v12  ;;  %v1285_v37 = vadd.f32 %v1284_v3, %v4352_v17  ;;  %1953 = vmatmul.f32.gmra.mxu0 %v5515_v52  ;;  %v5579_v11 = vld [vmem:[#allocation49_spill] sm:$0xff]  ;;  %v39_v28 = vld [vmem:[%s5316_s1 + $0x60] sm:$0xff] }
 0x20c   :  { %v2111_v3 = vand.u32 4294901760, %v39_v28 }
 0x20d   :  { %5575 = vst [vmem:[#allocation41_spill] sm:$0xff] %v4540_v13  ;;  %1844 = vmatmul.f32.gmra.mxu3 %v5576_v55  ;;  %2038 = vmatmul.f32.gmra.mxu1 %v5515_v52 }
 0x20e   :  { %2112 = vmatpush.msrb.mxu2 %v2111_v3  ;;  %2467 = vmatpush.msrb.mxu1 %v2111_v3 }
 0x20f   :  { %1740 = vmatmul.f32.gmra.mxu2 %v5577_v26  ;;  %v5581_v26 = vld [vmem:[#allocation5_spill] sm:$0xff] }
 0x210   :  { %v1369_v38 = vpop.f32.mrf.mxu3  ;;  %v4547_v39 = vpop.f32.mrf.mxu0 }
 0x211   :  { %v1370_v2 = vadd.f32 %v1369_v38, %v1285_v37  ;;  %v2273_v38 = vsub.f32 %v39_v28, %v2111_v3  ;;  %v5582_v37 = vld [vmem:[#allocation4_spill] sm:$0xff]  ;;  %v5586_v28 = vld [vmem:[#allocation61_spill] sm:$0xff] }
 0x212   :  { %v1288_v29 = vpop.f32.mrf.mxu2  ;;  %v4549_v9 = vpop.f32.mrf.mxu1 }
 0x213   :  { %5578 = vst [vmem:[#allocation68_spill] sm:$0xff] %v4549_v9  ;;  %v4552_v12 = vmul.f32 %v1370_v2, %v5579_v11  ;;  %v1289_v17 = vadd.f32 %v1288_v29, %v4359_v7  ;;  %1957 = vmatmul.f32.gmra.mxu0 %v5520_v44  ;;  %v2274_v7 = vand.u32 4294901760, %v2273_v38  ;;  %v5584_v29 = vand.u32 4294901760, %v4392_v61 }
 0x214   :  { %2366 = vmatpush.msrb.mxu0 %v2273_v38  ;;  %v5587_v61 = vand.u32 4294901760, %v4502_v19  ;;  %v5590_v19 = vld [vmem:[#allocation62_spill] sm:$0xff] }
 0x215   :  { %5580 = vst [vmem:[#allocation49_spill] sm:$0xff] %v4552_v12  ;;  %1850 = vmatmul.f32.gmra.mxu3 %v5581_v26  ;;  %2042 = vmatmul.f32.gmra.mxu1 %v5520_v44  ;;  %v2275_v26 = vsub.f32 %v2273_v38, %v2274_v7  ;;  %v5585_v44 = vand.u32 4294901760, %v4439_v22 }
 0x216   :  { %2580 = vmatpush.msra.mxu2 %v5584_v29  ;;  %v5588_v29 = vld [vmem:[#allocation6_spill] sm:$0xff] }
 0x217   :  { %1745 = vmatmul.f32.gmra.mxu2 %v5582_v37 }
 0x218   :  { %v1373_v11 = vpop.f32.mrf.mxu3  ;;  %v4562_v2 = vpop.f32.mrf.mxu0  ;;  %2584 = vmatpush.msra.mxu2 %v5585_v44 }
 0x219   :  { %5583 = vst [vmem:[#allocation69_spill] sm:$0xff] %v4562_v2  ;;  %v1374_v12 = vadd.f32 %v1373_v11, %v1289_v17  ;;  %v2276_v2 = vand.u32 4294901760, %v2275_v26  ;;  %v5589_v17 = vld [vmem:[#allocation9_spill] sm:$0xff]  ;;  %v5591_v11 = vld [vmem:[#allocation12_spill] sm:$0xff] }
 0x21a   :  { %v1292_v9 = vpop.f32.mrf.mxu2  ;;  %v4566_v13 = vpop.f32.mrf.mxu1  ;;  %2588 = vmatpush.msra.mxu2 %v5587_v61  ;;  %v5593_v61 = vld [vmem:[#allocation63_spill] sm:$0xff] }
 0x21b   :  { %v4571_v55 = vmul.f32 %v1374_v12, %v5586_v28  ;;  %v1293_v37 = vadd.f32 %v1292_v9, %v4366_v23  ;;  %1961 = vmatmul.f32.gmra.mxu0 %v3661_v18  ;;  %2277 = vmatpush.msrb.mxu3 %v2276_v2 }
 0x21c   :  { %2592 = vmatpush.msra.mxu2 %v2274_v7 }
 0x21d   :  { %1856 = vmatmul.f32.gmra.mxu3 %v5588_v29  ;;  %2046 = vmatmul.f32.gmra.mxu1 %v3661_v18 }
 0x21e   :  { %2671 = vmatpush.msra.mxu3 %v4388_v59  ;;  %v5592_v59 = vld [vmem:[#allocation15_spill] sm:$0xff] }
 0x21f   :  { %1750 = vmatmul.f32.gmra.mxu2 %v5589_v17 }
 0x220   :  { %v1377_v44 = vpop.f32.mrf.mxu3  ;;  %v4581_v22 = vpop.f32.mrf.mxu0  ;;  %2673 = vmatpush.msra.mxu3 %v4431_v32 }
 0x221   :  { %v1378_v23 = vadd.f32 %v1377_v44, %v1293_v37 }
 0x222   :  { %v1296_v9 = vpop.f32.mrf.mxu2  ;;  %v4584_v26 = vpop.f32.mrf.mxu1  ;;  %2675 = vmatpush.msra.mxu3 %v4496_v21  ;;  %v5595_v21 = vld [vmem:[#allocation20_spill] sm:$0xff] }
 0x223   :  { %v4587_v12 = vmul.f32 %v1378_v23, %v5590_v19  ;;  %v1297_v38 = vadd.f32 %v1296_v9, %v4373_v43  ;;  %1965 = vmatmul.f32.gmra.mxu0 %v3689_v33 }
 0x224   :  { %2677 = vmatpush.msra.mxu3 %v2111_v3  ;;  %v5596_v3 = vld [vmem:[#allocation22_spill] sm:$0xff] }
 0x225   :  { %1862 = vmatmul.f32.gmra.mxu3 %v5591_v11  ;;  %2050 = vmatmul.f32.gmra.mxu1 %v3689_v33 }
 0x227   :  { %1755 = vmatmul.f32.gmra.mxu2 %v5592_v59  ;;  %v5597_v59 = vld [vmem:[#allocation64_spill] sm:$0xff] }
 0x228   :  { %v1381_v32 = vpop.f32.mrf.mxu3  ;;  %v4595_v37 = vpop.f32.mrf.mxu0 }
 0x229   :  { %v1382_v2 = vadd.f32 %v1381_v32, %v1297_v38 }
 0x22a   :  { %v1300_v7 = vpop.f32.mrf.mxu2  ;;  %v4597_v28 = vpop.f32.mrf.mxu1 }
 0x22b   :  { %v4600_v43 = vmul.f32 %v1382_v2, %v5593_v61  ;;  %v1301_v44 = vadd.f32 %v1300_v7, %v4384_v6  ;;  %1969 = vmatmul.f32.gmra.mxu0 %v3752_v63  ;;  %v5598_v7 = vld [vmem:[#allocation28_spill] sm:$0xff] }
 0x22d   :  { %5594 = vst [vmem:[#allocation61_spill] sm:$0xff] %v4600_v43  ;;  %1868 = vmatmul.f32.gmra.mxu3 %v5595_v21  ;;  %2054 = vmatmul.f32.gmra.mxu1 %v3752_v63 }
 0x22f   :  { %1760 = vmatmul.f32.gmra.mxu2 %v5596_v3 }
 0x230   :  { %v1385_v23 = vpop.f32.mrf.mxu3  ;;  %v4607_v9 = vpop.f32.mrf.mxu0 }
 0x231   :  { %v1386_v19 = vadd.f32 %v1385_v23, %v1301_v44 }
 0x232   :  { %v1304_v38 = vpop.f32.mrf.mxu2  ;;  %v4609_v32 = vpop.f32.mrf.mxu1 }
 0x233   :  { %v4612_v2 = vmul.f32 %v1386_v19, %v5597_v59  ;;  %v1305_v6 = vadd.f32 %v1304_v38, %v4403_v24  ;;  %1973 = vmatmul.f32.gmra.mxu0 %v5531_v60 }
 0x235   :  { %1874 = vmatmul.f32.gmra.mxu3 %v5598_v7  ;;  %2058 = vmatmul.f32.gmra.mxu1 %v5531_v60 }
 0x237   :  { %1765 = vmatmul.f32.gmra.mxu2 %v5534_v42 }
 0x238   :  { %v1389_v61 = vpop.f32.mrf.mxu3  ;;  %v4619_v3 = vpop.f32.mrf.mxu0 }
 0x239   :  { %v1390_v44 = vadd.f32 %v1389_v61, %v1305_v6 }
 0x23a   :  { %v1308_v23 = vpop.f32.mrf.mxu2  ;;  %v4621_v43 = vpop.f32.mrf.mxu1 }
 0x23b   :  { %v4624_v59 = vmul.f32 %v1390_v44, %v4268_v16  ;;  %v1309_v24 = vadd.f32 %v1308_v23, %v4410_v45  ;;  %1977 = vmatmul.f32.gmra.mxu0 %v5535_v47 }
 0x23d   :  { %1880 = vmatmul.f32.gmra.mxu3 %v5536_v51  ;;  %2062 = vmatmul.f32.gmra.mxu1 %v5535_v47 }
 0x23f   :  { %1770 = vmatmul.f32.gmra.mxu2 %v5539_v27 }
 0x240   :  { %v1393_v19 = vpop.f32.mrf.mxu3  ;;  %v4631_v38 = vpop.f32.mrf.mxu0 }
 0x241   :  { %v1394_v6 = vadd.f32 %v1393_v19, %v1309_v24  ;;  %v4648_v24 = vld [vmem:[%s5316_s1 + $0xc2] ss:$0 sm:$0xff] }
 0x242   :  { %v1312_v61 = vpop.f32.mrf.mxu2  ;;  %v4633_v42 = vpop.f32.mrf.mxu1 }
 0x243   :  { %v4636_v16 = vmul.f32 %v1394_v6, %v4277_v25  ;;  %v1313_v45 = vadd.f32 %v1312_v61, %v4417_v1  ;;  %1981 = vmatmul.f32.gmra.mxu0 %v5540_v50  ;;  %v5602_v1 = vld [vmem:[#allocation18_spill] sm:$0xff] }
 0x245   :  { %5599 = vst [vmem:[#allocation6_spill] sm:$0xff] %v4636_v16  ;;  %1886 = vmatmul.f32.gmra.mxu3 %v5541_v56  ;;  %2066 = vmatmul.f32.gmra.mxu1 %v5540_v50  ;;  %v5604_v56 = vld [vmem:[#allocation51_spill] sm:$0xff] }
 0x246   :  { %v5605_v50 = vld [vmem:[#allocation11_spill] sm:$0xff] }
 0x247   :  { %1775 = vmatmul.f32.gmra.mxu2 %v5543_v48  ;;  %v1451_v48 = vadd.f32 %v4648_v24, %v4422_v8  ;;  %v1459_v8 = vadd.f32 %v4648_v24, %v4443_v10 }
 0x248   :  { %v1397_v44 = vpop.f32.mrf.mxu3  ;;  %v4643_v23 = vpop.f32.mrf.mxu0 }
 0x249   :  { %5600 = vst [vmem:[#allocation9_spill] sm:$0xff] %v4643_v23  ;;  %v1398_v25 = vadd.f32 %v1397_v44, %v1313_v45 }
 0x24a   :  { %v1316_v19 = vpop.f32.mrf.mxu2  ;;  %v4650_v6 = vpop.f32.mrf.mxu1 }
 0x24b   :  { %5601 = vst [vmem:[#allocation62_spill] sm:$0xff] %v4650_v6  ;;  %v4653_v61 = vmul.f32 %v1398_v25, %v5602_v1  ;;  %v1317_v16 = vadd.f32 %v1316_v19, %v4433_v41  ;;  %1985 = vmatmul.f32.gmra.mxu0 %v5545_v62  ;;  %v1612_v6 = vadd.f32 %v4424_v4, %v1451_v48  ;;  %v5609_v4 = vld [vmem:[#allocation34_spill] sm:$0xff] }
 0x24d   :  { %5603 = vst [vmem:[#allocation12_spill] sm:$0xff] %v4653_v61  ;;  %1892 = vmatmul.f32.gmra.mxu3 %v5604_v56  ;;  %2070 = vmatmul.f32.gmra.mxu1 %v5545_v62  ;;  %v5606_v61 = vld [vmem:[#allocation26_spill] sm:$0xff] }
 0x24f   :  { %2118 = vmatmul.f32.vlgmr.msrb.gmra.mxu2 %v5605_v50  ;;  %v5608_v50 = vld [vmem:[#allocation14_spill] sm:$0xff] }
 0x250   :  { %v1401_v45 = vpop.f32.mrf.mxu3  ;;  %v1926_v44 = vpop.f32.mrf.mxu0 }
 0x251   :  { %v1402_v23 = vadd.f32 %v1401_v45, %v1317_v16  ;;  %v1616_v16 = vadd.f32 %v5609_v4, %v1459_v8 }
 0x252   :  { %v1701_v25 = vpop.f32.mrf.mxu2  ;;  %v2011_v1 = vpop.f32.mrf.mxu1 }
 0x253   :  { %v4664_v41 = vmul.f32 %v1402_v23, %v5606_v61  ;;  %2369 = vmatmul.f32.vlgmr.msrb.gmra.mxu0 %v3695_v36  ;;  %v1702_v19 = vadd.f32 %v1701_v25, %v1612_v6  ;;  %v1467_v36 = vadd.f32 %v4648_v24, %v4460_v35  ;;  %v5611_v25 = vld [vmem:[#allocation23_spill] sm:$0xff] }
 0x255   :  { %5607 = vst [vmem:[#allocation63_spill] sm:$0xff] %v4664_v41  ;;  %2279 = vmatmul.f32.vlgmr.msrb.gmra.mxu3 %v3684_v30  ;;  %2471 = vmatmul.f32.vlgmr.msrb.gmra.mxu1 %v5549_v49  ;;  %v5610_v41 = vld [vmem:[#allocation10_spill] sm:$0xff] }
 0x257   :  { %2126 = vmatmul.f32.gmra.mxu2 %v5608_v50 }
 0x258   :  { %v1803_v56 = vpop.f32.mrf.mxu3  ;;  %v1930_v48 = vpop.f32.mrf.mxu0 }
 0x259   :  { %v1804_v45 = vadd.f32 %v1803_v56, %v1702_v19 }
 0x25a   :  { %v1706_v62 = vpop.f32.mrf.mxu2  ;;  %v2015_v23 = vpop.f32.mrf.mxu1 }
 0x25b   :  { %v1927_v61 = vadd.f32 %v1926_v44, %v1804_v45  ;;  %2374 = vmatmul.f32.gmra.mxu0 %v5610_v41  ;;  %v1707_v10 = vadd.f32 %v1706_v62, %v1616_v16  ;;  %v1620_v44 = vadd.f32 %v4462_v20, %v1467_v36  ;;  %v1475_v62 = vadd.f32 %v4648_v24, %v4472_v57  ;;  %v5614_v45 = vld [vmem:[#allocation31_spill] sm:$0xff]  ;;  %v5615_v36 = vld [vmem:[#allocation38_spill] sm:$0xff]  ;;  %v5616_v57 = vld [vmem:[#allocation21_spill] sm:$0xff] }
 0x25d   :  { %v2012_v6 = vadd.f32 %v2011_v1, %v1927_v61  ;;  %2283 = vmatmul.f32.gmra.mxu3 %v3716_v46  ;;  %2477 = vmatmul.f32.gmra.mxu1 %v3739_v58  ;;  %v5613_v1 = vld [vmem:[#allocation57_spill] sm:$0xff] }
 0x25f   :  { %v4679_v49 = vmul.f32 %v2012_v6, %v4453_v40  ;;  %2134 = vmatmul.f32.gmra.mxu2 %v5611_v25  ;;  %v5612_v40 = vld [vmem:[#allocation16_spill] sm:$0xff] }
 0x260   :  { %v1809_v56 = vpop.f32.mrf.mxu3  ;;  %v1934_v8 = vpop.f32.mrf.mxu0 }
 0x261   :  { %v1810_v19 = vadd.f32 %v1809_v56, %v1707_v10 }
 0x262   :  { %v1711_v41 = vpop.f32.mrf.mxu2  ;;  %v2019_v50 = vpop.f32.mrf.mxu1 }
 0x263   :  { %v1931_v4 = vadd.f32 %v1930_v48, %v1810_v19  ;;  %2379 = vmatmul.f32.gmra.mxu0 %v3755_v0  ;;  %v1712_v35 = vadd.f32 %v1711_v41, %v1620_v44  ;;  %v1624_v48 = vadd.f32 %v5615_v36, %v1475_v62  ;;  %v5617_v19 = vld [vmem:[#allocation17_spill] sm:$0xff]  ;;  %v5618_v41 = vld [vmem:[#allocation24_spill] sm:$0xff] }
 0x265   :  { %v2016_v58 = vadd.f32 %v2015_v23, %v1931_v4  ;;  %2287 = vmatmul.f32.gmra.mxu3 %v3733_v54  ;;  %2483 = vmatmul.f32.gmra.mxu1 %v5612_v40  ;;  %v1483_v23 = vadd.f32 %v4648_v24, %v4484_v14  ;;  %v5619_v4 = vld [vmem:[#allocation7_spill] sm:$0xff]  ;;  %v5623_v14 = vld [vmem:[#allocation29_spill] sm:$0xff] }
 0x266   :  { %v5621_v40 = vld [vmem:[#allocation39_spill] sm:$0xff] }
 0x267   :  { %v4689_v16 = vmul.f32 %v2016_v58, %v5613_v1  ;;  %2142 = vmatmul.f32.gmra.mxu2 %v5614_v45  ;;  %v5622_v1 = vld [vmem:[#allocation58_spill] sm:$0xff] }
 0x268   :  { %v1815_v20 = vpop.f32.mrf.mxu3  ;;  %v1938_v61 = vpop.f32.mrf.mxu0 }
 0x269   :  { %v1816_v10 = vadd.f32 %v1815_v20, %v1712_v35 }
 0x26a   :  { %v1716_v0 = vpop.f32.mrf.mxu2  ;;  %v2023_v6 = vpop.f32.mrf.mxu1 }
 0x26b   :  { %v1935_v25 = vadd.f32 %v1934_v8, %v1816_v10  ;;  %2384 = vmatmul.f32.gmra.mxu0 %v5616_v57  ;;  %v1717_v56 = vadd.f32 %v1716_v0, %v1624_v48  ;;  %v1628_v8 = vadd.f32 %v5622_v1, %v1483_v23  ;;  %v5625_v57 = vld [vmem:[#allocation25_spill] sm:$0xff] }
 0x26d   :  { %v2020_v44 = vadd.f32 %v2019_v50, %v1935_v25  ;;  %2291 = vmatmul.f32.gmra.mxu3 %v5617_v19  ;;  %2489 = vmatmul.f32.gmra.mxu1 %v5618_v41  ;;  %v5624_v50 = vld [vmem:[#allocation65_spill] sm:$0xff]  ;;  %v5627_v41 = vld [vmem:[#allocation59_spill] sm:$0xff] }
 0x26e   :  { %v1491_v48 = vadd.f32 %v4648_v24, %v5624_v50  ;;  %v5630_v50 = vld [vmem:[#allocation37_spill] sm:$0xff] }
 0x26f   :  { %v4699_v58 = vmul.f32 %v2020_v44, %v5619_v4  ;;  %2150 = vmatmul.f32.gmra.mxu2 %v5621_v40  ;;  %v5626_v44 = vld [vmem:[#allocation32_spill] sm:$0xff]  ;;  %v5628_v40 = vld [vmem:[#allocation47_spill] sm:$0xff] }
 0x270   :  { %v1821_v62 = vpop.f32.mrf.mxu3  ;;  %v1942_v35 = vpop.f32.mrf.mxu0 }
 0x271   :  { %5620 = vst [vmem:[#allocation20_spill] sm:$0xff] %v4699_v58  ;;  %v1822_v45 = vadd.f32 %v1821_v62, %v1717_v56  ;;  %v5629_v62 = vld [vmem:[#allocation66_spill] sm:$0xff] }
 0x272   :  { %v1721_v20 = vpop.f32.mrf.mxu2  ;;  %v2027_v36 = vpop.f32.mrf.mxu1 }
 0x273   :  { %v1939_v10 = vadd.f32 %v1938_v61, %v1822_v45  ;;  %2389 = vmatmul.f32.gmra.mxu0 %v5623_v14  ;;  %v1722_v0 = vadd.f32 %v1721_v20, %v1628_v8  ;;  %v1632_v61 = vadd.f32 %v5629_v62, %v1491_v48 }
 0x275   :  { %v2024_v25 = vadd.f32 %v2023_v6, %v1939_v10  ;;  %2295 = vmatmul.f32.gmra.mxu3 %v5625_v57  ;;  %2495 = vmatmul.f32.gmra.mxu1 %v5626_v44  ;;  %v1499_v6 = vadd.f32 %v4648_v24, %v4523_v15  ;;  %v5631_v10 = vld [vmem:[#allocation60_spill] sm:$0xff]  ;;  %v5632_v44 = vld [vmem:[#allocation53_spill] sm:$0xff] }
 0x276   :  { %v5634_v15 = vld [vmem:[#allocation45_spill] sm:$0xff] }
 0x277   :  { %v4709_v4 = vmul.f32 %v2024_v25, %v5627_v41  ;;  %2158 = vmatmul.f32.gmra.mxu2 %v5628_v40  ;;  %v5633_v41 = vld [vmem:[#allocation40_spill] sm:$0xff] }
 0x278   :  { %v1827_v23 = vpop.f32.mrf.mxu3  ;;  %v1946_v56 = vpop.f32.mrf.mxu0 }
 0x279   :  { %v1828_v1 = vadd.f32 %v1827_v23, %v1722_v0 }
 0x27a   :  { %v1726_v45 = vpop.f32.mrf.mxu2  ;;  %v2031_v14 = vpop.f32.mrf.mxu1 }
 0x27b   :  { %v1943_v58 = vadd.f32 %v1942_v35, %v1828_v1  ;;  %2394 = vmatmul.f32.gmra.mxu0 %v5630_v50  ;;  %v1727_v8 = vadd.f32 %v1726_v45, %v1632_v61  ;;  %v1636_v35 = vadd.f32 %v5633_v41, %v1499_v6  ;;  %v5635_v61 = vld [vmem:[#allocation48_spill] sm:$0xff]  ;;  %v5636_v45 = vld [vmem:[#allocation33_spill] sm:$0xff] }
 0x27d   :  { %v2028_v20 = vadd.f32 %v2027_v36, %v1943_v58  ;;  %2299 = vmatmul.f32.gmra.mxu3 %v5505_v34  ;;  %2501 = vmatmul.f32.gmra.mxu1 %v5566_v53  ;;  %v1507_v58 = vadd.f32 %v4648_v24, %v4535_v5  ;;  %v5639_v5 = vld [vmem:[#allocation52_spill] sm:$0xff] }
 0x27f   :  { %v4719_v25 = vmul.f32 %v2028_v20, %v5631_v10  ;;  %2166 = vmatmul.f32.gmra.mxu2 %v5632_v44  ;;  %v5637_v20 = vld [vmem:[#allocation56_spill] sm:$0xff]  ;;  %v5638_v10 = vld [vmem:[#allocation67_spill] sm:$0xff] }
 0x280   :  { %v1833_v48 = vpop.f32.mrf.mxu3  ;;  %v1950_v0 = vpop.f32.mrf.mxu0 }
 0x281   :  { %v1834_v40 = vadd.f32 %v1833_v48, %v1727_v8 }
 0x282   :  { %v1731_v23 = vpop.f32.mrf.mxu2  ;;  %v2035_v62 = vpop.f32.mrf.mxu1 }
 0x283   :  { %v1947_v1 = vadd.f32 %v1946_v56, %v1834_v40  ;;  %2399 = vmatmul.f32.gmra.mxu0 %v5634_v15  ;;  %v1732_v36 = vadd.f32 %v1731_v23, %v1636_v35  ;;  %v1640_v56 = vadd.f32 %v5638_v10, %v1507_v58  ;;  %v5641_v15 = vld [vmem:[#allocation41_spill] sm:$0xff] }
 0x285   :  { %v2032_v53 = vadd.f32 %v2031_v14, %v1947_v1  ;;  %2303 = vmatmul.f32.gmra.mxu3 %v5510_v31  ;;  %2507 = vmatmul.f32.gmra.mxu1 %v5635_v61  ;;  %v1515_v14 = vadd.f32 %v4648_v24, %v4547_v39  ;;  %v5640_v1 = vld [vmem:[#allocation54_spill] sm:$0xff]  ;;  %v5642_v61 = vld [vmem:[#allocation8_spill] sm:$0xff]  ;;  %v5644_v39 = vld [vmem:[#allocation3_spill] sm:$0xff] }
 0x287   :  { %v4729_v50 = vmul.f32 %v2032_v53, %v5636_v45  ;;  %2174 = vmatmul.f32.gmra.mxu2 %v5637_v20  ;;  %v5643_v45 = vld [vmem:[#allocation68_spill] sm:$0xff] }
 0x288   :  { %v1839_v6 = vpop.f32.mrf.mxu3  ;;  %v1954_v8 = vpop.f32.mrf.mxu0 }
 0x289   :  { %v1840_v44 = vadd.f32 %v1839_v6, %v1732_v36 }
 0x28a   :  { %v1736_v48 = vpop.f32.mrf.mxu2  ;;  %v2039_v41 = vpop.f32.mrf.mxu1 }
 0x28b   :  { %v1951_v40 = vadd.f32 %v1950_v0, %v1840_v44  ;;  %2404 = vmatmul.f32.gmra.mxu0 %v5639_v5  ;;  %v1737_v35 = vadd.f32 %v1736_v48, %v1640_v56  ;;  %v1644_v0 = vadd.f32 %v5643_v45, %v1515_v14  ;;  %v5646_v5 = vld [vmem:[#allocation2_spill] sm:$0xff] }
 0x28d   :  { %v2036_v23 = vadd.f32 %v2035_v62, %v1951_v40  ;;  %2307 = vmatmul.f32.gmra.mxu3 %v5515_v52  ;;  %2513 = vmatmul.f32.gmra.mxu1 %v5640_v1  ;;  %v5645_v62 = vld [vmem:[#allocation69_spill] sm:$0xff] }
 0x28e   :  { %v1523_v56 = vadd.f32 %v4648_v24, %v5645_v62  ;;  %v5648_v1 = vld [vmem:[#allocation49_spill] sm:$0xff]  ;;  %v5650_v62 = vld [vmem:[#allocation4_spill] sm:$0xff] }
 0x28f   :  { %v4739_v53 = vmul.f32 %v2036_v23, %v5641_v15  ;;  %2182 = vmatmul.f32.gmra.mxu2 %v5642_v61  ;;  %v5647_v23 = vld [vmem:[#allocation5_spill] sm:$0xff] }
 0x290   :  { %v1845_v58 = vpop.f32.mrf.mxu3  ;;  %v1958_v36 = vpop.f32.mrf.mxu0  ;;  %v5649_v61 = vld [vmem:[#allocation13_spill] sm:$0xff] }
 0x291   :  { %v1846_v20 = vadd.f32 %v1845_v58, %v1737_v35 }
 0x292   :  { %v1741_v6 = vpop.f32.mrf.mxu2  ;;  %v2043_v10 = vpop.f32.mrf.mxu1 }
 0x293   :  { %v1955_v44 = vadd.f32 %v1954_v8, %v1846_v20  ;;  %2409 = vmatmul.f32.gmra.mxu0 %v5644_v39  ;;  %v1742_v48 = vadd.f32 %v1741_v6, %v1644_v0  ;;  %v1648_v8 = vadd.f32 %v4566_v13, %v1523_v56 }
 0x295   :  { %v2040_v40 = vadd.f32 %v2039_v41, %v1955_v44  ;;  %2311 = vmatmul.f32.gmra.mxu3 %v5646_v5  ;;  %2519 = vmatmul.f32.gmra.mxu1 %v5647_v23  ;;  %v1531_v41 = vadd.f32 %v4648_v24, %v4581_v22  ;;  %v1539_v22 = vadd.f32 %v4648_v24, %v4595_v37  ;;  %v5653_v37 = vld [vmem:[#allocation15_spill] sm:$0xff] }
 0x297   :  { %v4749_v15 = vmul.f32 %v2040_v40, %v5648_v1  ;;  %2190 = vmatmul.f32.gmra.mxu2 %v5649_v61  ;;  %v5651_v40 = vld [vmem:[#allocation19_spill] sm:$0xff] }
 0x298   :  { %v1851_v14 = vpop.f32.mrf.mxu3  ;;  %v1962_v35 = vpop.f32.mrf.mxu0 }
 0x299   :  { %v1852_v58 = vadd.f32 %v1851_v14, %v1742_v48  ;;  %v5652_v14 = vld [vmem:[#allocation27_spill] sm:$0xff] }
 0x29a   :  { %v1746_v45 = vpop.f32.mrf.mxu2  ;;  %v2047_v20 = vpop.f32.mrf.mxu1 }
 0x29b   :  { %v1959_v39 = vadd.f32 %v1958_v36, %v1852_v58  ;;  %2414 = vmatmul.f32.gmra.mxu0 %v5650_v62  ;;  %v1747_v0 = vadd.f32 %v1746_v45, %v1648_v8  ;;  %v1652_v36 = vadd.f32 %v4584_v26, %v1531_v41 }
 0x29d   :  { %v2044_v6 = vadd.f32 %v2043_v10, %v1959_v39  ;;  %2315 = vmatmul.f32.gmra.mxu3 %v3661_v18  ;;  %2525 = vmatmul.f32.gmra.mxu1 %v5588_v29 }
 0x29f   :  { %v4759_v44 = vmul.f32 %v2044_v6, %v4571_v55  ;;  %2198 = vmatmul.f32.gmra.mxu2 %v5651_v40 }
 0x2a0   :  { %v1857_v13 = vpop.f32.mrf.mxu3  ;;  %v1966_v56 = vpop.f32.mrf.mxu0 }
 0x2a1   :  { %v1858_v48 = vadd.f32 %v1857_v13, %v1747_v0  ;;  %v5655_v0 = vld [vmem:[#allocation36_spill] sm:$0xff] }
 0x2a2   :  { %v1751_v23 = vpop.f32.mrf.mxu2  ;;  %v2051_v1 = vpop.f32.mrf.mxu1 }
 0x2a3   :  { %v1963_v61 = vadd.f32 %v1962_v35, %v1858_v48  ;;  %2419 = vmatmul.f32.gmra.mxu0 %v5589_v17  ;;  %v1752_v10 = vadd.f32 %v1751_v23, %v1652_v36  ;;  %v1656_v35 = vadd.f32 %v4597_v28, %v1539_v22  ;;  %v5656_v48 = vld [vmem:[#allocation22_spill] sm:$0xff]  ;;  %v1555_v23 = vadd.f32 %v4648_v24, %v4619_v3 }
 0x2a5   :  { %v2048_v29 = vadd.f32 %v2047_v20, %v1963_v61  ;;  %2319 = vmatmul.f32.gmra.mxu3 %v3689_v33  ;;  %2531 = vmatmul.f32.gmra.mxu1 %v5591_v11  ;;  %v1547_v20 = vadd.f32 %v4648_v24, %v4607_v9 }
 0x2a7   :  { %v4769_v55 = vmul.f32 %v2048_v29, %v4587_v12  ;;  %2206 = vmatmul.f32.gmra.mxu2 %v5652_v14  ;;  %v5654_v12 = vld [vmem:[#allocation61_spill] sm:$0xff]  ;;  %v1660_v6 = vadd.f32 %v4609_v32, %v1547_v20  ;;  %v5657_v32 = vld [vmem:[#allocation44_spill] sm:$0xff] }
 0x2a8   :  { %v1863_v26 = vpop.f32.mrf.mxu3  ;;  %v1970_v8 = vpop.f32.mrf.mxu0 }
 0x2a9   :  { %v1864_v58 = vadd.f32 %v1863_v26, %v1752_v10  ;;  %v1664_v10 = vadd.f32 %v4621_v43, %v1555_v23  ;;  %v5659_v43 = vld [vmem:[#allocation50_spill] sm:$0xff] }
 0x2aa   :  { %v1756_v17 = vpop.f32.mrf.mxu2  ;;  %v2055_v45 = vpop.f32.mrf.mxu1 }
 0x2ab   :  { %v1967_v39 = vadd.f32 %v1966_v56, %v1864_v58  ;;  %2424 = vmatmul.f32.gmra.mxu0 %v5653_v37  ;;  %v1757_v62 = vadd.f32 %v1756_v17, %v1656_v35  ;;  %v1563_v35 = vadd.f32 %v4648_v24, %v4631_v38  ;;  %v5660_v38 = vld [vmem:[#allocation9_spill] sm:$0xff] }
 0x2ad   :  { %v2052_v11 = vadd.f32 %v2051_v1, %v1967_v39  ;;  %2323 = vmatmul.f32.gmra.mxu3 %v3752_v63  ;;  %2537 = vmatmul.f32.gmra.mxu1 %v5595_v21  ;;  %v1668_v39 = vadd.f32 %v4633_v42, %v1563_v35 }
 0x2af   :  { %v4779_v41 = vmul.f32 %v2052_v11, %v5654_v12  ;;  %2214 = vmatmul.f32.gmra.mxu2 %v5655_v0  ;;  %v1571_v11 = vadd.f32 %v4648_v24, %v5660_v38  ;;  %v2766_v24 = vld [vmem:[%s5316_s1 + $0xb8] sm:$0xf]  ;;  %v5670_v38 = vld [vmem:[#allocation63_spill] sm:$0xff] }
 0x2b0   :  { %v1869_v28 = vpop.f32.mrf.mxu3  ;;  %v1974_v56 = vpop.f32.mrf.mxu0  ;;  %v2820_v23 = vsel %vm2818_vm2, %v2766_v24, 0 }
 0x2b1   :  { %v1870_v40 = vadd.f32 %v1869_v28, %v1757_v62  ;;  %v5662_v28 = vld [vmem:[#allocation42_spill] sm:$0xff] }
 0x2b2   :  { %v1761_v13 = vpop.f32.mrf.mxu2  ;;  %v2059_v9 = vpop.f32.mrf.mxu1 }
 0x2b3   :  { %v1971_v36 = vadd.f32 %v1970_v8, %v1870_v40  ;;  %2429 = vmatmul.f32.gmra.mxu0 %v5656_v48  ;;  %v1762_v1 = vadd.f32 %v1761_v13, %v1660_v6  ;;  %v5658_v8 = vld [vmem:[#allocation30_spill] sm:$0xff]  ;;  %v5664_v13 = vld [vmem:[#allocation55_spill] sm:$0xff] }
 0x2b4   :  { %v5663_v6 = vld [vmem:[#allocation6_spill] sm:$0xff] }
 0x2b5   :  { %v2056_v21 = vadd.f32 %v2055_v45, %v1971_v36  ;;  %2327 = vmatmul.f32.gmra.mxu3 %v5531_v60  ;;  %2543 = vmatmul.f32.gmra.mxu1 %v5598_v7  ;;  %v5665_v36 = vld [vmem:[#allocation62_spill] sm:$0xff] }
 0x2b6   :  { %v1672_v48 = vadd.f32 %v5665_v36, %v1571_v11 }
 0x2b7   :  { %v4789_v61 = vmul.f32 %v2056_v21, %v4612_v2  ;;  %2222 = vmatmul.f32.gmra.mxu2 %v5657_v32  ;;  %v5666_v21 = vld [vmem:[#allocation46_spill] sm:$0xff]  ;;  %v4817_v32 = vand.u32 4294901760, %v2820_v23 }
 0x2b8   :  { %v1875_v22 = vpop.f32.mrf.mxu3  ;;  %v1978_v3 = vpop.f32.mrf.mxu0 }
 0x2b9   :  { %v1876_v29 = vadd.f32 %v1875_v22, %v1762_v1  ;;  %2831 = vmatpush.msra.mxu0 %v4817_v32  ;;  %3218 = vmatpush.msrb.mxu3 %v4817_v32 }
 0x2ba   :  { %v1766_v14 = vpop.f32.mrf.mxu2  ;;  %v2063_v2 = vpop.f32.mrf.mxu1 }
 0x2bb   :  { %v1975_v26 = vadd.f32 %v1974_v56, %v1876_v29  ;;  %2434 = vmatmul.f32.gmra.mxu0 %v5658_v8  ;;  %v1767_v58 = vadd.f32 %v1766_v14, %v1664_v10  ;;  %v5667_v29 = vld [vmem:[#allocation43_spill] sm:$0xff]  ;;  %v5669_v8 = vld [vmem:[#allocation12_spill] sm:$0xff] }
 0x2bc   :  { %v5668_v14 = vld [vmem:[#allocation51_spill] sm:$0xff] }
 0x2bd   :  { %v2060_v17 = vadd.f32 %v2059_v9, %v1975_v26  ;;  %2331 = vmatmul.f32.gmra.mxu3 %v5535_v47  ;;  %2549 = vmatmul.f32.gmra.mxu1 %v5536_v51  ;;  %v5661_v51 = vld [vmem:[#allocation35_spill] sm:$0xff]  ;;  %v4822_v26 = vsub.f32 %v2820_v23, %v4817_v32 }
 0x2bf   :  { %v4799_v7 = vmul.f32 %v2060_v17, %v4624_v59  ;;  %2230 = vmatmul.f32.gmra.mxu2 %v5659_v43  ;;  %v2985_v35 = vand.u32 4294901760, %v4822_v26 }
 0x2c0   :  { %v1881_v45 = vpop.f32.mrf.mxu3  ;;  %v1982_v59 = vpop.f32.mrf.mxu0  ;;  %3106 = vmatpush.msrb.mxu2 %v4822_v26 }
 0x2c1   :  { %v1882_v37 = vadd.f32 %v1881_v45, %v1767_v58  ;;  %v2986_v43 = vsub.f32 %v4822_v26, %v2985_v35 }
 0x2c2   :  { %v1771_v20 = vpop.f32.mrf.mxu2  ;;  %v2067_v56 = vpop.f32.mrf.mxu1 }
 0x2c3   :  { %v1979_v62 = vadd.f32 %v1978_v3, %v1882_v37  ;;  %2439 = vmatmul.f32.gmra.mxu0 %v5539_v27  ;;  %v1772_v12 = vadd.f32 %v1771_v20, %v1668_v39  ;;  %v2987_v20 = vand.u32 4294901760, %v2986_v43 }
 0x2c5   :  { %v2064_v0 = vadd.f32 %v2063_v2, %v1979_v62  ;;  %2335 = vmatmul.f32.gmra.mxu3 %v5661_v51  ;;  %2555 = vmatmul.f32.gmra.mxu1 %v5662_v28  ;;  %v2765_v28 = vld [vmem:[%s5316_s1 + $0xb0] sm:$0xff] }
 0x2c6   :  { %2988 = vmatpush.msra.mxu1 %v2987_v20 }
 0x2c7   :  { %v4809_v40 = vmul.f32 %v2064_v0, %v5663_v6  ;;  %2238 = vmatmul.f32.gmra.mxu2 %v5664_v13  ;;  %v4845_v6 = vand.u32 4294901760, %v2765_v28 }
 0x2c8   :  { %v1887_v42 = vpop.f32.mrf.mxu3  ;;  %v1986_v17 = vpop.f32.mrf.mxu0 }
 0x2c9   :  { %v1888_v27 = vadd.f32 %v1887_v42, %v1772_v12  ;;  %2833 = vmatpush.msra.mxu0 %v4845_v6  ;;  %3220 = vmatpush.msrb.mxu3 %v4845_v6 }
 0x2ca   :  { %v1776_v9 = vpop.f32.mrf.mxu2  ;;  %v2071_v39 = vpop.f32.mrf.mxu1 }
 0x2cb   :  { %v1983_v1 = vadd.f32 %v1982_v59, %v1888_v27  ;;  %2444 = vmatmul.f32.gmra.mxu0 %v5666_v21  ;;  %v1777_v22 = vadd.f32 %v1776_v9, %v1672_v48  ;;  %v2764_v9 = vld [vmem:[%s5316_s1 + $0xa8] sm:$0xff] }
 0x2cd   :  { %v2068_v10 = vadd.f32 %v2067_v56, %v1983_v1  ;;  %2339 = vmatmul.f32.gmra.mxu3 %v5667_v29  ;;  %2561 = vmatmul.f32.gmra.mxu1 %v5668_v14  ;;  %v4868_v1 = vand.u32 4294901760, %v2764_v9 }
 0x2cf   :  { %v4827_v3 = vmul.f32 %v2068_v10, %v5669_v8  ;;  %2594 = vmatmul.f32.vlgmr.msra.gmra.mxu2 %v3684_v30  ;;  %2835 = vmatpush.msra.mxu0 %v4868_v1  ;;  %v4872_v21 = vsub.f32 %v2764_v9, %v4868_v1 }
 0x2d0   :  { %v1893_v58 = vpop.f32.mrf.mxu3  ;;  %3222 = vmatpush.msrb.mxu3 %v4868_v1 }
 0x2d1   :  { %v1894_v2 = vadd.f32 %v1893_v58, %v1777_v22 }
 0x2d2   :  { %v2119_v45 = vpop.f32.mrf.mxu2 }
 0x2d3   :  { %v1987_v37 = vadd.f32 %v1986_v17, %v1894_v2  ;;  %v2763_v2 = vld [vmem:[%s5316_s1 + $0xa0] sm:$0xff] }
 0x2d5   :  { %v2072_v62 = vadd.f32 %v2071_v39, %v1987_v37  ;;  %2679 = vmatmul.f32.vlgmr.msra.gmra.mxu3 %v3684_v30  ;;  %v4849_v30 = vsub.f32 %v2765_v28, %v4845_v6 }
 0x2d7   :  { %v4837_v11 = vmul.f32 %v2072_v62, %v5670_v38  ;;  %2598 = vmatmul.f32.gmra.mxu2 %v3716_v46  ;;  %v2991_v13 = vand.u32 4294901760, %v4849_v30 }
 0x2d8   :  { %v2280_v12 = vpop.f32.mrf.mxu3  ;;  %3109 = vmatpush.msrb.mxu2 %v4849_v30 }
 0x2d9   :  { %v4840_v0 = vadd.f32 %v2280_v12, %v2119_v45  ;;  %v2992_v56 = vsub.f32 %v4849_v30, %v2991_v13  ;;  %v4891_v45 = vand.u32 4294901760, %v2763_v2 }
 0x2da   :  { %v2127_v59 = vpop.f32.mrf.mxu2  ;;  %3112 = vmatpush.msrb.mxu2 %v4872_v21 }
 0x2db   :  { %v2993_v27 = vand.u32 4294901760, %v2992_v56  ;;  %2837 = vmatpush.msra.mxu0 %v4891_v45  ;;  %v4895_v39 = vsub.f32 %v2763_v2, %v4891_v45  ;;  %3224 = vmatpush.msrb.mxu3 %v4891_v45 }
 0x2dd   :  { %2683 = vmatmul.f32.gmra.mxu3 %v3716_v46  ;;  %2994 = vmatpush.msra.mxu1 %v2993_v27 }
 0x2de   :  { %3115 = vmatpush.msrb.mxu2 %v4895_v39 }
 0x2df   :  { %2602 = vmatmul.f32.gmra.mxu2 %v3733_v54 }
 0x2e0   :  { %v2284_v42 = vpop.f32.mrf.mxu3 }
 0x2e1   :  { %v4859_v36 = vadd.f32 %v2284_v42, %v2127_v59  ;;  %v2762_v59 = vld [vmem:[%s5316_s1 + $0x98] sm:$0xff] }
 0x2e2   :  { %v2135_v48 = vpop.f32.mrf.mxu2  ;;  %v4914_v56 = vand.u32 4294901760, %v2762_v59 }
 0x2e4   :  { %2839 = vmatpush.msra.mxu0 %v4914_v56  ;;  %3226 = vmatpush.msrb.mxu3 %v4914_v56 }
 0x2e5   :  { %2687 = vmatmul.f32.gmra.mxu3 %v3733_v54  ;;  %v2997_v54 = vand.u32 4294901760, %v4872_v21 }
 0x2e7   :  { %2606 = vmatmul.f32.gmra.mxu2 %v5617_v19  ;;  %v2998_v10 = vsub.f32 %v4872_v21, %v2997_v54 }
 0x2e8   :  { %v2288_v46 = vpop.f32.mrf.mxu3 }
 0x2e9   :  { %v4863_v24 = vadd.f32 %v2288_v46, %v2135_v48  ;;  %v2999_v58 = vand.u32 4294901760, %v2998_v10  ;;  %v4918_v48 = vsub.f32 %v2762_v59, %v4914_v56  ;;  %v2761_v10 = vld [vmem:[%s5316_s1 + $0x90] sm:$0xff] }
 0x2ea   :  { %v2143_v23 = vpop.f32.mrf.mxu2 }
 0x2eb   :  { %3000 = vmatpush.msra.mxu1 %v2999_v58  ;;  %3118 = vmatpush.msrb.mxu2 %v4918_v48  ;;  %v4941_v58 = vand.u32 4294901760, %v2761_v10 }
 0x2ed   :  { %2691 = vmatmul.f32.gmra.mxu3 %v5617_v19  ;;  %2841 = vmatpush.msra.mxu0 %v4941_v58 }
 0x2ee   :  { %3228 = vmatpush.msrb.mxu3 %v4941_v58 }
 0x2ef   :  { %2610 = vmatmul.f32.gmra.mxu2 %v5625_v57 }
 0x2f0   :  { %v2292_v22 = vpop.f32.mrf.mxu3 }
 0x2f1   :  { %v4882_v14 = vadd.f32 %v2292_v22, %v2143_v23 }
 0x2f2   :  { %v2151_v8 = vpop.f32.mrf.mxu2 }
 0x2f5   :  { %2695 = vmatmul.f32.gmra.mxu3 %v5625_v57  ;;  %v3003_v57 = vand.u32 4294901760, %v4895_v39 }
 0x2f7   :  { %2614 = vmatmul.f32.gmra.mxu2 %v5505_v34  ;;  %v3004_v20 = vsub.f32 %v4895_v39, %v3003_v57 }
 0x2f8   :  { %v2296_v19 = vpop.f32.mrf.mxu3 }
 0x2f9   :  { %v4886_v17 = vadd.f32 %v2296_v19, %v2151_v8  ;;  %v3005_v12 = vand.u32 4294901760, %v3004_v20  ;;  %v3014_v19 = vsub.f32 %v2761_v10, %v4941_v58 }
 0x2fa   :  { %v2159_v43 = vpop.f32.mrf.mxu2 }
 0x2fb   :  { %3006 = vmatpush.msra.mxu1 %v3005_v12  ;;  %3121 = vmatpush.msrb.mxu2 %v3014_v19 }
 0x2fd   :  { %2699 = vmatmul.f32.gmra.mxu3 %v5505_v34 }
 0x2ff   :  { %2618 = vmatmul.f32.gmra.mxu2 %v5510_v31 }
 0x300   :  { %v2300_v37 = vpop.f32.mrf.mxu3 }
 0x301   :  { %v4905_v62 = vadd.f32 %v2300_v37, %v2159_v43 }
 0x302   :  { %v2167_v38 = vpop.f32.mrf.mxu2 }
 0x305   :  { %2703 = vmatmul.f32.gmra.mxu3 %v5510_v31  ;;  %v5442_v31 = vand.u32 4294901760, %v4918_v48 }
 0x307   :  { %2622 = vmatmul.f32.gmra.mxu2 %v5515_v52  ;;  %v3010_v46 = vsub.f32 %v4918_v48, %v5442_v31 }
 0x308   :  { %v2304_v34 = vpop.f32.mrf.mxu3 }
 0x309   :  { %v4909_v28 = vadd.f32 %v2304_v34, %v2167_v38  ;;  %v3011_v22 = vand.u32 4294901760, %v3010_v46 }
 0x30a   :  { %v2175_v42 = vpop.f32.mrf.mxu2 }
 0x30b   :  { %3012 = vmatpush.msra.mxu1 %v3011_v22 }
 0x30d   :  { %2707 = vmatmul.f32.gmra.mxu3 %v5515_v52 }
 0x30f   :  { %2626 = vmatmul.f32.gmra.mxu2 %v5646_v5 }
 0x310   :  { %v2308_v27 = vpop.f32.mrf.mxu3 }
 0x311   :  { %v4928_v9 = vadd.f32 %v2308_v27, %v2175_v42 }
 0x312   :  { %v4930_v23 = vpop.f32.mrf.mxu2 }
 0x315   :  { %2711 = vmatmul.f32.gmra.mxu3 %v5646_v5  ;;  %v3015_v5 = vand.u32 4294901760, %v3014_v19 }
 0x317   :  { %2630 = vmatmul.f32.gmra.mxu2 %v3661_v18  ;;  %v3016_v43 = vsub.f32 %v3014_v19, %v3015_v5  ;;  %v2472_v19 = vpop.f32.mrf.mxu1 }
 0x318   :  { %v4934_v52 = vpop.f32.mrf.mxu3 }
 0x319   :  { %v3017_v20 = vand.u32 4294901760, %v3016_v43  ;;  %v2759_v43 = vld [vmem:[%s5316_s1 + $0x80] sm:$0xff] }
 0x31a   :  { %v4939_v8 = vpop.f32.mrf.mxu2 }
 0x31b   :  { %3018 = vmatpush.msra.mxu1 %v3017_v20 }
 0x31d   :  { %2715 = vmatmul.f32.gmra.mxu3 %v3661_v18  ;;  %v2760_v18 = vld [vmem:[%s5316_s1 + $0x88] sm:$0xff] }
 0x31e   :  { %v2842_v34 = vand.u32 4294901760, %v2760_v18 }
 0x31f   :  { %2634 = vmatmul.f32.gmra.mxu2 %v3689_v33  ;;  %v2478_v31 = vpop.f32.mrf.mxu1 }
 0x320   :  { %v4948_v2 = vpop.f32.mrf.mxu3  ;;  %2843 = vmatpush.msra.mxu0 %v2842_v34  ;;  %v3020_v59 = vsub.f32 %v2760_v18, %v2842_v34  ;;  %3230 = vmatpush.msrb.mxu3 %v2842_v34 }
 0x322   :  { %v4950_v37 = vpop.f32.mrf.mxu2  ;;  %v3021_v42 = vand.u32 4294901760, %v3020_v59  ;;  %3124 = vmatpush.msrb.mxu2 %v3020_v59 }
 0x324   :  { %v3022_v46 = vsub.f32 %v3020_v59, %v3021_v42 }
 0x325   :  { %2719 = vmatmul.f32.gmra.mxu3 %v3689_v33  ;;  %v2370_v33 = vpop.f32.mrf.mxu0 }
 0x326   :  { %v3023_v10 = vand.u32 4294901760, %v3022_v46 }
 0x327   :  { %2638 = vmatmul.f32.gmra.mxu2 %v3752_v63 }
 0x328   :  { %v4954_v38 = vpop.f32.mrf.mxu3  ;;  %3024 = vmatpush.msra.mxu1 %v3023_v10 }
 0x32a   :  { %v4959_v12 = vpop.f32.mrf.mxu2 }
 0x32d   :  { %2723 = vmatmul.f32.gmra.mxu3 %v3752_v63  ;;  %v2844_v63 = vand.u32 4294901760, %v2759_v43  ;;  %v2375_v59 = vpop.f32.mrf.mxu0 }
 0x32f   :  { %2642 = vmatmul.f32.gmra.mxu2 %v5531_v60  ;;  %2845 = vmatpush.msra.mxu0 %v2844_v63  ;;  %v3026_v18 = vsub.f32 %v2759_v43, %v2844_v63 }
 0x330   :  { %v4963_v27 = vpop.f32.mrf.mxu3  ;;  %3232 = vmatpush.msrb.mxu3 %v2844_v63 }
 0x331   :  { %3341 = vmatpush.msrb.mxu0 %v2985_v35  ;;  %v3027_v10 = vand.u32 4294901760, %v3026_v18  ;;  %3127 = vmatpush.msrb.mxu2 %v3026_v18  ;;  %v5671_v35 = vand.u32 4294901760, %v4918_v48 }
 0x332   :  { %v4965_v22 = vpop.f32.mrf.mxu2 }
 0x333   :  { %3345 = vmatpush.msrb.mxu0 %v2991_v13  ;;  %v2484_v13 = vpop.f32.mrf.mxu1 }
 0x335   :  { %2727 = vmatmul.f32.gmra.mxu3 %v5531_v60  ;;  %v3028_v60 = vsub.f32 %v3026_v18, %v3027_v10  ;;  %3349 = vmatpush.msrb.mxu0 %v2997_v54 }
 0x337   :  { %2646 = vmatmul.f32.gmra.mxu2 %v5535_v47  ;;  %v3029_v43 = vand.u32 4294901760, %v3028_v60  ;;  %3353 = vmatpush.msrb.mxu0 %v3003_v57 }
 0x338   :  { %v4972_v20 = vpop.f32.mrf.mxu3 }
 0x339   :  { %3030 = vmatpush.msra.mxu1 %v3029_v43  ;;  %3357 = vmatpush.msrb.mxu0 %v5671_v35 }
 0x33a   :  { %v4976_v46 = vpop.f32.mrf.mxu2 }
 0x33b   :  { %3444 = vmatpush.msrb.mxu1 %v4817_v32  ;;  %3361 = vmatpush.msrb.mxu0 %v3015_v5  ;;  %v2490_v54 = vpop.f32.mrf.mxu1 }
 0x33d   :  { %2731 = vmatmul.f32.gmra.mxu3 %v5535_v47  ;;  %3446 = vmatpush.msrb.mxu1 %v4845_v6  ;;  %v2380_v47 = vpop.f32.mrf.mxu0 }
 0x33e   :  { %3365 = vmatpush.msrb.mxu0 %v3021_v42  ;;  %v2381_v60 = vadd.f32 %v2380_v47, %v4863_v24 }
 0x33f   :  { %2650 = vmatmul.f32.gmra.mxu2 %v5661_v51  ;;  %3448 = vmatpush.msrb.mxu1 %v4868_v1  ;;  %v2371_v1 = vadd.f32 %v2370_v33, %v4840_v0 }
 0x340   :  { %v4986_v26 = vpop.f32.mrf.mxu3  ;;  %3369 = vmatpush.msrb.mxu0 %v3027_v10 }
 0x341   :  { %3450 = vmatpush.msrb.mxu1 %v4891_v45  ;;  %v2473_v39 = vadd.f32 %v2472_v19, %v2371_v1  ;;  %v2485_v1 = vadd.f32 %v2484_v13, %v2381_v60  ;;  %v5672_v13 = vld [vmem:[#allocation20_spill] sm:$0xff] }
 0x342   :  { %v4991_v30 = vpop.f32.mrf.mxu2 }
 0x343   :  { %3452 = vmatpush.msrb.mxu1 %v4914_v56  ;;  %v2376_v56 = vadd.f32 %v2375_v59, %v4859_v36 }
 0x345   :  { %2735 = vmatmul.f32.gmra.mxu3 %v5661_v51  ;;  %3454 = vmatpush.msrb.mxu1 %v4941_v58  ;;  %v2385_v51 = vpop.f32.mrf.mxu0  ;;  %v2479_v18 = vadd.f32 %v2478_v31, %v2376_v56 }
 0x346   :  { %v2386_v47 = vadd.f32 %v2385_v51, %v4882_v14 }
 0x347   :  { %2654 = vmatmul.f32.gmra.mxu2 %v5667_v29  ;;  %3456 = vmatpush.msrb.mxu1 %v2842_v34  ;;  %v2496_v34 = vpop.f32.mrf.mxu1 }
 0x348   :  { %v4998_v32 = vpop.f32.mrf.mxu3 }
 0x349   :  { %3458 = vmatpush.msrb.mxu1 %v2844_v63 }
 0x34a   :  { %v5001_v21 = vpop.f32.mrf.mxu2 }
 0x34d   :  { %2739 = vmatmul.f32.gmra.mxu3 %v5667_v29  ;;  %v2390_v48 = vpop.f32.mrf.mxu0 }
 0x34e   :  { %v2391_v51 = vadd.f32 %v2390_v48, %v4886_v17 }
 0x350   :  { %v5005_v6 = vpop.f32.mrf.mxu3 }
 0x352   :  { %v2595_v45 = vpop.f32.mrf.mxu2 }
 0x353   :  { %v2596_v57 = vadd.f32 %v2595_v45, %v2473_v39  ;;  %v2502_v39 = vpop.f32.mrf.mxu1 }
 0x355   :  { %v2395_v59 = vpop.f32.mrf.mxu0 }
 0x356   :  { %v2396_v48 = vadd.f32 %v2395_v59, %v4905_v62 }
 0x358   :  { %v2680_v5 = vpop.f32.mrf.mxu3 }
 0x359   :  { %v2681_v42 = vadd.f32 %v2680_v5, %v2596_v57 }
 0x35a   :  { %v2599_v58 = vpop.f32.mrf.mxu2 }
 0x35b   :  { %v2743_v29 = vmul.f32 %v2681_v42, %v4679_v49  ;;  %v2600_v0 = vadd.f32 %v2599_v58, %v2479_v18 }
 0x35d   :  { %v2771_v63 = vsel %vm2769_vm3, %v2743_v29, 0 }
 0x35e   :  { %v5011_v10 = vand.u32 4294901760, %v2771_v63 }
 0x360   :  { %v2847_v33 = vsub.f32 %v2771_v63, %v5011_v10  ;;  %v2684_v19 = vpop.f32.mrf.mxu3  ;;  %3032 = vmatmul.f32.vlgmr.msra.gmra.mxu1 %v5011_v10  ;;  %v2400_v63 = vpop.f32.mrf.mxu0 }
 0x361   :  { %v2685_v36 = vadd.f32 %v2684_v19, %v2600_v0  ;;  %v2401_v59 = vadd.f32 %v2400_v63, %v4909_v28 }
 0x362   :  { %v2848_v43 = vand.u32 4294901760, %v2847_v33  ;;  %v2603_v35 = vpop.f32.mrf.mxu2  ;;  %3130 = vmatmul.f32.vlgmr.msrb.gmra.mxu2 %v2847_v33 }
 0x363   :  { %v2744_v49 = vmul.f32 %v2685_v36, %v4689_v16  ;;  %v2604_v56 = vadd.f32 %v2603_v35, %v2485_v1  ;;  %v2508_v35 = vpop.f32.mrf.mxu1 }
 0x364   :  { %v2849_v31 = vsub.f32 %v2847_v33, %v2848_v43  ;;  %3236 = vmatmul.f32.vlgmr.msrb.gmra.mxu3 %v2848_v43  ;;  %v2491_v33 = vadd.f32 %v2490_v54, %v2386_v47 }
 0x365   :  { %v2774_v45 = vsel %vm2769_vm3, %v2744_v49, 0 }
 0x366   :  { %v2850_v57 = vand.u32 4294901760, %v2849_v31  ;;  %v5018_v5 = vand.u32 4294901760, %v2774_v45 }
 0x368   :  { %v2688_v42 = vpop.f32.mrf.mxu3  ;;  %2851 = vmatmul.f32.vlgmr.msra.gmra.mxu0 %v2850_v57  ;;  %3036 = vmatmul.f32.gmra.mxu1 %v5018_v5  ;;  %v2855_v24 = vsub.f32 %v2774_v45, %v5018_v5 }
 0x369   :  { %v2689_v58 = vadd.f32 %v2688_v42, %v2604_v56  ;;  %v2497_v56 = vadd.f32 %v2496_v34, %v2391_v51 }
 0x36a   :  { %v2607_v16 = vpop.f32.mrf.mxu2  ;;  %3135 = vmatmul.f32.gmra.mxu2 %v2855_v24  ;;  %v2856_v29 = vand.u32 4294901760, %v2855_v24 }
 0x36b   :  { %v2745_v18 = vmul.f32 %v2689_v58, %v5672_v13  ;;  %v2608_v43 = vadd.f32 %v2607_v16, %v2491_v33 }
 0x36c   :  { %3242 = vmatmul.f32.gmra.mxu3 %v2856_v29  ;;  %v2857_v0 = vsub.f32 %v2855_v24, %v2856_v29  ;;  %v2405_v24 = vpop.f32.mrf.mxu0 }
 0x36d   :  { %v2777_v19 = vsel %vm2769_vm3, %v2745_v18, 0  ;;  %v2406_v63 = vadd.f32 %v2405_v24, %v4928_v9 }
 0x36e   :  { %v5025_v60 = vand.u32 4294901760, %v2777_v19  ;;  %v2858_v36 = vand.u32 4294901760, %v2857_v0 }
 0x370   :  { %v2692_v49 = vpop.f32.mrf.mxu3  ;;  %2859 = vmatmul.f32.gmra.mxu0 %v2858_v36  ;;  %3040 = vmatmul.f32.gmra.mxu1 %v5025_v60  ;;  %v2863_v14 = vsub.f32 %v2777_v19, %v5025_v60  ;;  %v2503_v19 = vadd.f32 %v2502_v39, %v2396_v48 }
 0x371   :  { %v2693_v31 = vadd.f32 %v2692_v49, %v2608_v43 }
 0x372   :  { %v2611_v1 = vpop.f32.mrf.mxu2  ;;  %3140 = vmatmul.f32.gmra.mxu2 %v2863_v14  ;;  %v2864_v45 = vand.u32 4294901760, %v2863_v14 }
 0x373   :  { %v2746_v54 = vmul.f32 %v2693_v31, %v4709_v4  ;;  %v2612_v16 = vadd.f32 %v2611_v1, %v2497_v56  ;;  %v2514_v4 = vpop.f32.mrf.mxu1  ;;  %v2509_v56 = vadd.f32 %v2508_v35, %v2401_v59 }
 0x374   :  { %3248 = vmatmul.f32.gmra.mxu3 %v2864_v45  ;;  %v2865_v57 = vsub.f32 %v2863_v14, %v2864_v45  ;;  %v2410_v51 = vpop.f32.mrf.mxu0 }
 0x375   :  { %v2780_v42 = vsel %vm2769_vm3, %v2746_v54, 0 }
 0x376   :  { %v5032_v47 = vand.u32 4294901760, %v2780_v42  ;;  %v2866_v58 = vand.u32 4294901760, %v2865_v57 }
 0x378   :  { %v2696_v29 = vpop.f32.mrf.mxu3  ;;  %2867 = vmatmul.f32.gmra.mxu0 %v2866_v58  ;;  %3044 = vmatmul.f32.gmra.mxu1 %v5032_v47  ;;  %v2871_v17 = vsub.f32 %v2780_v42, %v5032_v47 }
 0x379   :  { %v2697_v13 = vadd.f32 %v2696_v29, %v2612_v16 }
 0x37a   :  { %v2615_v18 = vpop.f32.mrf.mxu2  ;;  %3145 = vmatmul.f32.gmra.mxu2 %v2871_v17  ;;  %v2872_v34 = vand.u32 4294901760, %v2871_v17 }
 0x37b   :  { %v2747_v0 = vmul.f32 %v2697_v13, %v4719_v25  ;;  %v2616_v14 = vadd.f32 %v2615_v18, %v2503_v19  ;;  %v2520_v54 = vpop.f32.mrf.mxu1 }
 0x37c   :  { %3254 = vmatmul.f32.gmra.mxu3 %v2872_v34  ;;  %v2873_v33 = vsub.f32 %v2871_v17, %v2872_v34 }
 0x37d   :  { %v2783_v36 = vsel %vm2769_vm3, %v2747_v0, 0  ;;  %v2515_v0 = vadd.f32 %v2514_v4, %v2406_v63 }
 0x37e   :  { %v5039_v43 = vand.u32 4294901760, %v2783_v36  ;;  %v2874_v49 = vand.u32 4294901760, %v2873_v33  ;;  %v2313_v33 = vadd.f32 %v4934_v52, %v4930_v23 }
 0x380   :  { %v2700_v31 = vpop.f32.mrf.mxu3  ;;  %2875 = vmatmul.f32.gmra.mxu0 %v2874_v49  ;;  %3048 = vmatmul.f32.gmra.mxu1 %v5039_v43  ;;  %v2879_v62 = vsub.f32 %v2783_v36, %v5039_v43 }
 0x381   :  { %v2701_v1 = vadd.f32 %v2700_v31, %v2616_v14 }
 0x382   :  { %v2619_v25 = vpop.f32.mrf.mxu2  ;;  %3150 = vmatmul.f32.gmra.mxu2 %v2879_v62  ;;  %v2880_v45 = vand.u32 4294901760, %v2879_v62 }
 0x383   :  { %v2748_v39 = vmul.f32 %v2701_v1, %v4729_v50  ;;  %v2620_v29 = vadd.f32 %v2619_v25, %v2509_v56  ;;  %v2415_v50 = vpop.f32.mrf.mxu0  ;;  %v2526_v36 = vpop.f32.mrf.mxu1 }
 0x384   :  { %3260 = vmatmul.f32.gmra.mxu3 %v2880_v45  ;;  %v2881_v57 = vsub.f32 %v2879_v62, %v2880_v45  ;;  %v2317_v45 = vadd.f32 %v4948_v2, %v4939_v8 }
 0x385   :  { %v2786_v42 = vsel %vm2769_vm3, %v2748_v39, 0 }
 0x386   :  { %v5046_v58 = vand.u32 4294901760, %v2786_v42  ;;  %v2882_v16 = vand.u32 4294901760, %v2881_v57 }
 0x388   :  { %v2704_v17 = vpop.f32.mrf.mxu3  ;;  %2883 = vmatmul.f32.gmra.mxu0 %v2882_v16  ;;  %3052 = vmatmul.f32.gmra.mxu1 %v5046_v58  ;;  %v2887_v28 = vsub.f32 %v2786_v42, %v5046_v58 }
 0x389   :  { %v2705_v48 = vadd.f32 %v2704_v17, %v2620_v29  ;;  %v2416_v29 = vadd.f32 %v2415_v50, %v2317_v45 }
 0x38a   :  { %v2623_v13 = vpop.f32.mrf.mxu2  ;;  %3155 = vmatmul.f32.gmra.mxu2 %v2887_v28  ;;  %v2888_v18 = vand.u32 4294901760, %v2887_v28 }
 0x38b   :  { %v2749_v35 = vmul.f32 %v2705_v48, %v4739_v53  ;;  %v2624_v9 = vadd.f32 %v2623_v13, %v2515_v0  ;;  %v2411_v53 = vadd.f32 %v2410_v51, %v2313_v33  ;;  %v2420_v52 = vpop.f32.mrf.mxu0  ;;  %v2532_v51 = vpop.f32.mrf.mxu1  ;;  %v2527_v63 = vadd.f32 %v2526_v36, %v2416_v29 }
 0x38c   :  { %3266 = vmatmul.f32.gmra.mxu3 %v2888_v18  ;;  %v2889_v34 = vsub.f32 %v2887_v28, %v2888_v18  ;;  %v2321_v48 = vadd.f32 %v4954_v38, %v4950_v37 }
 0x38d   :  { %v2789_v19 = vsel %vm2769_vm3, %v2749_v35, 0  ;;  %v2521_v25 = vadd.f32 %v2520_v54, %v2411_v53 }
 0x38e   :  { %v5055_v49 = vand.u32 4294901760, %v2789_v19  ;;  %v2890_v14 = vand.u32 4294901760, %v2889_v34 }
 0x390   :  { %v2708_v24 = vpop.f32.mrf.mxu3  ;;  %2891 = vmatmul.f32.gmra.mxu0 %v2890_v14  ;;  %3056 = vmatmul.f32.gmra.mxu1 %v5055_v49  ;;  %v2895_v31 = vsub.f32 %v2789_v19, %v5055_v49 }
 0x391   :  { %v2709_v62 = vadd.f32 %v2708_v24, %v2624_v9 }
 0x392   :  { %v2627_v59 = vpop.f32.mrf.mxu2  ;;  %3160 = vmatmul.f32.gmra.mxu2 %v2895_v31  ;;  %v2896_v4 = vand.u32 4294901760, %v2895_v31 }
 0x393   :  { %v2750_v23 = vmul.f32 %v2709_v62, %v4749_v15  ;;  %v2628_v42 = vadd.f32 %v2627_v59, %v2521_v25  ;;  %v2425_v18 = vpop.f32.mrf.mxu0  ;;  %v2538_v14 = vpop.f32.mrf.mxu1 }
 0x394   :  { %3272 = vmatmul.f32.gmra.mxu3 %v2896_v4  ;;  %v2897_v1 = vsub.f32 %v2895_v31, %v2896_v4  ;;  %v2325_v31 = vadd.f32 %v4963_v27, %v4959_v12 }
 0x395   :  { %v2792_v39 = vsel %vm2769_vm3, %v2750_v23, 0 }
 0x396   :  { %v5063_v57 = vand.u32 4294901760, %v2792_v39  ;;  %v2898_v56 = vand.u32 4294901760, %v2897_v1 }
 0x398   :  { %v2712_v16 = vpop.f32.mrf.mxu3  ;;  %2899 = vmatmul.f32.gmra.mxu0 %v2898_v56  ;;  %3060 = vmatmul.f32.gmra.mxu1 %v5063_v57  ;;  %v2903_v15 = vsub.f32 %v2792_v39, %v5063_v57 }
 0x399   :  { %v2713_v17 = vadd.f32 %v2712_v16, %v2628_v42 }
 0x39a   :  { %v2631_v28 = vpop.f32.mrf.mxu2  ;;  %3165 = vmatmul.f32.gmra.mxu2 %v2903_v15  ;;  %v2904_v54 = vand.u32 4294901760, %v2903_v15 }
 0x39b   :  { %v2751_v8 = vmul.f32 %v2713_v17, %v4759_v44  ;;  %v2632_v0 = vadd.f32 %v2631_v28, %v2527_v63  ;;  %v2421_v44 = vadd.f32 %v2420_v52, %v2321_v48  ;;  %v2430_v23 = vpop.f32.mrf.mxu0  ;;  %v2544_v27 = vpop.f32.mrf.mxu1 }
 0x39c   :  { %3278 = vmatmul.f32.gmra.mxu3 %v2904_v54  ;;  %v2905_v2 = vsub.f32 %v2903_v15, %v2904_v54 }
 0x39d   :  { %v2795_v13 = vsel %vm2769_vm3, %v2751_v8, 0  ;;  %v2533_v24 = vadd.f32 %v2532_v51, %v2421_v44  ;;  %v2329_v51 = vadd.f32 %v4972_v20, %v4965_v22 }
 0x39e   :  { %v5071_v35 = vand.u32 4294901760, %v2795_v13  ;;  %v2906_v34 = vand.u32 4294901760, %v2905_v2 }
 0x3a0   :  { %v2716_v50 = vpop.f32.mrf.mxu3  ;;  %2907 = vmatmul.f32.gmra.mxu0 %v2906_v34  ;;  %3064 = vmatmul.f32.gmra.mxu1 %v5071_v35  ;;  %v2911_v33 = vsub.f32 %v2795_v13, %v5071_v35 }
 0x3a1   :  { %v2717_v19 = vadd.f32 %v2716_v50, %v2632_v0 }
 0x3a2   :  { %v2635_v36 = vpop.f32.mrf.mxu2  ;;  %3170 = vmatmul.f32.gmra.mxu2 %v2911_v33  ;;  %v2912_v9 = vand.u32 4294901760, %v2911_v33 }
 0x3a3   :  { %v2752_v37 = vmul.f32 %v2717_v19, %v4769_v55  ;;  %v2636_v4 = vadd.f32 %v2635_v36, %v2533_v24  ;;  %v2426_v55 = vadd.f32 %v2425_v18, %v2325_v31  ;;  %v2435_v2 = vpop.f32.mrf.mxu0  ;;  %v2333_v18 = vadd.f32 %v4986_v26, %v4976_v46  ;;  %v2550_v0 = vpop.f32.mrf.mxu1 }
 0x3a4   :  { %3284 = vmatmul.f32.gmra.mxu3 %v2912_v9  ;;  %v2913_v38 = vsub.f32 %v2911_v33, %v2912_v9  ;;  %v2337_v31 = vadd.f32 %v4998_v32, %v4991_v30 }
 0x3a5   :  { %v2798_v53 = vsel %vm2769_vm3, %v2752_v37, 0  ;;  %v2539_v42 = vadd.f32 %v2538_v14, %v2426_v55 }
 0x3a6   :  { %v5079_v62 = vand.u32 4294901760, %v2798_v53  ;;  %v2914_v59 = vand.u32 4294901760, %v2913_v38 }
 0x3a8   :  { %v2720_v52 = vpop.f32.mrf.mxu3  ;;  %2915 = vmatmul.f32.gmra.mxu0 %v2914_v59  ;;  %3068 = vmatmul.f32.gmra.mxu1 %v5079_v62  ;;  %v2919_v1 = vsub.f32 %v2798_v53, %v5079_v62 }
 0x3a9   :  { %v2721_v25 = vadd.f32 %v2720_v52, %v2636_v4 }
 0x3aa   :  { %v2639_v45 = vpop.f32.mrf.mxu2  ;;  %3175 = vmatmul.f32.gmra.mxu2 %v2919_v1  ;;  %v2920_v39 = vand.u32 4294901760, %v2919_v1 }
 0x3ab   :  { %v2753_v12 = vmul.f32 %v2721_v25, %v4779_v41  ;;  %v2640_v17 = vadd.f32 %v2639_v45, %v2539_v42  ;;  %v2431_v41 = vadd.f32 %v2430_v23, %v2329_v51  ;;  %v2440_v26 = vpop.f32.mrf.mxu0  ;;  %v2556_v52 = vpop.f32.mrf.mxu1 }
 0x3ac   :  { %3290 = vmatmul.f32.gmra.mxu3 %v2920_v39  ;;  %v2921_v56 = vsub.f32 %v2919_v1, %v2920_v39  ;;  %v2441_v55 = vadd.f32 %v2440_v26, %v2337_v31 }
 0x3ad   :  { %v2801_v16 = vsel %vm2769_vm3, %v2753_v12, 0  ;;  %v2545_v13 = vadd.f32 %v2544_v27, %v2431_v41  ;;  %v2341_v27 = vadd.f32 %v5005_v6, %v5001_v21 }
 0x3ae   :  { %v5087_v15 = vand.u32 4294901760, %v2801_v16  ;;  %v2922_v29 = vand.u32 4294901760, %v2921_v56  ;;  %v2557_v12 = vadd.f32 %v2556_v52, %v2441_v55 }
 0x3b0   :  { %v2724_v28 = vpop.f32.mrf.mxu3  ;;  %2923 = vmatmul.f32.gmra.mxu0 %v2922_v29  ;;  %3072 = vmatmul.f32.gmra.mxu1 %v5087_v15  ;;  %v2927_v54 = vsub.f32 %v2801_v16, %v5087_v15 }
 0x3b1   :  { %v2725_v8 = vadd.f32 %v2724_v28, %v2640_v17 }
 0x3b2   :  { %v2643_v63 = vpop.f32.mrf.mxu2  ;;  %3180 = vmatmul.f32.gmra.mxu2 %v2927_v54  ;;  %v2928_v48 = vand.u32 4294901760, %v2927_v54 }
 0x3b3   :  { %v2754_v22 = vmul.f32 %v2725_v8, %v4789_v61  ;;  %v2644_v44 = vadd.f32 %v2643_v63, %v2545_v13  ;;  %v2436_v61 = vadd.f32 %v2435_v2, %v2333_v18  ;;  %v2445_v42 = vpop.f32.mrf.mxu0  ;;  %v2562_v41 = vpop.f32.mrf.mxu1 }
 0x3b4   :  { %3296 = vmatmul.f32.gmra.mxu3 %v2928_v48  ;;  %v2929_v20 = vsub.f32 %v2927_v54, %v2928_v48 }
 0x3b5   :  { %v2804_v34 = vsel %vm2769_vm3, %v2754_v22, 0  ;;  %v2551_v24 = vadd.f32 %v2550_v0, %v2436_v61 }
 0x3b6   :  { %v5095_v50 = vand.u32 4294901760, %v2804_v34  ;;  %v2930_v33 = vand.u32 4294901760, %v2929_v20 }
 0x3b8   :  { %v2728_v19 = vpop.f32.mrf.mxu3  ;;  %2931 = vmatmul.f32.gmra.mxu0 %v2930_v33  ;;  %3076 = vmatmul.f32.gmra.mxu1 %v5095_v50  ;;  %v2935_v14 = vsub.f32 %v2804_v34, %v5095_v50 }
 0x3b9   :  { %v2729_v36 = vadd.f32 %v2728_v19, %v2644_v44 }
 0x3ba   :  { %v2647_v9 = vpop.f32.mrf.mxu2  ;;  %3185 = vmatmul.f32.gmra.mxu2 %v2935_v14  ;;  %v2936_v37 = vand.u32 4294901760, %v2935_v14 }
 0x3bb   :  { %v2755_v46 = vmul.f32 %v2729_v36, %v4799_v7  ;;  %v2648_v23 = vadd.f32 %v2647_v9, %v2551_v24 }
 0x3bc   :  { %3302 = vmatmul.f32.gmra.mxu3 %v2936_v37  ;;  %v2937_v38 = vsub.f32 %v2935_v14, %v2936_v37 }
 0x3bd   :  { %v2807_v53 = vsel %vm2769_vm3, %v2755_v46, 0 }
 0x3be   :  { %v5103_v59 = vand.u32 4294901760, %v2807_v53  ;;  %v2938_v4 = vand.u32 4294901760, %v2937_v38 }
 0x3c0   :  { %v2732_v1 = vpop.f32.mrf.mxu3  ;;  %2939 = vmatmul.f32.gmra.mxu0 %v2938_v4  ;;  %3080 = vmatmul.f32.gmra.mxu1 %v5103_v59  ;;  %v2943_v7 = vsub.f32 %v2807_v53, %v5103_v59 }
 0x3c1   :  { %v2733_v25 = vadd.f32 %v2732_v1, %v2648_v23 }
 0x3c2   :  { %v2651_v45 = vpop.f32.mrf.mxu2  ;;  %3190 = vmatmul.f32.gmra.mxu2 %v2943_v7  ;;  %v2944_v39 = vand.u32 4294901760, %v2943_v7 }
 0x3c3   :  { %v2756_v30 = vmul.f32 %v2733_v25, %v4809_v40  ;;  %v2652_v29 = vadd.f32 %v2651_v45, %v2557_v12  ;;  %v2446_v40 = vadd.f32 %v2445_v42, %v2341_v27 }
 0x3c4   :  { %3308 = vmatmul.f32.gmra.mxu3 %v2944_v39  ;;  %v2945_v32 = vsub.f32 %v2943_v7, %v2944_v39 }
 0x3c5   :  { %v2810_v56 = vsel %vm2769_vm3, %v2756_v30, 0  ;;  %v2563_v63 = vadd.f32 %v2562_v41, %v2446_v40 }
 0x3c6   :  { %v5111_v51 = vand.u32 4294901760, %v2810_v56  ;;  %v2946_v16 = vand.u32 4294901760, %v2945_v32 }
 0x3c8   :  { %v2736_v17 = vpop.f32.mrf.mxu3  ;;  %2947 = vmatmul.f32.gmra.mxu0 %v2946_v16  ;;  %3084 = vmatmul.f32.gmra.mxu1 %v5111_v51  ;;  %v2951_v28 = vsub.f32 %v2810_v56, %v5111_v51 }
 0x3c9   :  { %v2737_v54 = vadd.f32 %v2736_v17, %v2652_v29 }
 0x3ca   :  { %3195 = vmatmul.f32.gmra.mxu2 %v2951_v28  ;;  %v2952_v8 = vand.u32 4294901760, %v2951_v28  ;;  %v2655_v6 = vpop.f32.mrf.mxu2 }
 0x3cb   :  { %v2757_v21 = vmul.f32 %v2737_v54, %v4827_v3  ;;  %v2656_v13 = vadd.f32 %v2655_v6, %v2563_v63 }
 0x3cc   :  { %3314 = vmatmul.f32.gmra.mxu3 %v2952_v8  ;;  %v2953_v2 = vsub.f32 %v2951_v28, %v2952_v8 }
 0x3cd   :  { %v2813_v48 = vsel %vm2769_vm3, %v2757_v21, 0 }
 0x3ce   :  { %v5117_v22 = vand.u32 4294901760, %v2813_v48  ;;  %v2954_v20 = vand.u32 4294901760, %v2953_v2 }
 0x3d0   :  { %v2740_v18 = vpop.f32.mrf.mxu3  ;;  %2955 = vmatmul.f32.gmra.mxu0 %v2954_v20  ;;  %3088 = vmatmul.f32.gmra.mxu1 %v5117_v22  ;;  %v2959_v34 = vsub.f32 %v2813_v48, %v5117_v22 }
 0x3d1   :  { %v2741_v0 = vadd.f32 %v2740_v18, %v2656_v13 }
 0x3d2   :  { %3200 = vmatmul.f32.gmra.mxu2 %v2959_v34  ;;  %v2960_v33 = vand.u32 4294901760, %v2959_v34 }
 0x3d3   :  { %v2758_v3 = vmul.f32 %v2741_v0, %v4837_v11 }
 0x3d4   :  { %3320 = vmatmul.f32.gmra.mxu3 %v2960_v33  ;;  %v2961_v44 = vsub.f32 %v2959_v34, %v2960_v33 }
 0x3d5   :  { %v2816_v19 = vsel %vm2769_vm3, %v2758_v3, 0 }
 0x3d6   :  { %v5123_v14 = vand.u32 4294901760, %v2816_v19  ;;  %v2962_v61 = vand.u32 4294901760, %v2961_v44 }
 0x3d8   :  { %2963 = vmatmul.f32.gmra.mxu0 %v2962_v61  ;;  %3092 = vmatmul.f32.gmra.mxu1 %v5123_v14  ;;  %v2967_v36 = vsub.f32 %v2816_v19, %v5123_v14 }
 0x3da   :  { %3205 = vmatmul.f32.gmra.mxu2 %v2967_v36  ;;  %v2968_v9 = vand.u32 4294901760, %v2967_v36 }
 0x3dc   :  { %3326 = vmatmul.f32.gmra.mxu3 %v2968_v9  ;;  %v2969_v37 = vsub.f32 %v2967_v36, %v2968_v9 }
 0x3dd   :  { %v5127_v46 = vpop.f32.mrf.mxu1 }
 0x3de   :  { %v2970_v26 = vand.u32 4294901760, %v2969_v37 }
 0x3e0   :  { %2971 = vmatmul.f32.gmra.mxu0 %v2970_v26  ;;  %3460 = vmatmul.f32.vlgmr.msrb.gmra.mxu1 %v5011_v10 }
 0x3e5   :  { %v5130_v11 = vpop.f32.mrf.mxu0  ;;  %v5132_v38 = vpop.f32.mrf.mxu1 }
 0x3e6   :  { %v3131_v28 = vpop.f32.mrf.mxu2 }
 0x3e8   :  { %3371 = vmatmul.f32.vlgmr.msrb.gmra.mxu0 %v5011_v10  ;;  %3464 = vmatmul.f32.gmra.mxu1 %v5018_v5 }
 0x3ed   :  { %v5136_v24 = vpop.f32.mrf.mxu0  ;;  %v5138_v31 = vpop.f32.mrf.mxu1 }
 0x3f0   :  { %3375 = vmatmul.f32.gmra.mxu0 %v5018_v5  ;;  %3468 = vmatmul.f32.gmra.mxu1 %v5025_v60 }
 0x3f5   :  { %v5142_v53 = vpop.f32.mrf.mxu0  ;;  %v5144_v4 = vpop.f32.mrf.mxu1 }
 0x3f8   :  { %3379 = vmatmul.f32.gmra.mxu0 %v5025_v60  ;;  %3472 = vmatmul.f32.gmra.mxu1 %v5032_v47 }
 0x3fd   :  { %v5148_v23 = vpop.f32.mrf.mxu0  ;;  %v5150_v10 = vpop.f32.mrf.mxu1 }
 0x400   :  { %3383 = vmatmul.f32.gmra.mxu0 %v5032_v47  ;;  %3476 = vmatmul.f32.gmra.mxu1 %v5039_v43 }
 0x405   :  { %v5154_v52 = vpop.f32.mrf.mxu0  ;;  %v5156_v5 = vpop.f32.mrf.mxu1 }
 0x408   :  { %3387 = vmatmul.f32.gmra.mxu0 %v5039_v43  ;;  %3480 = vmatmul.f32.gmra.mxu1 %v5046_v58 }
 0x40d   :  { %v5160_v1 = vpop.f32.mrf.mxu0  ;;  %v5162_v60 = vpop.f32.mrf.mxu1 }
 0x410   :  { %3391 = vmatmul.f32.gmra.mxu0 %v5046_v58  ;;  %3484 = vmatmul.f32.gmra.mxu1 %v5055_v49  ;;  %v5179_v58 = vld [vmem:[%s5316_s1 + $0xc3] ss:$0 sm:$0xff] }
 0x411   :  { %v2861_v9 = vadd.f32 %v5179_v58, %v5136_v24 }
 0x415   :  { %v5166_v7 = vpop.f32.mrf.mxu0  ;;  %v5168_v47 = vpop.f32.mrf.mxu1 }
 0x418   :  { %3395 = vmatmul.f32.gmra.mxu0 %v5055_v49  ;;  %3488 = vmatmul.f32.gmra.mxu1 %v5063_v57 }
 0x41d   :  { %v5172_v55 = vpop.f32.mrf.mxu0  ;;  %v3065_v43 = vpop.f32.mrf.mxu1 }
 0x420   :  { %3399 = vmatmul.f32.gmra.mxu0 %v5063_v57  ;;  %3492 = vmatmul.f32.gmra.mxu1 %v5071_v35 }
 0x425   :  { %v2916_v25 = vpop.f32.mrf.mxu0  ;;  %v3069_v45 = vpop.f32.mrf.mxu1 }
 0x426   :  { %v2917_v39 = vadd.f32 %v5179_v58, %v2916_v25 }
 0x428   :  { %v5182_v30 = vadd.f32 %v3065_v43, %v2917_v39  ;;  %3403 = vmatmul.f32.gmra.mxu0 %v5071_v35  ;;  %3496 = vmatmul.f32.gmra.mxu1 %v5079_v62  ;;  %v2869_v39 = vadd.f32 %v5179_v58, %v5142_v53 }
 0x42a   :  { %v3042_v24 = vadd.f32 %v5138_v31, %v2869_v39 }
 0x42d   :  { %v2924_v49 = vpop.f32.mrf.mxu0  ;;  %v3073_v32 = vpop.f32.mrf.mxu1 }
 0x42e   :  { %v2925_v57 = vadd.f32 %v5179_v58, %v2924_v49 }
 0x430   :  { %v5187_v12 = vadd.f32 %v3069_v45, %v2925_v57  ;;  %3407 = vmatmul.f32.gmra.mxu0 %v5079_v62  ;;  %3500 = vmatmul.f32.gmra.mxu1 %v5087_v15  ;;  %v3237_v62 = vpop.f32.mrf.mxu3 }
 0x435   :  { %v2932_v27 = vpop.f32.mrf.mxu0  ;;  %v3077_v56 = vpop.f32.mrf.mxu1 }
 0x436   :  { %v2933_v42 = vadd.f32 %v5179_v58, %v2932_v27 }
 0x438   :  { %v5192_v16 = vadd.f32 %v3073_v32, %v2933_v42  ;;  %3411 = vmatmul.f32.gmra.mxu0 %v5087_v15  ;;  %3504 = vmatmul.f32.gmra.mxu1 %v5095_v50  ;;  %v3136_v15 = vpop.f32.mrf.mxu2  ;;  %v3243_v63 = vpop.f32.mrf.mxu3 }
 0x43d   :  { %v2940_v35 = vpop.f32.mrf.mxu0  ;;  %v3081_v29 = vpop.f32.mrf.mxu1 }
 0x43e   :  { %v2941_v17 = vadd.f32 %v5179_v58, %v2940_v35 }
 0x440   :  { %v5197_v40 = vadd.f32 %v3077_v56, %v2941_v17  ;;  %3415 = vmatmul.f32.gmra.mxu0 %v5095_v50  ;;  %3508 = vmatmul.f32.gmra.mxu1 %v5103_v59  ;;  %v3141_v20 = vpop.f32.mrf.mxu2  ;;  %v3249_v0 = vpop.f32.mrf.mxu3 }
 0x445   :  { %v2948_v54 = vpop.f32.mrf.mxu0  ;;  %v3085_v41 = vpop.f32.mrf.mxu1 }
 0x446   :  { %v2949_v8 = vadd.f32 %v5179_v58, %v2948_v54 }
 0x448   :  { %v5202_v21 = vadd.f32 %v3081_v29, %v2949_v8  ;;  %3419 = vmatmul.f32.gmra.mxu0 %v5103_v59  ;;  %3512 = vmatmul.f32.gmra.mxu1 %v5111_v51  ;;  %v2853_v59 = vadd.f32 %v5179_v58, %v5130_v11  ;;  %v3146_v19 = vpop.f32.mrf.mxu2  ;;  %v3255_v26 = vpop.f32.mrf.mxu3  ;;  %v2877_v29 = vadd.f32 %v5179_v58, %v5148_v23 }
 0x449   :  { %v2885_v23 = vadd.f32 %v5179_v58, %v5154_v52 }
 0x44a   :  { %v3034_v3 = vadd.f32 %v5127_v46, %v2853_v59  ;;  %v3046_v31 = vadd.f32 %v5144_v4, %v2877_v29 }
 0x44c   :  { %v3132_v36 = vadd.f32 %v3131_v28, %v3034_v3 }
 0x44d   :  { %v2956_v6 = vpop.f32.mrf.mxu0  ;;  %v3089_v2 = vpop.f32.mrf.mxu1 }
 0x44e   :  { %v2957_v48 = vadd.f32 %v5179_v58, %v2956_v6  ;;  %v3238_v11 = vadd.f32 %v3237_v62, %v3132_v36  ;;  %v3147_v6 = vadd.f32 %v3146_v19, %v3046_v31 }
 0x450   :  { %v5207_v50 = vadd.f32 %v3085_v41, %v2957_v48  ;;  %3423 = vmatmul.f32.gmra.mxu0 %v5111_v51  ;;  %3516 = vmatmul.f32.gmra.mxu1 %v5117_v22  ;;  %v3151_v49 = vpop.f32.mrf.mxu2  ;;  %v3261_v27 = vpop.f32.mrf.mxu3  ;;  %v3050_v48 = vadd.f32 %v5150_v10, %v2885_v23 }
 0x452   :  { %v3152_v59 = vadd.f32 %v3151_v49, %v3050_v48 }
 0x455   :  { %v2964_v13 = vpop.f32.mrf.mxu0  ;;  %v3093_v18 = vpop.f32.mrf.mxu1 }
 0x456   :  { %v2965_v34 = vadd.f32 %v5179_v58, %v2964_v13 }
 0x458   :  { %v5214_v33 = vadd.f32 %v3089_v2, %v2965_v34  ;;  %3427 = vmatmul.f32.gmra.mxu0 %v5117_v22  ;;  %3520 = vmatmul.f32.gmra.mxu1 %v5123_v14  ;;  %v3038_v22 = vadd.f32 %v5132_v38, %v2861_v9  ;;  %v3142_v38 = vadd.f32 %v3141_v20, %v3042_v24  ;;  %v3156_v53 = vpop.f32.mrf.mxu2  ;;  %v3267_v41 = vpop.f32.mrf.mxu3 }
 0x45a   :  { %v3137_v45 = vadd.f32 %v3136_v15, %v3038_v22  ;;  %v3250_v28 = vadd.f32 %v3249_v0, %v3142_v38  ;;  %v2893_v0 = vadd.f32 %v5179_v58, %v5160_v1  ;;  %v2901_v1 = vadd.f32 %v5179_v58, %v5166_v7 }
 0x45c   :  { %v3244_v57 = vadd.f32 %v3243_v63, %v3137_v45  ;;  %v3256_v63 = vadd.f32 %v3255_v26, %v3147_v6  ;;  %v3054_v10 = vadd.f32 %v5156_v5, %v2893_v0  ;;  %v3058_v5 = vadd.f32 %v5162_v60, %v2901_v1 }
 0x45d   :  { %v2972_v51 = vpop.f32.mrf.mxu0  ;;  %v3461_v44 = vpop.f32.mrf.mxu1 }
 0x45e   :  { %v2973_v61 = vadd.f32 %v5179_v58, %v2972_v51  ;;  %v3262_v51 = vadd.f32 %v3261_v27, %v3152_v59  ;;  %v3157_v26 = vadd.f32 %v3156_v53, %v3054_v10 }
 0x460   :  { %v5222_v37 = vadd.f32 %v3093_v18, %v2973_v61  ;;  %3431 = vmatmul.f32.gmra.mxu0 %v5123_v14  ;;  %v3161_v4 = vpop.f32.mrf.mxu2  ;;  %v3273_v52 = vpop.f32.mrf.mxu3 }
 0x461   :  { %v3162_v49 = vadd.f32 %v3161_v4, %v3058_v5 }
 0x463   :  { %v3274_v24 = vadd.f32 %v3273_v52, %v3162_v49 }
 0x465   :  { %v3372_v43 = vpop.f32.mrf.mxu0  ;;  %v3465_v25 = vpop.f32.mrf.mxu1 }
 0x466   :  { %v3373_v46 = vadd.f32 %v3372_v43, %v3238_v11  ;;  %v3268_v43 = vadd.f32 %v3267_v41, %v3157_v26 }
 0x468   :  { %v3462_v32 = vadd.f32 %v3461_v44, %v3373_v46  ;;  %v3166_v61 = vpop.f32.mrf.mxu2  ;;  %v3279_v22 = vpop.f32.mrf.mxu3 }
 0x46a   :  { %3573 = vtanh.f32 %v3462_v32  ;;  %v2909_v32 = vadd.f32 %v5179_v58, %v5172_v55 }
 0x46c   :  { %v3062_v27 = vadd.f32 %v5168_v47, %v2909_v32 }
 0x46d   :  { %v3376_v56 = vpop.f32.mrf.mxu0  ;;  %v3469_v14 = vpop.f32.mrf.mxu1 }
 0x46e   :  { %v3377_v42 = vadd.f32 %v3376_v56, %v3244_v57  ;;  %v3167_v38 = vadd.f32 %v3166_v61, %v3062_v27 }
 0x470   :  { %v3574_v35 = vpop.eup %3573  ;;  %v3466_v17 = vadd.f32 %v3465_v25, %v3377_v42  ;;  %v3171_v7 = vpop.f32.mrf.mxu2  ;;  %v3280_v58 = vadd.f32 %v3279_v22, %v3167_v38 }
 0x471   :  { %3541 = vst.msk [vmem:[%s5318_s2] sm:$0xff] %vm3540_vm4, %v3574_v35  ;;  %v3285_v60 = vpop.f32.mrf.mxu3 }
 0x472   :  { %3575 = vtanh.f32 %v3466_v17 }
 0x475   :  { %v3380_v62 = vpop.f32.mrf.mxu0  ;;  %v3473_v54 = vpop.f32.mrf.mxu1 }
 0x476   :  { %v3381_v8 = vadd.f32 %v3380_v62, %v3250_v28  ;;  %v3172_v62 = vadd.f32 %v3171_v7, %v5182_v30 }
 0x478   :  { %v3576_v15 = vpop.eup %3575  ;;  %v3470_v2 = vadd.f32 %v3469_v14, %v3381_v8  ;;  %v3176_v55 = vpop.f32.mrf.mxu2  ;;  %v3286_v41 = vadd.f32 %v3285_v60, %v3172_v62 }
 0x479   :  { %3542 = vst.msk [vmem:[%s5318_s2 + $0x8] sm:$0xff] %vm3540_vm4, %v3576_v15  ;;  %v3291_v31 = vpop.f32.mrf.mxu3 }
 0x47a   :  { %3577 = vtanh.f32 %v3470_v2 }
 0x47d   :  { %v3384_v20 = vpop.f32.mrf.mxu0  ;;  %v3477_v13 = vpop.f32.mrf.mxu1 }
 0x47e   :  { %v3385_v18 = vadd.f32 %v3384_v20, %v3256_v63  ;;  %v3177_v63 = vadd.f32 %v3176_v55, %v5187_v12 }
 0x480   :  { %v3578_v34 = vpop.eup %3577  ;;  %v3474_v3 = vadd.f32 %v3473_v54, %v3385_v18  ;;  %v3181_v8 = vpop.f32.mrf.mxu2  ;;  %v3292_v30 = vadd.f32 %v3291_v31, %v3177_v63 }
 0x481   :  { %3543 = vst.msk [vmem:[%s5318_s2 + $0x10] sm:$0xff] %vm3540_vm4, %v3578_v34  ;;  %v3297_v4 = vpop.f32.mrf.mxu3  ;;  %v3182_v0 = vadd.f32 %v3181_v8, %v5192_v16 }
 0x482   :  { %3579 = vtanh.f32 %v3474_v3 }
 0x483   :  { %v3298_v3 = vadd.f32 %v3297_v4, %v3182_v0 }
 0x485   :  { %v3388_v44 = vpop.f32.mrf.mxu0  ;;  %v3481_v19 = vpop.f32.mrf.mxu1 }
 0x486   :  { %v3389_v36 = vadd.f32 %v3388_v44, %v3262_v51 }
 0x488   :  { %v3580_v9 = vpop.eup %3579  ;;  %v3478_v11 = vadd.f32 %v3477_v13, %v3389_v36  ;;  %v3186_v34 = vpop.f32.mrf.mxu2 }
 0x489   :  { %3544 = vst.msk [vmem:[%s5318_s2 + $0x18] sm:$0xff] %vm3540_vm4, %v3580_v9  ;;  %v3303_v12 = vpop.f32.mrf.mxu3  ;;  %v3187_v61 = vadd.f32 %v3186_v34, %v5197_v40 }
 0x48a   :  { %3581 = vtanh.f32 %v3478_v11 }
 0x48b   :  { %v3304_v16 = vadd.f32 %v3303_v12, %v3187_v61 }
 0x48d   :  { %v3392_v25 = vpop.f32.mrf.mxu0  ;;  %v3485_v46 = vpop.f32.mrf.mxu1 }
 0x48e   :  { %v3393_v45 = vadd.f32 %v3392_v25, %v3268_v43 }
 0x490   :  { %v3582_v39 = vpop.eup %3581  ;;  %v3482_v57 = vadd.f32 %v3481_v19, %v3393_v45  ;;  %v3191_v9 = vpop.f32.mrf.mxu2 }
 0x491   :  { %3545 = vst.msk [vmem:[%s5318_s2 + $0x20] sm:$0xff] %vm3540_vm4, %v3582_v39  ;;  %v3309_v26 = vpop.f32.mrf.mxu3  ;;  %v3192_v43 = vadd.f32 %v3191_v9, %v5202_v21 }
 0x492   :  { %3583 = vtanh.f32 %v3482_v57 }
 0x495   :  { %v3396_v56 = vpop.f32.mrf.mxu0  ;;  %v3489_v14 = vpop.f32.mrf.mxu1 }
 0x496   :  { %v3397_v42 = vadd.f32 %v3396_v56, %v3274_v24 }
 0x498   :  { %v3584_v35 = vpop.eup %3583  ;;  %v3486_v29 = vadd.f32 %v3485_v46, %v3397_v42  ;;  %v3196_v25 = vpop.f32.mrf.mxu2  ;;  %v3310_v46 = vadd.f32 %v3309_v26, %v3192_v43 }
 0x499   :  { %3546 = vst.msk [vmem:[%s5318_s2 + $0x28] sm:$0xff] %vm3540_vm4, %v3584_v35  ;;  %v3315_v49 = vpop.f32.mrf.mxu3  ;;  %v3197_v7 = vadd.f32 %v3196_v25, %v5207_v50 }
 0x49a   :  { %3585 = vtanh.f32 %v3486_v29 }
 0x49b   :  { %v3316_v24 = vadd.f32 %v3315_v49, %v3197_v7 }
 0x49d   :  { %v3400_v17 = vpop.f32.mrf.mxu0  ;;  %v3493_v53 = vpop.f32.mrf.mxu1 }
 0x49e   :  { %v3401_v28 = vadd.f32 %v3400_v17, %v3280_v58 }
 0x4a0   :  { %v3586_v47 = vpop.eup %3585  ;;  %v3490_v54 = vadd.f32 %v3489_v14, %v3401_v28  ;;  %v3201_v27 = vpop.f32.mrf.mxu2 }
 0x4a1   :  { %3547 = vst.msk [vmem:[%s5318_s2 + $0x30] sm:$0xff] %vm3540_vm4, %v3586_v47  ;;  %v3202_v42 = vadd.f32 %v3201_v27, %v5214_v33  ;;  %v3321_v38 = vpop.f32.mrf.mxu3 }
 0x4a2   :  { %3587 = vtanh.f32 %v3490_v54 }
 0x4a3   :  { %v3322_v50 = vadd.f32 %v3321_v38, %v3202_v42 }
 0x4a5   :  { %v3404_v15 = vpop.f32.mrf.mxu0  ;;  %v3497_v6 = vpop.f32.mrf.mxu1 }
 0x4a6   :  { %v3405_v23 = vadd.f32 %v3404_v15, %v3286_v41 }
 0x4a8   :  { %v3588_v2 = vpop.eup %3587  ;;  %v3494_v48 = vadd.f32 %v3493_v53, %v3405_v23  ;;  %v3206_v17 = vpop.f32.mrf.mxu2 }
 0x4a9   :  { %3548 = vst.msk [vmem:[%s5318_s2 + $0x38] sm:$0xff] %vm3540_vm4, %v3588_v2  ;;  %v3207_v28 = vadd.f32 %v3206_v17, %v5222_v37  ;;  %v3327_v33 = vpop.f32.mrf.mxu3 }
 0x4aa   :  { %3589 = vtanh.f32 %v3494_v48 }
 0x4ab   :  { %v3328_v47 = vadd.f32 %v3327_v33, %v3207_v28 }
 0x4ad   :  { %v3408_v20 = vpop.f32.mrf.mxu0  ;;  %v3501_v13 = vpop.f32.mrf.mxu1 }
 0x4ae   :  { %v3409_v18 = vadd.f32 %v3408_v20, %v3292_v30 }
 0x4b0   :  { %v3590_v59 = vpop.eup %3589  ;;  %v3498_v52 = vadd.f32 %v3497_v6, %v3409_v18 }
 0x4b1   :  { %3549 = vst.msk [vmem:[%s5318_s2 + $0x40] sm:$0xff] %vm3540_vm4, %v3590_v59 }
 0x4b2   :  { %3591 = vtanh.f32 %v3498_v52 }
 0x4b5   :  { %v3412_v51 = vpop.f32.mrf.mxu0  ;;  %v3505_v44 = vpop.f32.mrf.mxu1 }
 0x4b6   :  { %v3413_v10 = vadd.f32 %v3412_v51, %v3298_v3 }
 0x4b8   :  { %v3592_v19 = vpop.eup %3591  ;;  %v3502_v36 = vadd.f32 %v3501_v13, %v3413_v10 }
 0x4b9   :  { %3550 = vst.msk [vmem:[%s5318_s2 + $0x48] sm:$0xff] %vm3540_vm4, %v3592_v19 }
 0x4ba   :  { %3593 = vtanh.f32 %v3502_v36 }
 0x4bd   :  { %v3416_v1 = vpop.f32.mrf.mxu0  ;;  %v3509_v40 = vpop.f32.mrf.mxu1 }
 0x4be   :  { %v3417_v11 = vadd.f32 %v3416_v1, %v3304_v16 }
 0x4c0   :  { %v3594_v22 = vpop.eup %3593  ;;  %v3506_v5 = vadd.f32 %v3505_v44, %v3417_v11 }
 0x4c1   :  { %3551 = vst.msk [vmem:[%s5318_s2 + $0x50] sm:$0xff] %vm3540_vm4, %v3594_v22 }
 0x4c2   :  { %3595 = vtanh.f32 %v3506_v5 }
 0x4c5   :  { %v3420_v45 = vpop.f32.mrf.mxu0  ;;  %v3513_v21 = vpop.f32.mrf.mxu1 }
 0x4c6   :  { %v3421_v39 = vadd.f32 %v3420_v45, %v3310_v46 }
 0x4c8   :  { %v3596_v32 = vpop.eup %3595  ;;  %v3510_v57 = vadd.f32 %v3509_v40, %v3421_v39 }
 0x4c9   :  { %3552 = vst.msk [vmem:[%s5318_s2 + $0x58] sm:$0xff] %vm3540_vm4, %v3596_v32 }
 0x4ca   :  { %3597 = vtanh.f32 %v3510_v57 }
 0x4cd   :  { %v3424_v60 = vpop.f32.mrf.mxu0  ;;  %v3517_v29 = vpop.f32.mrf.mxu1 }
 0x4ce   :  { %v3425_v56 = vadd.f32 %v3424_v60, %v3316_v24 }
 0x4d0   :  { %v3598_v14 = vpop.eup %3597  ;;  %v3514_v35 = vadd.f32 %v3513_v21, %v3425_v56 }
 0x4d1   :  { %3553 = vst.msk [vmem:[%s5318_s2 + $0x60] sm:$0xff] %vm3540_vm4, %v3598_v14 }
 0x4d2   :  { %3599 = vtanh.f32 %v3514_v35 }
 0x4d5   :  { %v3428_v55 = vpop.f32.mrf.mxu0  ;;  %v3521_v41 = vpop.f32.mrf.mxu1 }
 0x4d6   :  { %v3429_v58 = vadd.f32 %v3428_v55, %v3322_v50 }
 0x4d8   :  { %v3600_v53 = vpop.eup %3599  ;;  %v3518_v31 = vadd.f32 %v3517_v29, %v3429_v58 }
 0x4d9   :  { %3554 = vst.msk [vmem:[%s5318_s2 + $0x68] sm:$0xff] %vm3540_vm4, %v3600_v53 }
 0x4da   :  { %3601 = vtanh.f32 %v3518_v31 }
 0x4dd   :  { %v3432_v62 = vpop.f32.mrf.mxu0 }
 0x4de   :  { %v3433_v54 = vadd.f32 %v3432_v62, %v3328_v47 }
 0x4e0   :  { %v3602_v8 = vpop.eup %3601  ;;  %v3522_v15 = vadd.f32 %v3521_v41, %v3433_v54 }
 0x4e1   :  { %3555 = vst.msk [vmem:[%s5318_s2 + $0x70] sm:$0xff] %vm3540_vm4, %v3602_v8 }
 0x4e2   :  { %3603 = vtanh.f32 %v3522_v15 }
 0x4e8   :  { %v3604_v37 = vpop.eup %3603 }
 0x4e9   :  { %3556 = vst.msk [vmem:[%s5318_s2 + $0x78] sm:$0xff] %vm3540_vm4, %v3604_v37 }

</bundles_post_ra>
